<compile_context>
chip_gen: v7x
topology: tpu7x:2x2x1
jax: 0.10.0
libtpu: 0.0.40
codegen_flags: <defaults>
</compile_context>

<pallas_src>
import jax
import jax.numpy as jnp
from jax.experimental import pallas as pl
from jax.experimental.pallas import tpu as pltpu


# ----------------------------- fused Pallas kernel ---------------------------

def _make_fused_kernel(L, S, B, Bp, D, H, Wpad):
    """Fused (L-layer LSTM + FC) kernel. Bp = padded batch, Wpad = padded d_in."""

    def kernel(x_ref, wih_ref, whh_ref, b_ref, fcw_ref, fcb_ref,
               out_ref, xw_scr, hseq_scr):
        # ---- in-kernel layout: batch-first x -> zeroed, padded, time-major ---
        # hseq_scr rows [t*Bp : t*Bp+Bp] hold timestep t of the current layer's
        # input sequence.  Zero first so padded batch rows / padded feature
        # columns are exactly zero (they multiply zero-padded W_ih rows).
        hseq_scr[...] = jnp.zeros_like(hseq_scr)
        for t in range(S):
            hseq_scr[t * Bp: t * Bp + B, :D] = x_ref[:, t, :]

        h = jnp.zeros((Bp, H), jnp.float32)
        for l in range(L):
            wih = wih_ref[l]            # (Wpad, 4H) bf16 (g-gate cols pre-scaled x2)
            whh = whh_ref[l]            # (H,    4H) bf16 (g-gate cols pre-scaled x2)
            b = b_ref[l]                # (1,    4H) f32  (b_ih+b_hh, g cols x2)

            # ---- hoisted input projection (one matmul, off the serial chain).
            # Full-ref read of hseq_scr happens (trace order) BEFORE any write
            # to it in the recurrence below -- required for correctness.
            inp = hseq_scr[...].astype(jnp.bfloat16)          # (S*Bp, Wpad)
            xw_scr[...] = (
                jnp.dot(inp, wih, preferred_element_type=jnp.float32) + b
            )

            # ---- serial time recurrence, fully unrolled (static S) ----------
            h = jnp.zeros((Bp, H), jnp.float32)
            c = jnp.zeros((Bp, H), jnp.float32)
            for t in range(S):
                gates = (
                    jnp.dot(h.astype(jnp.bfloat16), whh,
                            preferred_element_type=jnp.float32)
                    + xw_scr[t * Bp:(t + 1) * Bp, :]
                )                                             # (Bp, 4H) f32
                # one EUP pass for all four gates; gate order [i, f, g, o]
                sig = jax.nn.sigmoid(gates)
                i_g = sig[:, 0:H]
                f_g = sig[:, H:2 * H]
                g_g = 2.0 * sig[:, 2 * H:3 * H] - 1.0   # tanh(z) = 2*sigmoid(2z)-1
                o_g = sig[:, 3 * H:4 * H]
                c = f_g * c + i_g * g_g
                h = o_g * jnp.tanh(c)
                if l < L - 1:                 # last layer only needs h_last
                    hseq_scr[t * Bp:(t + 1) * Bp, :H] = h

        # ---- fused FC on the last timestep of the last layer (f32, one-time) -
        res = jnp.dot(h, fcw_ref[...], preferred_element_type=jnp.float32) \
            + fcb_ref[...]
        out_ref[...] = res[:B, :]             # drop batch padding in-kernel

    return kernel


# --------------------------------- wrapper -----------------------------------

def lstm_classifier_forward(x, params):
    """Mirrors LSTMClassifier.forward: x is (B, S, D) batch-first (PyTorch)."""
    wih_all, whh_all, b_all, fc_w_t, fc_b = params
    B, S, D = x.shape
    L, H, _ = whh_all.shape
    Wpad = wih_all.shape[1]
    O = fc_w_t.shape[1]
    Bp = max(8, ((B + 7) // 8) * 8)           # full sublane group

    kernel = _make_fused_kernel(L, S, B, Bp, D, H, Wpad)
    return pl.pallas_call(
        kernel,
        out_shape=jax.ShapeDtypeStruct((B, O), jnp.float32),
        scratch_shapes=[
            pltpu.VMEM((S * Bp, 4 * H), jnp.float32),   # hoisted x @ W_ih^T + bias
            pltpu.VMEM((S * Bp, Wpad), jnp.float32),    # padded, time-major layer input
        ],
    )(x, wih_all, whh_all, b_all, fc_w_t, fc_b)


# --------------------------- parameter creation / prep ------------------------

def init_raw_params(key, input_size, hidden_size, num_layers, output_size):
    """PyTorch-layout f32 parameters (for the reference and for prep)."""
    k = 1.0 / (hidden_size ** 0.5)
    lstm_raw = []
    for layer in range(num_layers):
        d_in = input_size if layer == 0 else hidden_size
        key, k1, k2, k3, k4 = jax.random.split(key, 5)
        w_ih = jax.random.uniform(k1, (4 * hidden_size, d_in), jnp.float32, -k, k)
        w_hh = jax.random.uniform(k2, (4 * hidden_size, hidden_size), jnp.float32, -k, k)
        b_ih = jax.random.uniform(k3, (4 * hidden_size,), jnp.float32, -k, k)
        b_hh = jax.random.uniform(k4, (4 * hidden_size,), jnp.float32, -k, k)
        lstm_raw.append((w_ih, w_hh, b_ih, b_hh))
    key, k5, k6 = jax.random.split(key, 3)
    fc_w = jax.random.uniform(k5, (output_size, hidden_size), jnp.float32, -k, k)
    fc_b = jax.random.uniform(k6, (output_size,), jnp.float32, -k, k)
    return lstm_raw, fc_w, fc_b


def prepare_kernel_params(lstm_raw, fc_w, fc_b):
    """One-time weight prep: transpose, stack, pad layer-0 d_in, fold the
    2*sigmoid(2x)-1 trick into the g-gate columns, cast matmul weights to bf16."""
    H = lstm_raw[0][1].shape[1]
    D = lstm_raw[0][0].shape[1]
    Wpad = max(D, H)
    gate_scale = jnp.ones((1, 4 * H), jnp.float32).at[:, 2 * H:3 * H].set(2.0)

    wih_list, whh_list, b_list = [], [], []
    for (w_ih, w_hh, b_ih, b_hh) in lstm_raw:
        wih_t = w_ih.T                                        # (d_in, 4H)
        wih_t = jnp.pad(wih_t, ((0, Wpad - wih_t.shape[0]), (0, 0)))
        whh_t = w_hh.T                                        # (H, 4H)
        b = (b_ih + b_hh).reshape(1, 4 * H)
        wih_list.append(wih_t * gate_scale)
        whh_list.append(whh_t * gate_scale)
        b_list.append(b * gate_scale)

    wih_all = jnp.stack(wih_list).astype(jnp.bfloat16)        # (L, Wpad, 4H)
    whh_all = jnp.stack(whh_list).astype(jnp.bfloat16)        # (L, H,    4H)
    b_all = jnp.stack(b_list)                                 # (L, 1,    4H) f32
    return wih_all, whh_all, b_all, fc_w.T, fc_b.reshape(1, -1)


# ------------------------------ pure-JAX reference ----------------------------

def reference_forward(x, lstm_raw, fc_w, fc_b):
    B = x.shape[0]
    h_seq = jnp.transpose(x, (1, 0, 2))                       # (S, B, D)
    for (w_ih, w_hh, b_ih, b_hh) in lstm_raw:
        H = w_hh.shape[1]
        wih_t, whh_t = w_ih.T, w_hh.T
        b = (b_ih + b_hh).reshape(1, -1)

        def step(carry, x_t, wih_t=wih_t, whh_t=whh_t, b=b, H=H):
            h, c = carry
            gates = x_t @ wih_t + h @ whh_t + b
            i = jax.nn.sigmoid(gates[:, 0:H])
            f = jax.nn.sigmoid(gates[:, H:2 * H])
            g = jnp.tanh(gates[:, 2 * H:3 * H])
            o = jax.nn.sigmoid(gates[:, 3 * H:4 * H])
            c = f * c + i * g
            h = o * jnp.tanh(c)
            return (h, c), h

        (_, _), h_seq = jax.lax.scan(
            step,
            (jnp.zeros((B, H), jnp.float32), jnp.zeros((B, H), jnp.float32)),
            h_seq,
        )
    return h_seq[-1] @ fc_w.T + fc_b.reshape(1, -1)


# ---------------------------------- main --------------------------------------

if __name__ == "__main__":
    batch = 2
    seq_len = 8
    input_size = 16
    hidden_size = 32
    num_layers = 4
    output_size = 1

    key = jax.random.PRNGKey(0)
    key, pkey, xkey = jax.random.split(key, 3)

    lstm_raw, fc_w, fc_b = init_raw_params(
        pkey, input_size, hidden_size, num_layers, output_size
    )
    params = prepare_kernel_params(lstm_raw, fc_w, fc_b)
    x = jax.random.normal(xkey, (batch, seq_len, input_size), jnp.float32)

    out = jax.block_until_ready(lstm_classifier_forward(x, params))
    ref = jax.block_until_ready(reference_forward(x, lstm_raw, fc_w, fc_b))

    assert out.shape == (batch, output_size), out.shape
    # bf16 MXU operands -> slightly looser tolerance than a pure-f32 kernel.
    assert jnp.allclose(out, ref, atol=2e-2, rtol=2e-2), (out, ref)

    print("KERNEL_OK")
</pallas_src>

<mosaic_0001>
module attributes {stable_mosaic.version = 11 : i64} {
  func.func @kernel(%arg0: memref<2x8x16xf32, #tpu.memory_space<vmem>>, %arg1: memref<4x32x128xbf16, #tpu.memory_space<vmem>>, %arg2: memref<4x32x128xbf16, #tpu.memory_space<vmem>>, %arg3: memref<4x1x128xf32, #tpu.memory_space<vmem>>, %arg4: memref<32x1xf32, #tpu.memory_space<vmem>>, %arg5: memref<1x1xf32, #tpu.memory_space<vmem>>, %arg6: memref<2x1xf32, #tpu.memory_space<vmem>>, %arg7: memref<64x128xf32, #tpu.memory_space<vmem>>, %arg8: memref<64x32xf32, #tpu.memory_space<vmem>>) attributes {dimension_semantics = [], scalar_prefetch = 0 : i64, scratch_operands = 2 : i64, tpu.core_type = #tpu.core_type<tc>} {
    %cst = arith.constant 0.000000e+00 : f32
    %0 = vector.broadcast %cst : f32 to vector<64x32xf32>
    %c0 = arith.constant 0 : index
    %c0_0 = arith.constant 0 : index
    %1 = vector.load %arg8[%c0, %c0_0] : memref<64x32xf32, #tpu.memory_space<vmem>>, vector<64x32xf32>
    tpu.vector_store %arg8[%c0, %c0_0], %0 {strides = array<i32>} : memref<64x32xf32, #tpu.memory_space<vmem>>, vector<64x32xf32>,
    %c0_1 = arith.constant 0 : index
    %c0_2 = arith.constant 0 : index
    %c0_3 = arith.constant 0 : index
    %2 = vector.load %arg0[%c0_1, %c0_2, %c0_3] : memref<2x8x16xf32, #tpu.memory_space<vmem>>, vector<2x1x16xf32>
    %3 = vector.shape_cast %2 : vector<2x1x16xf32> to vector<2x16xf32>
    %c0_4 = arith.constant 0 : index
    %c0_5 = arith.constant 0 : index
    %4 = vector.load %arg8[%c0_4, %c0_5] : memref<64x32xf32, #tpu.memory_space<vmem>>, vector<2x16xf32>
    tpu.vector_store %arg8[%c0_4, %c0_5], %3 {strides = array<i32>} : memref<64x32xf32, #tpu.memory_space<vmem>>, vector<2x16xf32>,
    %c0_6 = arith.constant 0 : index
    %c1 = arith.constant 1 : index
    %c0_7 = arith.constant 0 : index
    %5 = vector.load %arg0[%c0_6, %c1, %c0_7] : memref<2x8x16xf32, #tpu.memory_space<vmem>>, vector<2x1x16xf32>
    %6 = vector.shape_cast %5 : vector<2x1x16xf32> to vector<2x16xf32>
    %c8 = arith.constant 8 : index
    %c0_8 = arith.constant 0 : index
    %7 = vector.load %arg8[%c8, %c0_8] : memref<64x32xf32, #tpu.memory_space<vmem>>, vector<2x16xf32>
    tpu.vector_store %arg8[%c8, %c0_8], %6 {strides = array<i32>} : memref<64x32xf32, #tpu.memory_space<vmem>>, vector<2x16xf32>,
    %c0_9 = arith.constant 0 : index
    %c2 = arith.constant 2 : index
    %c0_10 = arith.constant 0 : index
    %8 = vector.load %arg0[%c0_9, %c2, %c0_10] : memref<2x8x16xf32, #tpu.memory_space<vmem>>, vector<2x1x16xf32>
    %9 = vector.shape_cast %8 : vector<2x1x16xf32> to vector<2x16xf32>
    %c16 = arith.constant 16 : index
    %c0_11 = arith.constant 0 : index
    %10 = vector.load %arg8[%c16, %c0_11] : memref<64x32xf32, #tpu.memory_space<vmem>>, vector<2x16xf32>
    tpu.vector_store %arg8[%c16, %c0_11], %9 {strides = array<i32>} : memref<64x32xf32, #tpu.memory_space<vmem>>, vector<2x16xf32>,
    %c0_12 = arith.constant 0 : index
    %c3 = arith.constant 3 : index
    %c0_13 = arith.constant 0 : index
    %11 = vector.load %arg0[%c0_12, %c3, %c0_13] : memref<2x8x16xf32, #tpu.memory_space<vmem>>, vector<2x1x16xf32>
    %12 = vector.shape_cast %11 : vector<2x1x16xf32> to vector<2x16xf32>
    %c24 = arith.constant 24 : index
    %c0_14 = arith.constant 0 : index
    %13 = vector.load %arg8[%c24, %c0_14] : memref<64x32xf32, #tpu.memory_space<vmem>>, vector<2x16xf32>
    tpu.vector_store %arg8[%c24, %c0_14], %12 {strides = array<i32>} : memref<64x32xf32, #tpu.memory_space<vmem>>, vector<2x16xf32>,
    %c0_15 = arith.constant 0 : index
    %c4 = arith.constant 4 : index
    %c0_16 = arith.constant 0 : index
    %14 = vector.load %arg0[%c0_15, %c4, %c0_16] : memref<2x8x16xf32, #tpu.memory_space<vmem>>, vector<2x1x16xf32>
    %15 = vector.shape_cast %14 : vector<2x1x16xf32> to vector<2x16xf32>
    %c32 = arith.constant 32 : index
    %c0_17 = arith.constant 0 : index
    %16 = vector.load %arg8[%c32, %c0_17] : memref<64x32xf32, #tpu.memory_space<vmem>>, vector<2x16xf32>
    tpu.vector_store %arg8[%c32, %c0_17], %15 {strides = array<i32>} : memref<64x32xf32, #tpu.memory_space<vmem>>, vector<2x16xf32>,
    %c0_18 = arith.constant 0 : index
    %c5 = arith.constant 5 : index
    %c0_19 = arith.constant 0 : index
    %17 = vector.load %arg0[%c0_18, %c5, %c0_19] : memref<2x8x16xf32, #tpu.memory_space<vmem>>, vector<2x1x16xf32>
    %18 = vector.shape_cast %17 : vector<2x1x16xf32> to vector<2x16xf32>
    %c40 = arith.constant 40 : index
    %c0_20 = arith.constant 0 : index
    %19 = vector.load %arg8[%c40, %c0_20] : memref<64x32xf32, #tpu.memory_space<vmem>>, vector<2x16xf32>
    tpu.vector_store %arg8[%c40, %c0_20], %18 {strides = array<i32>} : memref<64x32xf32, #tpu.memory_space<vmem>>, vector<2x16xf32>,
    %c0_21 = arith.constant 0 : index
    %c6 = arith.constant 6 : index
    %c0_22 = arith.constant 0 : index
    %20 = vector.load %arg0[%c0_21, %c6, %c0_22] : memref<2x8x16xf32, #tpu.memory_space<vmem>>, vector<2x1x16xf32>
    %21 = vector.shape_cast %20 : vector<2x1x16xf32> to vector<2x16xf32>
    %c48 = arith.constant 48 : index
    %c0_23 = arith.constant 0 : index
    %22 = vector.load %arg8[%c48, %c0_23] : memref<64x32xf32, #tpu.memory_space<vmem>>, vector<2x16xf32>
    tpu.vector_store %arg8[%c48, %c0_23], %21 {strides = array<i32>} : memref<64x32xf32, #tpu.memory_space<vmem>>, vector<2x16xf32>,
    %c0_24 = arith.constant 0 : index
    %c7 = arith.constant 7 : index
    %c0_25 = arith.constant 0 : index
    %23 = vector.load %arg0[%c0_24, %c7, %c0_25] : memref<2x8x16xf32, #tpu.memory_space<vmem>>, vector<2x1x16xf32>
    %24 = vector.shape_cast %23 : vector<2x1x16xf32> to vector<2x16xf32>
    %c56 = arith.constant 56 : index
    %c0_26 = arith.constant 0 : index
    %25 = vector.load %arg8[%c56, %c0_26] : memref<64x32xf32, #tpu.memory_space<vmem>>, vector<2x16xf32>
    tpu.vector_store %arg8[%c56, %c0_26], %24 {strides = array<i32>} : memref<64x32xf32, #tpu.memory_space<vmem>>, vector<2x16xf32>,
    %c0_27 = arith.constant 0 : index
    %c0_28 = arith.constant 0 : index
    %c0_29 = arith.constant 0 : index
    %26 = vector.load %arg1[%c0_27, %c0_28, %c0_29] : memref<4x32x128xbf16, #tpu.memory_space<vmem>>, vector<1x32x128xbf16>
    %27 = vector.shape_cast %26 : vector<1x32x128xbf16> to vector<32x128xbf16>
    %c0_30 = arith.constant 0 : index
    %c0_31 = arith.constant 0 : index
    %c0_32 = arith.constant 0 : index
    %28 = vector.load %arg2[%c0_30, %c0_31, %c0_32] : memref<4x32x128xbf16, #tpu.memory_space<vmem>>, vector<1x32x128xbf16>
    %29 = vector.shape_cast %28 : vector<1x32x128xbf16> to vector<32x128xbf16>
    %c0_33 = arith.constant 0 : index
    %c0_34 = arith.constant 0 : index
    %c0_35 = arith.constant 0 : index
    %30 = vector.load %arg3[%c0_33, %c0_34, %c0_35] : memref<4x1x128xf32, #tpu.memory_space<vmem>>, vector<1x1x128xf32>
    %31 = vector.shape_cast %30 : vector<1x1x128xf32> to vector<1x128xf32>
    %c0_36 = arith.constant 0 : index
    %c0_37 = arith.constant 0 : index
    %32 = vector.load %arg8[%c0_36, %c0_37] : memref<64x32xf32, #tpu.memory_space<vmem>>, vector<64x32xf32>
    %33 = arith.truncf %32 : vector<64x32xf32> to vector<64x32xbf16>
    %cst_38 = arith.constant dense<0.000000e+00> : vector<64x128xf32>
    %34 = tpu.matmul %33, %27, %cst_38 {dimension_numbers = #tpu.dot_dimension_numbers<[1], [0], [0], [1], [0, 0, 1, 1], [], []>} : vector<64x32xbf16>, vector<32x128xbf16>, vector<64x128xf32> -> vector<64x128xf32>
    %35 = vector.broadcast %31 : vector<1x128xf32> to vector<64x128xf32>
    %36 = arith.addf %34, %35 : vector<64x128xf32>
    %c0_39 = arith.constant 0 : index
    %c0_40 = arith.constant 0 : index
    %37 = vector.load %arg7[%c0_39, %c0_40] : memref<64x128xf32, #tpu.memory_space<vmem>>, vector<64x128xf32>
    tpu.vector_store %arg7[%c0_39, %c0_40], %36 {strides = array<i32>} : memref<64x128xf32, #tpu.memory_space<vmem>>, vector<64x128xf32>,
    %cst_41 = arith.constant 0.000000e+00 : f32
    %38 = vector.broadcast %cst_41 : f32 to vector<8x32xf32>
    %cst_42 = arith.constant 0.000000e+00 : f32
    %39 = vector.broadcast %cst_42 : f32 to vector<8x32xf32>
    %40 = arith.truncf %38 : vector<8x32xf32> to vector<8x32xbf16>
    %cst_43 = arith.constant dense<0.000000e+00> : vector<8x128xf32>
    %41 = tpu.matmul %40, %29, %cst_43 {dimension_numbers = #tpu.dot_dimension_numbers<[1], [0], [0], [1], [0, 0, 1, 1], [], []>} : vector<8x32xbf16>, vector<32x128xbf16>, vector<8x128xf32> -> vector<8x128xf32>
    %c0_44 = arith.constant 0 : index
    %c0_45 = arith.constant 0 : index
    %42 = vector.load %arg7[%c0_44, %c0_45] : memref<64x128xf32, #tpu.memory_space<vmem>>, vector<8x128xf32>
    %43 = arith.addf %41, %42 : vector<8x128xf32>
    %44 = arith.negf %43 : vector<8x128xf32>
    %45 = math.exp %44 : vector<8x128xf32>
    %cst_46 = arith.constant 1.000000e+00 : f32
    %46 = vector.broadcast %cst_46 : f32 to vector<8x128xf32>
    %47 = arith.addf %46, %45 : vector<8x128xf32>
    %48 = arith.divf %46, %47 : vector<8x128xf32>
    %49 = vector.extract_strided_slice %48 {offsets = [0, 0], sizes = [8, 32], strides = [1, 1]} : vector<8x128xf32> to vector<8x32xf32>
    %50 = vector.extract_strided_slice %48 {offsets = [0, 32], sizes = [8, 32], strides = [1, 1]} : vector<8x128xf32> to vector<8x32xf32>
    %51 = vector.extract_strided_slice %48 {offsets = [0, 64], sizes = [8, 32], strides = [1, 1]} : vector<8x128xf32> to vector<8x32xf32>
    %cst_47 = arith.constant 2.000000e+00 : f32
    %52 = vector.broadcast %cst_47 : f32 to vector<8x32xf32>
    %53 = arith.mulf %52, %51 : vector<8x32xf32>
    %cst_48 = arith.constant 1.000000e+00 : f32
    %54 = vector.broadcast %cst_48 : f32 to vector<8x32xf32>
    %55 = arith.subf %53, %54 : vector<8x32xf32>
    %56 = vector.extract_strided_slice %48 {offsets = [0, 96], sizes = [8, 32], strides = [1, 1]} : vector<8x128xf32> to vector<8x32xf32>
    %57 = arith.mulf %50, %39 : vector<8x32xf32>
    %58 = arith.mulf %49, %55 : vector<8x32xf32>
    %59 = arith.addf %57, %58 : vector<8x32xf32>
    %60 = math.tanh %59 : vector<8x32xf32>
    %61 = arith.mulf %56, %60 : vector<8x32xf32>
    %c0_49 = arith.constant 0 : index
    %c0_50 = arith.constant 0 : index
    %62 = vector.load %arg8[%c0_49, %c0_50] : memref<64x32xf32, #tpu.memory_space<vmem>>, vector<8x32xf32>
    tpu.vector_store %arg8[%c0_49, %c0_50], %61 {strides = array<i32>} : memref<64x32xf32, #tpu.memory_space<vmem>>, vector<8x32xf32>,
    %63 = arith.truncf %61 : vector<8x32xf32> to vector<8x32xbf16>
    %cst_51 = arith.constant dense<0.000000e+00> : vector<8x128xf32>
    %64 = tpu.matmul %63, %29, %cst_51 {dimension_numbers = #tpu.dot_dimension_numbers<[1], [0], [0], [1], [0, 0, 1, 1], [], []>} : vector<8x32xbf16>, vector<32x128xbf16>, vector<8x128xf32> -> vector<8x128xf32>
    %c8_52 = arith.constant 8 : index
    %c0_53 = arith.constant 0 : index
    %65 = vector.load %arg7[%c8_52, %c0_53] : memref<64x128xf32, #tpu.memory_space<vmem>>, vector<8x128xf32>
    %66 = arith.addf %64, %65 : vector<8x128xf32>
    %67 = arith.negf %66 : vector<8x128xf32>
    %68 = math.exp %67 : vector<8x128xf32>
    %cst_54 = arith.constant 1.000000e+00 : f32
    %69 = vector.broadcast %cst_54 : f32 to vector<8x128xf32>
    %70 = arith.addf %69, %68 : vector<8x128xf32>
    %71 = arith.divf %69, %70 : vector<8x128xf32>
    %72 = vector.extract_strided_slice %71 {offsets = [0, 0], sizes = [8, 32], strides = [1, 1]} : vector<8x128xf32> to vector<8x32xf32>
    %73 = vector.extract_strided_slice %71 {offsets = [0, 32], sizes = [8, 32], strides = [1, 1]} : vector<8x128xf32> to vector<8x32xf32>
    %74 = vector.extract_strided_slice %71 {offsets = [0, 64], sizes = [8, 32], strides = [1, 1]} : vector<8x128xf32> to vector<8x32xf32>
    %cst_55 = arith.constant 2.000000e+00 : f32
    %75 = vector.broadcast %cst_55 : f32 to vector<8x32xf32>
    %76 = arith.mulf %75, %74 : vector<8x32xf32>
    %cst_56 = arith.constant 1.000000e+00 : f32
    %77 = vector.broadcast %cst_56 : f32 to vector<8x32xf32>
    %78 = arith.subf %76, %77 : vector<8x32xf32>
    %79 = vector.extract_strided_slice %71 {offsets = [0, 96], sizes = [8, 32], strides = [1, 1]} : vector<8x128xf32> to vector<8x32xf32>
    %80 = arith.mulf %73, %59 : vector<8x32xf32>
    %81 = arith.mulf %72, %78 : vector<8x32xf32>
    %82 = arith.addf %80, %81 : vector<8x32xf32>
    %83 = math.tanh %82 : vector<8x32xf32>
    %84 = arith.mulf %79, %83 : vector<8x32xf32>
    %c8_57 = arith.constant 8 : index
    %c0_58 = arith.constant 0 : index
    %85 = vector.load %arg8[%c8_57, %c0_58] : memref<64x32xf32, #tpu.memory_space<vmem>>, vector<8x32xf32>
    tpu.vector_store %arg8[%c8_57, %c0_58], %84 {strides = array<i32>} : memref<64x32xf32, #tpu.memory_space<vmem>>, vector<8x32xf32>,
    %86 = arith.truncf %84 : vector<8x32xf32> to vector<8x32xbf16>
    %cst_59 = arith.constant dense<0.000000e+00> : vector<8x128xf32>
    %87 = tpu.matmul %86, %29, %cst_59 {dimension_numbers = #tpu.dot_dimension_numbers<[1], [0], [0], [1], [0, 0, 1, 1], [], []>} : vector<8x32xbf16>, vector<32x128xbf16>, vector<8x128xf32> -> vector<8x128xf32>
    %c16_60 = arith.constant 16 : index
    %c0_61 = arith.constant 0 : index
    %88 = vector.load %arg7[%c16_60, %c0_61] : memref<64x128xf32, #tpu.memory_space<vmem>>, vector<8x128xf32>
    %89 = arith.addf %87, %88 : vector<8x128xf32>
    %90 = arith.negf %89 : vector<8x128xf32>
    %91 = math.exp %90 : vector<8x128xf32>
    %cst_62 = arith.constant 1.000000e+00 : f32
    %92 = vector.broadcast %cst_62 : f32 to vector<8x128xf32>
    %93 = arith.addf %92, %91 : vector<8x128xf32>
    %94 = arith.divf %92, %93 : vector<8x128xf32>
    %95 = vector.extract_strided_slice %94 {offsets = [0, 0], sizes = [8, 32], strides = [1, 1]} : vector<8x128xf32> to vector<8x32xf32>
    %96 = vector.extract_strided_slice %94 {offsets = [0, 32], sizes = [8, 32], strides = [1, 1]} : vector<8x128xf32> to vector<8x32xf32>
    %97 = vector.extract_strided_slice %94 {offsets = [0, 64], sizes = [8, 32], strides = [1, 1]} : vector<8x128xf32> to vector<8x32xf32>
    %cst_63 = arith.constant 2.000000e+00 : f32
    %98 = vector.broadcast %cst_63 : f32 to vector<8x32xf32>
    %99 = arith.mulf %98, %97 : vector<8x32xf32>
    %cst_64 = arith.constant 1.000000e+00 : f32
    %100 = vector.broadcast %cst_64 : f32 to vector<8x32xf32>
    %101 = arith.subf %99, %100 : vector<8x32xf32>
    %102 = vector.extract_strided_slice %94 {offsets = [0, 96], sizes = [8, 32], strides = [1, 1]} : vector<8x128xf32> to vector<8x32xf32>
    %103 = arith.mulf %96, %82 : vector<8x32xf32>
    %104 = arith.mulf %95, %101 : vector<8x32xf32>
    %105 = arith.addf %103, %104 : vector<8x32xf32>
    %106 = math.tanh %105 : vector<8x32xf32>
    %107 = arith.mulf %102, %106 : vector<8x32xf32>
    %c16_65 = arith.constant 16 : index
    %c0_66 = arith.constant 0 : index
    %108 = vector.load %arg8[%c16_65, %c0_66] : memref<64x32xf32, #tpu.memory_space<vmem>>, vector<8x32xf32>
    tpu.vector_store %arg8[%c16_65, %c0_66], %107 {strides = array<i32>} : memref<64x32xf32, #tpu.memory_space<vmem>>, vector<8x32xf32>,
    %109 = arith.truncf %107 : vector<8x32xf32> to vector<8x32xbf16>
    %cst_67 = arith.constant dense<0.000000e+00> : vector<8x128xf32>
    %110 = tpu.matmul %109, %29, %cst_67 {dimension_numbers = #tpu.dot_dimension_numbers<[1], [0], [0], [1], [0, 0, 1, 1], [], []>} : vector<8x32xbf16>, vector<32x128xbf16>, vector<8x128xf32> -> vector<8x128xf32>
    %c24_68 = arith.constant 24 : index
    %c0_69 = arith.constant 0 : index
    %111 = vector.load %arg7[%c24_68, %c0_69] : memref<64x128xf32, #tpu.memory_space<vmem>>, vector<8x128xf32>
    %112 = arith.addf %110, %111 : vector<8x128xf32>
    %113 = arith.negf %112 : vector<8x128xf32>
    %114 = math.exp %113 : vector<8x128xf32>
    %cst_70 = arith.constant 1.000000e+00 : f32
    %115 = vector.broadcast %cst_70 : f32 to vector<8x128xf32>
    %116 = arith.addf %115, %114 : vector<8x128xf32>
    %117 = arith.divf %115, %116 : vector<8x128xf32>
    %118 = vector.extract_strided_slice %117 {offsets = [0, 0], sizes = [8, 32], strides = [1, 1]} : vector<8x128xf32> to vector<8x32xf32>
    %119 = vector.extract_strided_slice %117 {offsets = [0, 32], sizes = [8, 32], strides = [1, 1]} : vector<8x128xf32> to vector<8x32xf32>
    %120 = vector.extract_strided_slice %117 {offsets = [0, 64], sizes = [8, 32], strides = [1, 1]} : vector<8x128xf32> to vector<8x32xf32>
    %cst_71 = arith.constant 2.000000e+00 : f32
    %121 = vector.broadcast %cst_71 : f32 to vector<8x32xf32>
    %122 = arith.mulf %121, %120 : vector<8x32xf32>
    %cst_72 = arith.constant 1.000000e+00 : f32
    %123 = vector.broadcast %cst_72 : f32 to vector<8x32xf32>
    %124 = arith.subf %122, %123 : vector<8x32xf32>
    %125 = vector.extract_strided_slice %117 {offsets = [0, 96], sizes = [8, 32], strides = [1, 1]} : vector<8x128xf32> to vector<8x32xf32>
    %126 = arith.mulf %119, %105 : vector<8x32xf32>
    %127 = arith.mulf %118, %124 : vector<8x32xf32>
    %128 = arith.addf %126, %127 : vector<8x32xf32>
    %129 = math.tanh %128 : vector<8x32xf32>
    %130 = arith.mulf %125, %129 : vector<8x32xf32>
    %c24_73 = arith.constant 24 : index
    %c0_74 = arith.constant 0 : index
    %131 = vector.load %arg8[%c24_73, %c0_74] : memref<64x32xf32, #tpu.memory_space<vmem>>, vector<8x32xf32>
    tpu.vector_store %arg8[%c24_73, %c0_74], %130 {strides = array<i32>} : memref<64x32xf32, #tpu.memory_space<vmem>>, vector<8x32xf32>,
    %132 = arith.truncf %130 : vector<8x32xf32> to vector<8x32xbf16>
    %cst_75 = arith.constant dense<0.000000e+00> : vector<8x128xf32>
    %133 = tpu.matmul %132, %29, %cst_75 {dimension_numbers = #tpu.dot_dimension_numbers<[1], [0], [0], [1], [0, 0, 1, 1], [], []>} : vector<8x32xbf16>, vector<32x128xbf16>, vector<8x128xf32> -> vector<8x128xf32>
    %c32_76 = arith.constant 32 : index
    %c0_77 = arith.constant 0 : index
    %134 = vector.load %arg7[%c32_76, %c0_77] : memref<64x128xf32, #tpu.memory_space<vmem>>, vector<8x128xf32>
    %135 = arith.addf %133, %134 : vector<8x128xf32>
    %136 = arith.negf %135 : vector<8x128xf32>
    %137 = math.exp %136 : vector<8x128xf32>
    %cst_78 = arith.constant 1.000000e+00 : f32
    %138 = vector.broadcast %cst_78 : f32 to vector<8x128xf32>
    %139 = arith.addf %138, %137 : vector<8x128xf32>
    %140 = arith.divf %138, %139 : vector<8x128xf32>
    %141 = vector.extract_strided_slice %140 {offsets = [0, 0], sizes = [8, 32], strides = [1, 1]} : vector<8x128xf32> to vector<8x32xf32>
    %142 = vector.extract_strided_slice %140 {offsets = [0, 32], sizes = [8, 32], strides = [1, 1]} : vector<8x128xf32> to vector<8x32xf32>
    %143 = vector.extract_strided_slice %140 {offsets = [0, 64], sizes = [8, 32], strides = [1, 1]} : vector<8x128xf32> to vector<8x32xf32>
    %cst_79 = arith.constant 2.000000e+00 : f32
    %144 = vector.broadcast %cst_79 : f32 to vector<8x32xf32>
    %145 = arith.mulf %144, %143 : vector<8x32xf32>
    %cst_80 = arith.constant 1.000000e+00 : f32
    %146 = vector.broadcast %cst_80 : f32 to vector<8x32xf32>
    %147 = arith.subf %145, %146 : vector<8x32xf32>
    %148 = vector.extract_strided_slice %140 {offsets = [0, 96], sizes = [8, 32], strides = [1, 1]} : vector<8x128xf32> to vector<8x32xf32>
    %149 = arith.mulf %142, %128 : vector<8x32xf32>
    %150 = arith.mulf %141, %147 : vector<8x32xf32>
    %151 = arith.addf %149, %150 : vector<8x32xf32>
    %152 = math.tanh %151 : vector<8x32xf32>
    %153 = arith.mulf %148, %152 : vector<8x32xf32>
    %c32_81 = arith.constant 32 : index
    %c0_82 = arith.constant 0 : index
    %154 = vector.load %arg8[%c32_81, %c0_82] : memref<64x32xf32, #tpu.memory_space<vmem>>, vector<8x32xf32>
    tpu.vector_store %arg8[%c32_81, %c0_82], %153 {strides = array<i32>} : memref<64x32xf32, #tpu.memory_space<vmem>>, vector<8x32xf32>,
    %155 = arith.truncf %153 : vector<8x32xf32> to vector<8x32xbf16>
    %cst_83 = arith.constant dense<0.000000e+00> : vector<8x128xf32>
    %156 = tpu.matmul %155, %29, %cst_83 {dimension_numbers = #tpu.dot_dimension_numbers<[1], [0], [0], [1], [0, 0, 1, 1], [], []>} : vector<8x32xbf16>, vector<32x128xbf16>, vector<8x128xf32> -> vector<8x128xf32>
    %c40_84 = arith.constant 40 : index
    %c0_85 = arith.constant 0 : index
    %157 = vector.load %arg7[%c40_84, %c0_85] : memref<64x128xf32, #tpu.memory_space<vmem>>, vector<8x128xf32>
    %158 = arith.addf %156, %157 : vector<8x128xf32>
    %159 = arith.negf %158 : vector<8x128xf32>
    %160 = math.exp %159 : vector<8x128xf32>
    %cst_86 = arith.constant 1.000000e+00 : f32
    %161 = vector.broadcast %cst_86 : f32 to vector<8x128xf32>
    %162 = arith.addf %161, %160 : vector<8x128xf32>
    %163 = arith.divf %161, %162 : vector<8x128xf32>
    %164 = vector.extract_strided_slice %163 {offsets = [0, 0], sizes = [8, 32], strides = [1, 1]} : vector<8x128xf32> to vector<8x32xf32>
    %165 = vector.extract_strided_slice %163 {offsets = [0, 32], sizes = [8, 32], strides = [1, 1]} : vector<8x128xf32> to vector<8x32xf32>
    %166 = vector.extract_strided_slice %163 {offsets = [0, 64], sizes = [8, 32], strides = [1, 1]} : vector<8x128xf32> to vector<8x32xf32>
    %cst_87 = arith.constant 2.000000e+00 : f32
    %167 = vector.broadcast %cst_87 : f32 to vector<8x32xf32>
    %168 = arith.mulf %167, %166 : vector<8x32xf32>
    %cst_88 = arith.constant 1.000000e+00 : f32
    %169 = vector.broadcast %cst_88 : f32 to vector<8x32xf32>
    %170 = arith.subf %168, %169 : vector<8x32xf32>
    %171 = vector.extract_strided_slice %163 {offsets = [0, 96], sizes = [8, 32], strides = [1, 1]} : vector<8x128xf32> to vector<8x32xf32>
    %172 = arith.mulf %165, %151 : vector<8x32xf32>
    %173 = arith.mulf %164, %170 : vector<8x32xf32>
    %174 = arith.addf %172, %173 : vector<8x32xf32>
    %175 = math.tanh %174 : vector<8x32xf32>
    %176 = arith.mulf %171, %175 : vector<8x32xf32>
    %c40_89 = arith.constant 40 : index
    %c0_90 = arith.constant 0 : index
    %177 = vector.load %arg8[%c40_89, %c0_90] : memref<64x32xf32, #tpu.memory_space<vmem>>, vector<8x32xf32>
    tpu.vector_store %arg8[%c40_89, %c0_90], %176 {strides = array<i32>} : memref<64x32xf32, #tpu.memory_space<vmem>>, vector<8x32xf32>,
    %178 = arith.truncf %176 : vector<8x32xf32> to vector<8x32xbf16>
    %cst_91 = arith.constant dense<0.000000e+00> : vector<8x128xf32>
    %179 = tpu.matmul %178, %29, %cst_91 {dimension_numbers = #tpu.dot_dimension_numbers<[1], [0], [0], [1], [0, 0, 1, 1], [], []>} : vector<8x32xbf16>, vector<32x128xbf16>, vector<8x128xf32> -> vector<8x128xf32>
    %c48_92 = arith.constant 48 : index
    %c0_93 = arith.constant 0 : index
    %180 = vector.load %arg7[%c48_92, %c0_93] : memref<64x128xf32, #tpu.memory_space<vmem>>, vector<8x128xf32>
    %181 = arith.addf %179, %180 : vector<8x128xf32>
    %182 = arith.negf %181 : vector<8x128xf32>
    %183 = math.exp %182 : vector<8x128xf32>
    %cst_94 = arith.constant 1.000000e+00 : f32
    %184 = vector.broadcast %cst_94 : f32 to vector<8x128xf32>
    %185 = arith.addf %184, %183 : vector<8x128xf32>
    %186 = arith.divf %184, %185 : vector<8x128xf32>
    %187 = vector.extract_strided_slice %186 {offsets = [0, 0], sizes = [8, 32], strides = [1, 1]} : vector<8x128xf32> to vector<8x32xf32>
    %188 = vector.extract_strided_slice %186 {offsets = [0, 32], sizes = [8, 32], strides = [1, 1]} : vector<8x128xf32> to vector<8x32xf32>
    %189 = vector.extract_strided_slice %186 {offsets = [0, 64], sizes = [8, 32], strides = [1, 1]} : vector<8x128xf32> to vector<8x32xf32>
    %cst_95 = arith.constant 2.000000e+00 : f32
    %190 = vector.broadcast %cst_95 : f32 to vector<8x32xf32>
    %191 = arith.mulf %190, %189 : vector<8x32xf32>
    %cst_96 = arith.constant 1.000000e+00 : f32
    %192 = vector.broadcast %cst_96 : f32 to vector<8x32xf32>
    %193 = arith.subf %191, %192 : vector<8x32xf32>
    %194 = vector.extract_strided_slice %186 {offsets = [0, 96], sizes = [8, 32], strides = [1, 1]} : vector<8x128xf32> to vector<8x32xf32>
    %195 = arith.mulf %188, %174 : vector<8x32xf32>
    %196 = arith.mulf %187, %193 : vector<8x32xf32>
    %197 = arith.addf %195, %196 : vector<8x32xf32>
    %198 = math.tanh %197 : vector<8x32xf32>
    %199 = arith.mulf %194, %198 : vector<8x32xf32>
    %c48_97 = arith.constant 48 : index
    %c0_98 = arith.constant 0 : index
    %200 = vector.load %arg8[%c48_97, %c0_98] : memref<64x32xf32, #tpu.memory_space<vmem>>, vector<8x32xf32>
    tpu.vector_store %arg8[%c48_97, %c0_98], %199 {strides = array<i32>} : memref<64x32xf32, #tpu.memory_space<vmem>>, vector<8x32xf32>,
    %201 = arith.truncf %199 : vector<8x32xf32> to vector<8x32xbf16>
    %cst_99 = arith.constant dense<0.000000e+00> : vector<8x128xf32>
    %202 = tpu.matmul %201, %29, %cst_99 {dimension_numbers = #tpu.dot_dimension_numbers<[1], [0], [0], [1], [0, 0, 1, 1], [], []>} : vector<8x32xbf16>, vector<32x128xbf16>, vector<8x128xf32> -> vector<8x128xf32>
    %c56_100 = arith.constant 56 : index
    %c0_101 = arith.constant 0 : index
    %203 = vector.load %arg7[%c56_100, %c0_101] : memref<64x128xf32, #tpu.memory_space<vmem>>, vector<8x128xf32>
    %204 = arith.addf %202, %203 : vector<8x128xf32>
    %205 = arith.negf %204 : vector<8x128xf32>
    %206 = math.exp %205 : vector<8x128xf32>
    %cst_102 = arith.constant 1.000000e+00 : f32
    %207 = vector.broadcast %cst_102 : f32 to vector<8x128xf32>
    %208 = arith.addf %207, %206 : vector<8x128xf32>
    %209 = arith.divf %207, %208 : vector<8x128xf32>
    %210 = vector.extract_strided_slice %209 {offsets = [0, 0], sizes = [8, 32], strides = [1, 1]} : vector<8x128xf32> to vector<8x32xf32>
    %211 = vector.extract_strided_slice %209 {offsets = [0, 32], sizes = [8, 32], strides = [1, 1]} : vector<8x128xf32> to vector<8x32xf32>
    %212 = vector.extract_strided_slice %209 {offsets = [0, 64], sizes = [8, 32], strides = [1, 1]} : vector<8x128xf32> to vector<8x32xf32>
    %cst_103 = arith.constant 2.000000e+00 : f32
    %213 = vector.broadcast %cst_103 : f32 to vector<8x32xf32>
    %214 = arith.mulf %213, %212 : vector<8x32xf32>
    %cst_104 = arith.constant 1.000000e+00 : f32
    %215 = vector.broadcast %cst_104 : f32 to vector<8x32xf32>
    %216 = arith.subf %214, %215 : vector<8x32xf32>
    %217 = vector.extract_strided_slice %209 {offsets = [0, 96], sizes = [8, 32], strides = [1, 1]} : vector<8x128xf32> to vector<8x32xf32>
    %218 = arith.mulf %211, %197 : vector<8x32xf32>
    %219 = arith.mulf %210, %216 : vector<8x32xf32>
    %220 = arith.addf %218, %219 : vector<8x32xf32>
    %221 = math.tanh %220 : vector<8x32xf32>
    %222 = arith.mulf %217, %221 : vector<8x32xf32>
    %c56_105 = arith.constant 56 : index
    %c0_106 = arith.constant 0 : index
    %223 = vector.load %arg8[%c56_105, %c0_106] : memref<64x32xf32, #tpu.memory_space<vmem>>, vector<8x32xf32>
    tpu.vector_store %arg8[%c56_105, %c0_106], %222 {strides = array<i32>} : memref<64x32xf32, #tpu.memory_space<vmem>>, vector<8x32xf32>,
    %c1_107 = arith.constant 1 : index
    %c0_108 = arith.constant 0 : index
    %c0_109 = arith.constant 0 : index
    %224 = vector.load %arg1[%c1_107, %c0_108, %c0_109] : memref<4x32x128xbf16, #tpu.memory_space<vmem>>, vector<1x32x128xbf16>
    %225 = vector.shape_cast %224 : vector<1x32x128xbf16> to vector<32x128xbf16>
    %c1_110 = arith.constant 1 : index
    %c0_111 = arith.constant 0 : index
    %c0_112 = arith.constant 0 : index
    %226 = vector.load %arg2[%c1_110, %c0_111, %c0_112] : memref<4x32x128xbf16, #tpu.memory_space<vmem>>, vector<1x32x128xbf16>
    %227 = vector.shape_cast %226 : vector<1x32x128xbf16> to vector<32x128xbf16>
    %c1_113 = arith.constant 1 : index
    %c0_114 = arith.constant 0 : index
    %c0_115 = arith.constant 0 : index
    %228 = vector.load %arg3[%c1_113, %c0_114, %c0_115] : memref<4x1x128xf32, #tpu.memory_space<vmem>>, vector<1x1x128xf32>
    %229 = vector.shape_cast %228 : vector<1x1x128xf32> to vector<1x128xf32>
    %c0_116 = arith.constant 0 : index
    %c0_117 = arith.constant 0 : index
    %230 = vector.load %arg8[%c0_116, %c0_117] : memref<64x32xf32, #tpu.memory_space<vmem>>, vector<64x32xf32>
    %231 = arith.truncf %230 : vector<64x32xf32> to vector<64x32xbf16>
    %cst_118 = arith.constant dense<0.000000e+00> : vector<64x128xf32>
    %232 = tpu.matmul %231, %225, %cst_118 {dimension_numbers = #tpu.dot_dimension_numbers<[1], [0], [0], [1], [0, 0, 1, 1], [], []>} : vector<64x32xbf16>, vector<32x128xbf16>, vector<64x128xf32> -> vector<64x128xf32>
    %233 = vector.broadcast %229 : vector<1x128xf32> to vector<64x128xf32>
    %234 = arith.addf %232, %233 : vector<64x128xf32>
    %c0_119 = arith.constant 0 : index
    %c0_120 = arith.constant 0 : index
    %235 = vector.load %arg7[%c0_119, %c0_120] : memref<64x128xf32, #tpu.memory_space<vmem>>, vector<64x128xf32>
    tpu.vector_store %arg7[%c0_119, %c0_120], %234 {strides = array<i32>} : memref<64x128xf32, #tpu.memory_space<vmem>>, vector<64x128xf32>,
    %cst_121 = arith.constant 0.000000e+00 : f32
    %236 = vector.broadcast %cst_121 : f32 to vector<8x32xf32>
    %cst_122 = arith.constant 0.000000e+00 : f32
    %237 = vector.broadcast %cst_122 : f32 to vector<8x32xf32>
    %238 = arith.truncf %236 : vector<8x32xf32> to vector<8x32xbf16>
    %cst_123 = arith.constant dense<0.000000e+00> : vector<8x128xf32>
    %239 = tpu.matmul %238, %227, %cst_123 {dimension_numbers = #tpu.dot_dimension_numbers<[1], [0], [0], [1], [0, 0, 1, 1], [], []>} : vector<8x32xbf16>, vector<32x128xbf16>, vector<8x128xf32> -> vector<8x128xf32>
    %c0_124 = arith.constant 0 : index
    %c0_125 = arith.constant 0 : index
    %240 = vector.load %arg7[%c0_124, %c0_125] : memref<64x128xf32, #tpu.memory_space<vmem>>, vector<8x128xf32>
    %241 = arith.addf %239, %240 : vector<8x128xf32>
    %242 = arith.negf %241 : vector<8x128xf32>
    %243 = math.exp %242 : vector<8x128xf32>
    %cst_126 = arith.constant 1.000000e+00 : f32
    %244 = vector.broadcast %cst_126 : f32 to vector<8x128xf32>
    %245 = arith.addf %244, %243 : vector<8x128xf32>
    %246 = arith.divf %244, %245 : vector<8x128xf32>
    %247 = vector.extract_strided_slice %246 {offsets = [0, 0], sizes = [8, 32], strides = [1, 1]} : vector<8x128xf32> to vector<8x32xf32>
    %248 = vector.extract_strided_slice %246 {offsets = [0, 32], sizes = [8, 32], strides = [1, 1]} : vector<8x128xf32> to vector<8x32xf32>
    %249 = vector.extract_strided_slice %246 {offsets = [0, 64], sizes = [8, 32], strides = [1, 1]} : vector<8x128xf32> to vector<8x32xf32>
    %cst_127 = arith.constant 2.000000e+00 : f32
    %250 = vector.broadcast %cst_127 : f32 to vector<8x32xf32>
    %251 = arith.mulf %250, %249 : vector<8x32xf32>
    %cst_128 = arith.constant 1.000000e+00 : f32
    %252 = vector.broadcast %cst_128 : f32 to vector<8x32xf32>
    %253 = arith.subf %251, %252 : vector<8x32xf32>
    %254 = vector.extract_strided_slice %246 {offsets = [0, 96], sizes = [8, 32], strides = [1, 1]} : vector<8x128xf32> to vector<8x32xf32>
    %255 = arith.mulf %248, %237 : vector<8x32xf32>
    %256 = arith.mulf %247, %253 : vector<8x32xf32>
    %257 = arith.addf %255, %256 : vector<8x32xf32>
    %258 = math.tanh %257 : vector<8x32xf32>
    %259 = arith.mulf %254, %258 : vector<8x32xf32>
    %c0_129 = arith.constant 0 : index
    %c0_130 = arith.constant 0 : index
    %260 = vector.load %arg8[%c0_129, %c0_130] : memref<64x32xf32, #tpu.memory_space<vmem>>, vector<8x32xf32>
    tpu.vector_store %arg8[%c0_129, %c0_130], %259 {strides = array<i32>} : memref<64x32xf32, #tpu.memory_space<vmem>>, vector<8x32xf32>,
    %261 = arith.truncf %259 : vector<8x32xf32> to vector<8x32xbf16>
    %cst_131 = arith.constant dense<0.000000e+00> : vector<8x128xf32>
    %262 = tpu.matmul %261, %227, %cst_131 {dimension_numbers = #tpu.dot_dimension_numbers<[1], [0], [0], [1], [0, 0, 1, 1], [], []>} : vector<8x32xbf16>, vector<32x128xbf16>, vector<8x128xf32> -> vector<8x128xf32>
    %c8_132 = arith.constant 8 : index
    %c0_133 = arith.constant 0 : index
    %263 = vector.load %arg7[%c8_132, %c0_133] : memref<64x128xf32, #tpu.memory_space<vmem>>, vector<8x128xf32>
    %264 = arith.addf %262, %263 : vector<8x128xf32>
    %265 = arith.negf %264 : vector<8x128xf32>
    %266 = math.exp %265 : vector<8x128xf32>
    %cst_134 = arith.constant 1.000000e+00 : f32
    %267 = vector.broadcast %cst_134 : f32 to vector<8x128xf32>
    %268 = arith.addf %267, %266 : vector<8x128xf32>
    %269 = arith.divf %267, %268 : vector<8x128xf32>
    %270 = vector.extract_strided_slice %269 {offsets = [0, 0], sizes = [8, 32], strides = [1, 1]} : vector<8x128xf32> to vector<8x32xf32>
    %271 = vector.extract_strided_slice %269 {offsets = [0, 32], sizes = [8, 32], strides = [1, 1]} : vector<8x128xf32> to vector<8x32xf32>
    %272 = vector.extract_strided_slice %269 {offsets = [0, 64], sizes = [8, 32], strides = [1, 1]} : vector<8x128xf32> to vector<8x32xf32>
    %cst_135 = arith.constant 2.000000e+00 : f32
    %273 = vector.broadcast %cst_135 : f32 to vector<8x32xf32>
    %274 = arith.mulf %273, %272 : vector<8x32xf32>
    %cst_136 = arith.constant 1.000000e+00 : f32
    %275 = vector.broadcast %cst_136 : f32 to vector<8x32xf32>
    %276 = arith.subf %274, %275 : vector<8x32xf32>
    %277 = vector.extract_strided_slice %269 {offsets = [0, 96], sizes = [8, 32], strides = [1, 1]} : vector<8x128xf32> to vector<8x32xf32>
    %278 = arith.mulf %271, %257 : vector<8x32xf32>
    %279 = arith.mulf %270, %276 : vector<8x32xf32>
    %280 = arith.addf %278, %279 : vector<8x32xf32>
    %281 = math.tanh %280 : vector<8x32xf32>
    %282 = arith.mulf %277, %281 : vector<8x32xf32>
    %c8_137 = arith.constant 8 : index
    %c0_138 = arith.constant 0 : index
    %283 = vector.load %arg8[%c8_137, %c0_138] : memref<64x32xf32, #tpu.memory_space<vmem>>, vector<8x32xf32>
    tpu.vector_store %arg8[%c8_137, %c0_138], %282 {strides = array<i32>} : memref<64x32xf32, #tpu.memory_space<vmem>>, vector<8x32xf32>,
    %284 = arith.truncf %282 : vector<8x32xf32> to vector<8x32xbf16>
    %cst_139 = arith.constant dense<0.000000e+00> : vector<8x128xf32>
    %285 = tpu.matmul %284, %227, %cst_139 {dimension_numbers = #tpu.dot_dimension_numbers<[1], [0], [0], [1], [0, 0, 1, 1], [], []>} : vector<8x32xbf16>, vector<32x128xbf16>, vector<8x128xf32> -> vector<8x128xf32>
    %c16_140 = arith.constant 16 : index
    %c0_141 = arith.constant 0 : index
    %286 = vector.load %arg7[%c16_140, %c0_141] : memref<64x128xf32, #tpu.memory_space<vmem>>, vector<8x128xf32>
    %287 = arith.addf %285, %286 : vector<8x128xf32>
    %288 = arith.negf %287 : vector<8x128xf32>
    %289 = math.exp %288 : vector<8x128xf32>
    %cst_142 = arith.constant 1.000000e+00 : f32
    %290 = vector.broadcast %cst_142 : f32 to vector<8x128xf32>
    %291 = arith.addf %290, %289 : vector<8x128xf32>
    %292 = arith.divf %290, %291 : vector<8x128xf32>
    %293 = vector.extract_strided_slice %292 {offsets = [0, 0], sizes = [8, 32], strides = [1, 1]} : vector<8x128xf32> to vector<8x32xf32>
    %294 = vector.extract_strided_slice %292 {offsets = [0, 32], sizes = [8, 32], strides = [1, 1]} : vector<8x128xf32> to vector<8x32xf32>
    %295 = vector.extract_strided_slice %292 {offsets = [0, 64], sizes = [8, 32], strides = [1, 1]} : vector<8x128xf32> to vector<8x32xf32>
    %cst_143 = arith.constant 2.000000e+00 : f32
    %296 = vector.broadcast %cst_143 : f32 to vector<8x32xf32>
    %297 = arith.mulf %296, %295 : vector<8x32xf32>
    %cst_144 = arith.constant 1.000000e+00 : f32
    %298 = vector.broadcast %cst_144 : f32 to vector<8x32xf32>
    %299 = arith.subf %297, %298 : vector<8x32xf32>
    %300 = vector.extract_strided_slice %292 {offsets = [0, 96], sizes = [8, 32], strides = [1, 1]} : vector<8x128xf32> to vector<8x32xf32>
    %301 = arith.mulf %294, %280 : vector<8x32xf32>
    %302 = arith.mulf %293, %299 : vector<8x32xf32>
    %303 = arith.addf %301, %302 : vector<8x32xf32>
    %304 = math.tanh %303 : vector<8x32xf32>
    %305 = arith.mulf %300, %304 : vector<8x32xf32>
    %c16_145 = arith.constant 16 : index
    %c0_146 = arith.constant 0 : index
    %306 = vector.load %arg8[%c16_145, %c0_146] : memref<64x32xf32, #tpu.memory_space<vmem>>, vector<8x32xf32>
    tpu.vector_store %arg8[%c16_145, %c0_146], %305 {strides = array<i32>} : memref<64x32xf32, #tpu.memory_space<vmem>>, vector<8x32xf32>,
    %307 = arith.truncf %305 : vector<8x32xf32> to vector<8x32xbf16>
    %cst_147 = arith.constant dense<0.000000e+00> : vector<8x128xf32>
    %308 = tpu.matmul %307, %227, %cst_147 {dimension_numbers = #tpu.dot_dimension_numbers<[1], [0], [0], [1], [0, 0, 1, 1], [], []>} : vector<8x32xbf16>, vector<32x128xbf16>, vector<8x128xf32> -> vector<8x128xf32>
    %c24_148 = arith.constant 24 : index
    %c0_149 = arith.constant 0 : index
    %309 = vector.load %arg7[%c24_148, %c0_149] : memref<64x128xf32, #tpu.memory_space<vmem>>, vector<8x128xf32>
    %310 = arith.addf %308, %309 : vector<8x128xf32>
    %311 = arith.negf %310 : vector<8x128xf32>
    %312 = math.exp %311 : vector<8x128xf32>
    %cst_150 = arith.constant 1.000000e+00 : f32
    %313 = vector.broadcast %cst_150 : f32 to vector<8x128xf32>
    %314 = arith.addf %313, %312 : vector<8x128xf32>
    %315 = arith.divf %313, %314 : vector<8x128xf32>
    %316 = vector.extract_strided_slice %315 {offsets = [0, 0], sizes = [8, 32], strides = [1, 1]} : vector<8x128xf32> to vector<8x32xf32>
    %317 = vector.extract_strided_slice %315 {offsets = [0, 32], sizes = [8, 32], strides = [1, 1]} : vector<8x128xf32> to vector<8x32xf32>
    %318 = vector.extract_strided_slice %315 {offsets = [0, 64], sizes = [8, 32], strides = [1, 1]} : vector<8x128xf32> to vector<8x32xf32>
    %cst_151 = arith.constant 2.000000e+00 : f32
    %319 = vector.broadcast %cst_151 : f32 to vector<8x32xf32>
    %320 = arith.mulf %319, %318 : vector<8x32xf32>
    %cst_152 = arith.constant 1.000000e+00 : f32
    %321 = vector.broadcast %cst_152 : f32 to vector<8x32xf32>
    %322 = arith.subf %320, %321 : vector<8x32xf32>
    %323 = vector.extract_strided_slice %315 {offsets = [0, 96], sizes = [8, 32], strides = [1, 1]} : vector<8x128xf32> to vector<8x32xf32>
    %324 = arith.mulf %317, %303 : vector<8x32xf32>
    %325 = arith.mulf %316, %322 : vector<8x32xf32>
    %326 = arith.addf %324, %325 : vector<8x32xf32>
    %327 = math.tanh %326 : vector<8x32xf32>
    %328 = arith.mulf %323, %327 : vector<8x32xf32>
    %c24_153 = arith.constant 24 : index
    %c0_154 = arith.constant 0 : index
    %329 = vector.load %arg8[%c24_153, %c0_154] : memref<64x32xf32, #tpu.memory_space<vmem>>, vector<8x32xf32>
    tpu.vector_store %arg8[%c24_153, %c0_154], %328 {strides = array<i32>} : memref<64x32xf32, #tpu.memory_space<vmem>>, vector<8x32xf32>,
    %330 = arith.truncf %328 : vector<8x32xf32> to vector<8x32xbf16>
    %cst_155 = arith.constant dense<0.000000e+00> : vector<8x128xf32>
    %331 = tpu.matmul %330, %227, %cst_155 {dimension_numbers = #tpu.dot_dimension_numbers<[1], [0], [0], [1], [0, 0, 1, 1], [], []>} : vector<8x32xbf16>, vector<32x128xbf16>, vector<8x128xf32> -> vector<8x128xf32>
    %c32_156 = arith.constant 32 : index
    %c0_157 = arith.constant 0 : index
    %332 = vector.load %arg7[%c32_156, %c0_157] : memref<64x128xf32, #tpu.memory_space<vmem>>, vector<8x128xf32>
    %333 = arith.addf %331, %332 : vector<8x128xf32>
    %334 = arith.negf %333 : vector<8x128xf32>
    %335 = math.exp %334 : vector<8x128xf32>
    %cst_158 = arith.constant 1.000000e+00 : f32
    %336 = vector.broadcast %cst_158 : f32 to vector<8x128xf32>
    %337 = arith.addf %336, %335 : vector<8x128xf32>
    %338 = arith.divf %336, %337 : vector<8x128xf32>
    %339 = vector.extract_strided_slice %338 {offsets = [0, 0], sizes = [8, 32], strides = [1, 1]} : vector<8x128xf32> to vector<8x32xf32>
    %340 = vector.extract_strided_slice %338 {offsets = [0, 32], sizes = [8, 32], strides = [1, 1]} : vector<8x128xf32> to vector<8x32xf32>
    %341 = vector.extract_strided_slice %338 {offsets = [0, 64], sizes = [8, 32], strides = [1, 1]} : vector<8x128xf32> to vector<8x32xf32>
    %cst_159 = arith.constant 2.000000e+00 : f32
    %342 = vector.broadcast %cst_159 : f32 to vector<8x32xf32>
    %343 = arith.mulf %342, %341 : vector<8x32xf32>
    %cst_160 = arith.constant 1.000000e+00 : f32
    %344 = vector.broadcast %cst_160 : f32 to vector<8x32xf32>
    %345 = arith.subf %343, %344 : vector<8x32xf32>
    %346 = vector.extract_strided_slice %338 {offsets = [0, 96], sizes = [8, 32], strides = [1, 1]} : vector<8x128xf32> to vector<8x32xf32>
    %347 = arith.mulf %340, %326 : vector<8x32xf32>
    %348 = arith.mulf %339, %345 : vector<8x32xf32>
    %349 = arith.addf %347, %348 : vector<8x32xf32>
    %350 = math.tanh %349 : vector<8x32xf32>
    %351 = arith.mulf %346, %350 : vector<8x32xf32>
    %c32_161 = arith.constant 32 : index
    %c0_162 = arith.constant 0 : index
    %352 = vector.load %arg8[%c32_161, %c0_162] : memref<64x32xf32, #tpu.memory_space<vmem>>, vector<8x32xf32>
    tpu.vector_store %arg8[%c32_161, %c0_162], %351 {strides = array<i32>} : memref<64x32xf32, #tpu.memory_space<vmem>>, vector<8x32xf32>,
    %353 = arith.truncf %351 : vector<8x32xf32> to vector<8x32xbf16>
    %cst_163 = arith.constant dense<0.000000e+00> : vector<8x128xf32>
    %354 = tpu.matmul %353, %227, %cst_163 {dimension_numbers = #tpu.dot_dimension_numbers<[1], [0], [0], [1], [0, 0, 1, 1], [], []>} : vector<8x32xbf16>, vector<32x128xbf16>, vector<8x128xf32> -> vector<8x128xf32>
    %c40_164 = arith.constant 40 : index
    %c0_165 = arith.constant 0 : index
    %355 = vector.load %arg7[%c40_164, %c0_165] : memref<64x128xf32, #tpu.memory_space<vmem>>, vector<8x128xf32>
    %356 = arith.addf %354, %355 : vector<8x128xf32>
    %357 = arith.negf %356 : vector<8x128xf32>
    %358 = math.exp %357 : vector<8x128xf32>
    %cst_166 = arith.constant 1.000000e+00 : f32
    %359 = vector.broadcast %cst_166 : f32 to vector<8x128xf32>
    %360 = arith.addf %359, %358 : vector<8x128xf32>
    %361 = arith.divf %359, %360 : vector<8x128xf32>
    %362 = vector.extract_strided_slice %361 {offsets = [0, 0], sizes = [8, 32], strides = [1, 1]} : vector<8x128xf32> to vector<8x32xf32>
    %363 = vector.extract_strided_slice %361 {offsets = [0, 32], sizes = [8, 32], strides = [1, 1]} : vector<8x128xf32> to vector<8x32xf32>
    %364 = vector.extract_strided_slice %361 {offsets = [0, 64], sizes = [8, 32], strides = [1, 1]} : vector<8x128xf32> to vector<8x32xf32>
    %cst_167 = arith.constant 2.000000e+00 : f32
    %365 = vector.broadcast %cst_167 : f32 to vector<8x32xf32>
    %366 = arith.mulf %365, %364 : vector<8x32xf32>
    %cst_168 = arith.constant 1.000000e+00 : f32
    %367 = vector.broadcast %cst_168 : f32 to vector<8x32xf32>
    %368 = arith.subf %366, %367 : vector<8x32xf32>
    %369 = vector.extract_strided_slice %361 {offsets = [0, 96], sizes = [8, 32], strides = [1, 1]} : vector<8x128xf32> to vector<8x32xf32>
    %370 = arith.mulf %363, %349 : vector<8x32xf32>
    %371 = arith.mulf %362, %368 : vector<8x32xf32>
    %372 = arith.addf %370, %371 : vector<8x32xf32>
    %373 = math.tanh %372 : vector<8x32xf32>
    %374 = arith.mulf %369, %373 : vector<8x32xf32>
    %c40_169 = arith.constant 40 : index
    %c0_170 = arith.constant 0 : index
    %375 = vector.load %arg8[%c40_169, %c0_170] : memref<64x32xf32, #tpu.memory_space<vmem>>, vector<8x32xf32>
    tpu.vector_store %arg8[%c40_169, %c0_170], %374 {strides = array<i32>} : memref<64x32xf32, #tpu.memory_space<vmem>>, vector<8x32xf32>,
    %376 = arith.truncf %374 : vector<8x32xf32> to vector<8x32xbf16>
    %cst_171 = arith.constant dense<0.000000e+00> : vector<8x128xf32>
    %377 = tpu.matmul %376, %227, %cst_171 {dimension_numbers = #tpu.dot_dimension_numbers<[1], [0], [0], [1], [0, 0, 1, 1], [], []>} : vector<8x32xbf16>, vector<32x128xbf16>, vector<8x128xf32> -> vector<8x128xf32>
    %c48_172 = arith.constant 48 : index
    %c0_173 = arith.constant 0 : index
    %378 = vector.load %arg7[%c48_172, %c0_173] : memref<64x128xf32, #tpu.memory_space<vmem>>, vector<8x128xf32>
    %379 = arith.addf %377, %378 : vector<8x128xf32>
    %380 = arith.negf %379 : vector<8x128xf32>
    %381 = math.exp %380 : vector<8x128xf32>
    %cst_174 = arith.constant 1.000000e+00 : f32
    %382 = vector.broadcast %cst_174 : f32 to vector<8x128xf32>
    %383 = arith.addf %382, %381 : vector<8x128xf32>
    %384 = arith.divf %382, %383 : vector<8x128xf32>
    %385 = vector.extract_strided_slice %384 {offsets = [0, 0], sizes = [8, 32], strides = [1, 1]} : vector<8x128xf32> to vector<8x32xf32>
    %386 = vector.extract_strided_slice %384 {offsets = [0, 32], sizes = [8, 32], strides = [1, 1]} : vector<8x128xf32> to vector<8x32xf32>
    %387 = vector.extract_strided_slice %384 {offsets = [0, 64], sizes = [8, 32], strides = [1, 1]} : vector<8x128xf32> to vector<8x32xf32>
    %cst_175 = arith.constant 2.000000e+00 : f32
    %388 = vector.broadcast %cst_175 : f32 to vector<8x32xf32>
    %389 = arith.mulf %388, %387 : vector<8x32xf32>
    %cst_176 = arith.constant 1.000000e+00 : f32
    %390 = vector.broadcast %cst_176 : f32 to vector<8x32xf32>
    %391 = arith.subf %389, %390 : vector<8x32xf32>
    %392 = vector.extract_strided_slice %384 {offsets = [0, 96], sizes = [8, 32], strides = [1, 1]} : vector<8x128xf32> to vector<8x32xf32>
    %393 = arith.mulf %386, %372 : vector<8x32xf32>
    %394 = arith.mulf %385, %391 : vector<8x32xf32>
    %395 = arith.addf %393, %394 : vector<8x32xf32>
    %396 = math.tanh %395 : vector<8x32xf32>
    %397 = arith.mulf %392, %396 : vector<8x32xf32>
    %c48_177 = arith.constant 48 : index
    %c0_178 = arith.constant 0 : index
    %398 = vector.load %arg8[%c48_177, %c0_178] : memref<64x32xf32, #tpu.memory_space<vmem>>, vector<8x32xf32>
    tpu.vector_store %arg8[%c48_177, %c0_178], %397 {strides = array<i32>} : memref<64x32xf32, #tpu.memory_space<vmem>>, vector<8x32xf32>,
    %399 = arith.truncf %397 : vector<8x32xf32> to vector<8x32xbf16>
    %cst_179 = arith.constant dense<0.000000e+00> : vector<8x128xf32>
    %400 = tpu.matmul %399, %227, %cst_179 {dimension_numbers = #tpu.dot_dimension_numbers<[1], [0], [0], [1], [0, 0, 1, 1], [], []>} : vector<8x32xbf16>, vector<32x128xbf16>, vector<8x128xf32> -> vector<8x128xf32>
    %c56_180 = arith.constant 56 : index
    %c0_181 = arith.constant 0 : index
    %401 = vector.load %arg7[%c56_180, %c0_181] : memref<64x128xf32, #tpu.memory_space<vmem>>, vector<8x128xf32>
    %402 = arith.addf %400, %401 : vector<8x128xf32>
    %403 = arith.negf %402 : vector<8x128xf32>
    %404 = math.exp %403 : vector<8x128xf32>
    %cst_182 = arith.constant 1.000000e+00 : f32
    %405 = vector.broadcast %cst_182 : f32 to vector<8x128xf32>
    %406 = arith.addf %405, %404 : vector<8x128xf32>
    %407 = arith.divf %405, %406 : vector<8x128xf32>
    %408 = vector.extract_strided_slice %407 {offsets = [0, 0], sizes = [8, 32], strides = [1, 1]} : vector<8x128xf32> to vector<8x32xf32>
    %409 = vector.extract_strided_slice %407 {offsets = [0, 32], sizes = [8, 32], strides = [1, 1]} : vector<8x128xf32> to vector<8x32xf32>
    %410 = vector.extract_strided_slice %407 {offsets = [0, 64], sizes = [8, 32], strides = [1, 1]} : vector<8x128xf32> to vector<8x32xf32>
    %cst_183 = arith.constant 2.000000e+00 : f32
    %411 = vector.broadcast %cst_183 : f32 to vector<8x32xf32>
    %412 = arith.mulf %411, %410 : vector<8x32xf32>
    %cst_184 = arith.constant 1.000000e+00 : f32
    %413 = vector.broadcast %cst_184 : f32 to vector<8x32xf32>
    %414 = arith.subf %412, %413 : vector<8x32xf32>
    %415 = vector.extract_strided_slice %407 {offsets = [0, 96], sizes = [8, 32], strides = [1, 1]} : vector<8x128xf32> to vector<8x32xf32>
    %416 = arith.mulf %409, %395 : vector<8x32xf32>
    %417 = arith.mulf %408, %414 : vector<8x32xf32>
    %418 = arith.addf %416, %417 : vector<8x32xf32>
    %419 = math.tanh %418 : vector<8x32xf32>
    %420 = arith.mulf %415, %419 : vector<8x32xf32>
    %c56_185 = arith.constant 56 : index
    %c0_186 = arith.constant 0 : index
    %421 = vector.load %arg8[%c56_185, %c0_186] : memref<64x32xf32, #tpu.memory_space<vmem>>, vector<8x32xf32>
    tpu.vector_store %arg8[%c56_185, %c0_186], %420 {strides = array<i32>} : memref<64x32xf32, #tpu.memory_space<vmem>>, vector<8x32xf32>,
    %c2_187 = arith.constant 2 : index
    %c0_188 = arith.constant 0 : index
    %c0_189 = arith.constant 0 : index
    %422 = vector.load %arg1[%c2_187, %c0_188, %c0_189] : memref<4x32x128xbf16, #tpu.memory_space<vmem>>, vector<1x32x128xbf16>
    %423 = vector.shape_cast %422 : vector<1x32x128xbf16> to vector<32x128xbf16>
    %c2_190 = arith.constant 2 : index
    %c0_191 = arith.constant 0 : index
    %c0_192 = arith.constant 0 : index
    %424 = vector.load %arg2[%c2_190, %c0_191, %c0_192] : memref<4x32x128xbf16, #tpu.memory_space<vmem>>, vector<1x32x128xbf16>
    %425 = vector.shape_cast %424 : vector<1x32x128xbf16> to vector<32x128xbf16>
    %c2_193 = arith.constant 2 : index
    %c0_194 = arith.constant 0 : index
    %c0_195 = arith.constant 0 : index
    %426 = vector.load %arg3[%c2_193, %c0_194, %c0_195] : memref<4x1x128xf32, #tpu.memory_space<vmem>>, vector<1x1x128xf32>
    %427 = vector.shape_cast %426 : vector<1x1x128xf32> to vector<1x128xf32>
    %c0_196 = arith.constant 0 : index
    %c0_197 = arith.constant 0 : index
    %428 = vector.load %arg8[%c0_196, %c0_197] : memref<64x32xf32, #tpu.memory_space<vmem>>, vector<64x32xf32>
    %429 = arith.truncf %428 : vector<64x32xf32> to vector<64x32xbf16>
    %cst_198 = arith.constant dense<0.000000e+00> : vector<64x128xf32>
    %430 = tpu.matmul %429, %423, %cst_198 {dimension_numbers = #tpu.dot_dimension_numbers<[1], [0], [0], [1], [0, 0, 1, 1], [], []>} : vector<64x32xbf16>, vector<32x128xbf16>, vector<64x128xf32> -> vector<64x128xf32>
    %431 = vector.broadcast %427 : vector<1x128xf32> to vector<64x128xf32>
    %432 = arith.addf %430, %431 : vector<64x128xf32>
    %c0_199 = arith.constant 0 : index
    %c0_200 = arith.constant 0 : index
    %433 = vector.load %arg7[%c0_199, %c0_200] : memref<64x128xf32, #tpu.memory_space<vmem>>, vector<64x128xf32>
    tpu.vector_store %arg7[%c0_199, %c0_200], %432 {strides = array<i32>} : memref<64x128xf32, #tpu.memory_space<vmem>>, vector<64x128xf32>,
    %cst_201 = arith.constant 0.000000e+00 : f32
    %434 = vector.broadcast %cst_201 : f32 to vector<8x32xf32>
    %cst_202 = arith.constant 0.000000e+00 : f32
    %435 = vector.broadcast %cst_202 : f32 to vector<8x32xf32>
    %436 = arith.truncf %434 : vector<8x32xf32> to vector<8x32xbf16>
    %cst_203 = arith.constant dense<0.000000e+00> : vector<8x128xf32>
    %437 = tpu.matmul %436, %425, %cst_203 {dimension_numbers = #tpu.dot_dimension_numbers<[1], [0], [0], [1], [0, 0, 1, 1], [], []>} : vector<8x32xbf16>, vector<32x128xbf16>, vector<8x128xf32> -> vector<8x128xf32>
    %c0_204 = arith.constant 0 : index
    %c0_205 = arith.constant 0 : index
    %438 = vector.load %arg7[%c0_204, %c0_205] : memref<64x128xf32, #tpu.memory_space<vmem>>, vector<8x128xf32>
    %439 = arith.addf %437, %438 : vector<8x128xf32>
    %440 = arith.negf %439 : vector<8x128xf32>
    %441 = math.exp %440 : vector<8x128xf32>
    %cst_206 = arith.constant 1.000000e+00 : f32
    %442 = vector.broadcast %cst_206 : f32 to vector<8x128xf32>
    %443 = arith.addf %442, %441 : vector<8x128xf32>
    %444 = arith.divf %442, %443 : vector<8x128xf32>
    %445 = vector.extract_strided_slice %444 {offsets = [0, 0], sizes = [8, 32], strides = [1, 1]} : vector<8x128xf32> to vector<8x32xf32>
    %446 = vector.extract_strided_slice %444 {offsets = [0, 32], sizes = [8, 32], strides = [1, 1]} : vector<8x128xf32> to vector<8x32xf32>
    %447 = vector.extract_strided_slice %444 {offsets = [0, 64], sizes = [8, 32], strides = [1, 1]} : vector<8x128xf32> to vector<8x32xf32>
    %cst_207 = arith.constant 2.000000e+00 : f32
    %448 = vector.broadcast %cst_207 : f32 to vector<8x32xf32>
    %449 = arith.mulf %448, %447 : vector<8x32xf32>
    %cst_208 = arith.constant 1.000000e+00 : f32
    %450 = vector.broadcast %cst_208 : f32 to vector<8x32xf32>
    %451 = arith.subf %449, %450 : vector<8x32xf32>
    %452 = vector.extract_strided_slice %444 {offsets = [0, 96], sizes = [8, 32], strides = [1, 1]} : vector<8x128xf32> to vector<8x32xf32>
    %453 = arith.mulf %446, %435 : vector<8x32xf32>
    %454 = arith.mulf %445, %451 : vector<8x32xf32>
    %455 = arith.addf %453, %454 : vector<8x32xf32>
    %456 = math.tanh %455 : vector<8x32xf32>
    %457 = arith.mulf %452, %456 : vector<8x32xf32>
    %c0_209 = arith.constant 0 : index
    %c0_210 = arith.constant 0 : index
    %458 = vector.load %arg8[%c0_209, %c0_210] : memref<64x32xf32, #tpu.memory_space<vmem>>, vector<8x32xf32>
    tpu.vector_store %arg8[%c0_209, %c0_210], %457 {strides = array<i32>} : memref<64x32xf32, #tpu.memory_space<vmem>>, vector<8x32xf32>,
    %459 = arith.truncf %457 : vector<8x32xf32> to vector<8x32xbf16>
    %cst_211 = arith.constant dense<0.000000e+00> : vector<8x128xf32>
    %460 = tpu.matmul %459, %425, %cst_211 {dimension_numbers = #tpu.dot_dimension_numbers<[1], [0], [0], [1], [0, 0, 1, 1], [], []>} : vector<8x32xbf16>, vector<32x128xbf16>, vector<8x128xf32> -> vector<8x128xf32>
    %c8_212 = arith.constant 8 : index
    %c0_213 = arith.constant 0 : index
    %461 = vector.load %arg7[%c8_212, %c0_213] : memref<64x128xf32, #tpu.memory_space<vmem>>, vector<8x128xf32>
    %462 = arith.addf %460, %461 : vector<8x128xf32>
    %463 = arith.negf %462 : vector<8x128xf32>
    %464 = math.exp %463 : vector<8x128xf32>
    %cst_214 = arith.constant 1.000000e+00 : f32
    %465 = vector.broadcast %cst_214 : f32 to vector<8x128xf32>
    %466 = arith.addf %465, %464 : vector<8x128xf32>
    %467 = arith.divf %465, %466 : vector<8x128xf32>
    %468 = vector.extract_strided_slice %467 {offsets = [0, 0], sizes = [8, 32], strides = [1, 1]} : vector<8x128xf32> to vector<8x32xf32>
    %469 = vector.extract_strided_slice %467 {offsets = [0, 32], sizes = [8, 32], strides = [1, 1]} : vector<8x128xf32> to vector<8x32xf32>
    %470 = vector.extract_strided_slice %467 {offsets = [0, 64], sizes = [8, 32], strides = [1, 1]} : vector<8x128xf32> to vector<8x32xf32>
    %cst_215 = arith.constant 2.000000e+00 : f32
    %471 = vector.broadcast %cst_215 : f32 to vector<8x32xf32>
    %472 = arith.mulf %471, %470 : vector<8x32xf32>
    %cst_216 = arith.constant 1.000000e+00 : f32
    %473 = vector.broadcast %cst_216 : f32 to vector<8x32xf32>
    %474 = arith.subf %472, %473 : vector<8x32xf32>
    %475 = vector.extract_strided_slice %467 {offsets = [0, 96], sizes = [8, 32], strides = [1, 1]} : vector<8x128xf32> to vector<8x32xf32>
    %476 = arith.mulf %469, %455 : vector<8x32xf32>
    %477 = arith.mulf %468, %474 : vector<8x32xf32>
    %478 = arith.addf %476, %477 : vector<8x32xf32>
    %479 = math.tanh %478 : vector<8x32xf32>
    %480 = arith.mulf %475, %479 : vector<8x32xf32>
    %c8_217 = arith.constant 8 : index
    %c0_218 = arith.constant 0 : index
    %481 = vector.load %arg8[%c8_217, %c0_218] : memref<64x32xf32, #tpu.memory_space<vmem>>, vector<8x32xf32>
    tpu.vector_store %arg8[%c8_217, %c0_218], %480 {strides = array<i32>} : memref<64x32xf32, #tpu.memory_space<vmem>>, vector<8x32xf32>,
    %482 = arith.truncf %480 : vector<8x32xf32> to vector<8x32xbf16>
    %cst_219 = arith.constant dense<0.000000e+00> : vector<8x128xf32>
    %483 = tpu.matmul %482, %425, %cst_219 {dimension_numbers = #tpu.dot_dimension_numbers<[1], [0], [0], [1], [0, 0, 1, 1], [], []>} : vector<8x32xbf16>, vector<32x128xbf16>, vector<8x128xf32> -> vector<8x128xf32>
    %c16_220 = arith.constant 16 : index
    %c0_221 = arith.constant 0 : index
    %484 = vector.load %arg7[%c16_220, %c0_221] : memref<64x128xf32, #tpu.memory_space<vmem>>, vector<8x128xf32>
    %485 = arith.addf %483, %484 : vector<8x128xf32>
    %486 = arith.negf %485 : vector<8x128xf32>
    %487 = math.exp %486 : vector<8x128xf32>
    %cst_222 = arith.constant 1.000000e+00 : f32
    %488 = vector.broadcast %cst_222 : f32 to vector<8x128xf32>
    %489 = arith.addf %488, %487 : vector<8x128xf32>
    %490 = arith.divf %488, %489 : vector<8x128xf32>
    %491 = vector.extract_strided_slice %490 {offsets = [0, 0], sizes = [8, 32], strides = [1, 1]} : vector<8x128xf32> to vector<8x32xf32>
    %492 = vector.extract_strided_slice %490 {offsets = [0, 32], sizes = [8, 32], strides = [1, 1]} : vector<8x128xf32> to vector<8x32xf32>
    %493 = vector.extract_strided_slice %490 {offsets = [0, 64], sizes = [8, 32], strides = [1, 1]} : vector<8x128xf32> to vector<8x32xf32>
    %cst_223 = arith.constant 2.000000e+00 : f32
    %494 = vector.broadcast %cst_223 : f32 to vector<8x32xf32>
    %495 = arith.mulf %494, %493 : vector<8x32xf32>
    %cst_224 = arith.constant 1.000000e+00 : f32
    %496 = vector.broadcast %cst_224 : f32 to vector<8x32xf32>
    %497 = arith.subf %495, %496 : vector<8x32xf32>
    %498 = vector.extract_strided_slice %490 {offsets = [0, 96], sizes = [8, 32], strides = [1, 1]} : vector<8x128xf32> to vector<8x32xf32>
    %499 = arith.mulf %492, %478 : vector<8x32xf32>
    %500 = arith.mulf %491, %497 : vector<8x32xf32>
    %501 = arith.addf %499, %500 : vector<8x32xf32>
    %502 = math.tanh %501 : vector<8x32xf32>
    %503 = arith.mulf %498, %502 : vector<8x32xf32>
    %c16_225 = arith.constant 16 : index
    %c0_226 = arith.constant 0 : index
    %504 = vector.load %arg8[%c16_225, %c0_226] : memref<64x32xf32, #tpu.memory_space<vmem>>, vector<8x32xf32>
    tpu.vector_store %arg8[%c16_225, %c0_226], %503 {strides = array<i32>} : memref<64x32xf32, #tpu.memory_space<vmem>>, vector<8x32xf32>,
    %505 = arith.truncf %503 : vector<8x32xf32> to vector<8x32xbf16>
    %cst_227 = arith.constant dense<0.000000e+00> : vector<8x128xf32>
    %506 = tpu.matmul %505, %425, %cst_227 {dimension_numbers = #tpu.dot_dimension_numbers<[1], [0], [0], [1], [0, 0, 1, 1], [], []>} : vector<8x32xbf16>, vector<32x128xbf16>, vector<8x128xf32> -> vector<8x128xf32>
    %c24_228 = arith.constant 24 : index
    %c0_229 = arith.constant 0 : index
    %507 = vector.load %arg7[%c24_228, %c0_229] : memref<64x128xf32, #tpu.memory_space<vmem>>, vector<8x128xf32>
    %508 = arith.addf %506, %507 : vector<8x128xf32>
    %509 = arith.negf %508 : vector<8x128xf32>
    %510 = math.exp %509 : vector<8x128xf32>
    %cst_230 = arith.constant 1.000000e+00 : f32
    %511 = vector.broadcast %cst_230 : f32 to vector<8x128xf32>
    %512 = arith.addf %511, %510 : vector<8x128xf32>
    %513 = arith.divf %511, %512 : vector<8x128xf32>
    %514 = vector.extract_strided_slice %513 {offsets = [0, 0], sizes = [8, 32], strides = [1, 1]} : vector<8x128xf32> to vector<8x32xf32>
    %515 = vector.extract_strided_slice %513 {offsets = [0, 32], sizes = [8, 32], strides = [1, 1]} : vector<8x128xf32> to vector<8x32xf32>
    %516 = vector.extract_strided_slice %513 {offsets = [0, 64], sizes = [8, 32], strides = [1, 1]} : vector<8x128xf32> to vector<8x32xf32>
    %cst_231 = arith.constant 2.000000e+00 : f32
    %517 = vector.broadcast %cst_231 : f32 to vector<8x32xf32>
    %518 = arith.mulf %517, %516 : vector<8x32xf32>
    %cst_232 = arith.constant 1.000000e+00 : f32
    %519 = vector.broadcast %cst_232 : f32 to vector<8x32xf32>
    %520 = arith.subf %518, %519 : vector<8x32xf32>
    %521 = vector.extract_strided_slice %513 {offsets = [0, 96], sizes = [8, 32], strides = [1, 1]} : vector<8x128xf32> to vector<8x32xf32>
    %522 = arith.mulf %515, %501 : vector<8x32xf32>
    %523 = arith.mulf %514, %520 : vector<8x32xf32>
    %524 = arith.addf %522, %523 : vector<8x32xf32>
    %525 = math.tanh %524 : vector<8x32xf32>
    %526 = arith.mulf %521, %525 : vector<8x32xf32>
    %c24_233 = arith.constant 24 : index
    %c0_234 = arith.constant 0 : index
    %527 = vector.load %arg8[%c24_233, %c0_234] : memref<64x32xf32, #tpu.memory_space<vmem>>, vector<8x32xf32>
    tpu.vector_store %arg8[%c24_233, %c0_234], %526 {strides = array<i32>} : memref<64x32xf32, #tpu.memory_space<vmem>>, vector<8x32xf32>,
    %528 = arith.truncf %526 : vector<8x32xf32> to vector<8x32xbf16>
    %cst_235 = arith.constant dense<0.000000e+00> : vector<8x128xf32>
    %529 = tpu.matmul %528, %425, %cst_235 {dimension_numbers = #tpu.dot_dimension_numbers<[1], [0], [0], [1], [0, 0, 1, 1], [], []>} : vector<8x32xbf16>, vector<32x128xbf16>, vector<8x128xf32> -> vector<8x128xf32>
    %c32_236 = arith.constant 32 : index
    %c0_237 = arith.constant 0 : index
    %530 = vector.load %arg7[%c32_236, %c0_237] : memref<64x128xf32, #tpu.memory_space<vmem>>, vector<8x128xf32>
    %531 = arith.addf %529, %530 : vector<8x128xf32>
    %532 = arith.negf %531 : vector<8x128xf32>
    %533 = math.exp %532 : vector<8x128xf32>
    %cst_238 = arith.constant 1.000000e+00 : f32
    %534 = vector.broadcast %cst_238 : f32 to vector<8x128xf32>
    %535 = arith.addf %534, %533 : vector<8x128xf32>
    %536 = arith.divf %534, %535 : vector<8x128xf32>
    %537 = vector.extract_strided_slice %536 {offsets = [0, 0], sizes = [8, 32], strides = [1, 1]} : vector<8x128xf32> to vector<8x32xf32>
    %538 = vector.extract_strided_slice %536 {offsets = [0, 32], sizes = [8, 32], strides = [1, 1]} : vector<8x128xf32> to vector<8x32xf32>
    %539 = vector.extract_strided_slice %536 {offsets = [0, 64], sizes = [8, 32], strides = [1, 1]} : vector<8x128xf32> to vector<8x32xf32>
    %cst_239 = arith.constant 2.000000e+00 : f32
    %540 = vector.broadcast %cst_239 : f32 to vector<8x32xf32>
    %541 = arith.mulf %540, %539 : vector<8x32xf32>
    %cst_240 = arith.constant 1.000000e+00 : f32
    %542 = vector.broadcast %cst_240 : f32 to vector<8x32xf32>
    %543 = arith.subf %541, %542 : vector<8x32xf32>
    %544 = vector.extract_strided_slice %536 {offsets = [0, 96], sizes = [8, 32], strides = [1, 1]} : vector<8x128xf32> to vector<8x32xf32>
    %545 = arith.mulf %538, %524 : vector<8x32xf32>
    %546 = arith.mulf %537, %543 : vector<8x32xf32>
    %547 = arith.addf %545, %546 : vector<8x32xf32>
    %548 = math.tanh %547 : vector<8x32xf32>
    %549 = arith.mulf %544, %548 : vector<8x32xf32>
    %c32_241 = arith.constant 32 : index
    %c0_242 = arith.constant 0 : index
    %550 = vector.load %arg8[%c32_241, %c0_242] : memref<64x32xf32, #tpu.memory_space<vmem>>, vector<8x32xf32>
    tpu.vector_store %arg8[%c32_241, %c0_242], %549 {strides = array<i32>} : memref<64x32xf32, #tpu.memory_space<vmem>>, vector<8x32xf32>,
    %551 = arith.truncf %549 : vector<8x32xf32> to vector<8x32xbf16>
    %cst_243 = arith.constant dense<0.000000e+00> : vector<8x128xf32>
    %552 = tpu.matmul %551, %425, %cst_243 {dimension_numbers = #tpu.dot_dimension_numbers<[1], [0], [0], [1], [0, 0, 1, 1], [], []>} : vector<8x32xbf16>, vector<32x128xbf16>, vector<8x128xf32> -> vector<8x128xf32>
    %c40_244 = arith.constant 40 : index
    %c0_245 = arith.constant 0 : index
    %553 = vector.load %arg7[%c40_244, %c0_245] : memref<64x128xf32, #tpu.memory_space<vmem>>, vector<8x128xf32>
    %554 = arith.addf %552, %553 : vector<8x128xf32>
    %555 = arith.negf %554 : vector<8x128xf32>
    %556 = math.exp %555 : vector<8x128xf32>
    %cst_246 = arith.constant 1.000000e+00 : f32
    %557 = vector.broadcast %cst_246 : f32 to vector<8x128xf32>
    %558 = arith.addf %557, %556 : vector<8x128xf32>
    %559 = arith.divf %557, %558 : vector<8x128xf32>
    %560 = vector.extract_strided_slice %559 {offsets = [0, 0], sizes = [8, 32], strides = [1, 1]} : vector<8x128xf32> to vector<8x32xf32>
    %561 = vector.extract_strided_slice %559 {offsets = [0, 32], sizes = [8, 32], strides = [1, 1]} : vector<8x128xf32> to vector<8x32xf32>
    %562 = vector.extract_strided_slice %559 {offsets = [0, 64], sizes = [8, 32], strides = [1, 1]} : vector<8x128xf32> to vector<8x32xf32>
    %cst_247 = arith.constant 2.000000e+00 : f32
    %563 = vector.broadcast %cst_247 : f32 to vector<8x32xf32>
    %564 = arith.mulf %563, %562 : vector<8x32xf32>
    %cst_248 = arith.constant 1.000000e+00 : f32
    %565 = vector.broadcast %cst_248 : f32 to vector<8x32xf32>
    %566 = arith.subf %564, %565 : vector<8x32xf32>
    %567 = vector.extract_strided_slice %559 {offsets = [0, 96], sizes = [8, 32], strides = [1, 1]} : vector<8x128xf32> to vector<8x32xf32>
    %568 = arith.mulf %561, %547 : vector<8x32xf32>
    %569 = arith.mulf %560, %566 : vector<8x32xf32>
    %570 = arith.addf %568, %569 : vector<8x32xf32>
    %571 = math.tanh %570 : vector<8x32xf32>
    %572 = arith.mulf %567, %571 : vector<8x32xf32>
    %c40_249 = arith.constant 40 : index
    %c0_250 = arith.constant 0 : index
    %573 = vector.load %arg8[%c40_249, %c0_250] : memref<64x32xf32, #tpu.memory_space<vmem>>, vector<8x32xf32>
    tpu.vector_store %arg8[%c40_249, %c0_250], %572 {strides = array<i32>} : memref<64x32xf32, #tpu.memory_space<vmem>>, vector<8x32xf32>,
    %574 = arith.truncf %572 : vector<8x32xf32> to vector<8x32xbf16>
    %cst_251 = arith.constant dense<0.000000e+00> : vector<8x128xf32>
    %575 = tpu.matmul %574, %425, %cst_251 {dimension_numbers = #tpu.dot_dimension_numbers<[1], [0], [0], [1], [0, 0, 1, 1], [], []>} : vector<8x32xbf16>, vector<32x128xbf16>, vector<8x128xf32> -> vector<8x128xf32>
    %c48_252 = arith.constant 48 : index
    %c0_253 = arith.constant 0 : index
    %576 = vector.load %arg7[%c48_252, %c0_253] : memref<64x128xf32, #tpu.memory_space<vmem>>, vector<8x128xf32>
    %577 = arith.addf %575, %576 : vector<8x128xf32>
    %578 = arith.negf %577 : vector<8x128xf32>
    %579 = math.exp %578 : vector<8x128xf32>
    %cst_254 = arith.constant 1.000000e+00 : f32
    %580 = vector.broadcast %cst_254 : f32 to vector<8x128xf32>
    %581 = arith.addf %580, %579 : vector<8x128xf32>
    %582 = arith.divf %580, %581 : vector<8x128xf32>
    %583 = vector.extract_strided_slice %582 {offsets = [0, 0], sizes = [8, 32], strides = [1, 1]} : vector<8x128xf32> to vector<8x32xf32>
    %584 = vector.extract_strided_slice %582 {offsets = [0, 32], sizes = [8, 32], strides = [1, 1]} : vector<8x128xf32> to vector<8x32xf32>
    %585 = vector.extract_strided_slice %582 {offsets = [0, 64], sizes = [8, 32], strides = [1, 1]} : vector<8x128xf32> to vector<8x32xf32>
    %cst_255 = arith.constant 2.000000e+00 : f32
    %586 = vector.broadcast %cst_255 : f32 to vector<8x32xf32>
    %587 = arith.mulf %586, %585 : vector<8x32xf32>
    %cst_256 = arith.constant 1.000000e+00 : f32
    %588 = vector.broadcast %cst_256 : f32 to vector<8x32xf32>
    %589 = arith.subf %587, %588 : vector<8x32xf32>
    %590 = vector.extract_strided_slice %582 {offsets = [0, 96], sizes = [8, 32], strides = [1, 1]} : vector<8x128xf32> to vector<8x32xf32>
    %591 = arith.mulf %584, %570 : vector<8x32xf32>
    %592 = arith.mulf %583, %589 : vector<8x32xf32>
    %593 = arith.addf %591, %592 : vector<8x32xf32>
    %594 = math.tanh %593 : vector<8x32xf32>
    %595 = arith.mulf %590, %594 : vector<8x32xf32>
    %c48_257 = arith.constant 48 : index
    %c0_258 = arith.constant 0 : index
    %596 = vector.load %arg8[%c48_257, %c0_258] : memref<64x32xf32, #tpu.memory_space<vmem>>, vector<8x32xf32>
    tpu.vector_store %arg8[%c48_257, %c0_258], %595 {strides = array<i32>} : memref<64x32xf32, #tpu.memory_space<vmem>>, vector<8x32xf32>,
    %597 = arith.truncf %595 : vector<8x32xf32> to vector<8x32xbf16>
    %cst_259 = arith.constant dense<0.000000e+00> : vector<8x128xf32>
    %598 = tpu.matmul %597, %425, %cst_259 {dimension_numbers = #tpu.dot_dimension_numbers<[1], [0], [0], [1], [0, 0, 1, 1], [], []>} : vector<8x32xbf16>, vector<32x128xbf16>, vector<8x128xf32> -> vector<8x128xf32>
    %c56_260 = arith.constant 56 : index
    %c0_261 = arith.constant 0 : index
    %599 = vector.load %arg7[%c56_260, %c0_261] : memref<64x128xf32, #tpu.memory_space<vmem>>, vector<8x128xf32>
    %600 = arith.addf %598, %599 : vector<8x128xf32>
    %601 = arith.negf %600 : vector<8x128xf32>
    %602 = math.exp %601 : vector<8x128xf32>
    %cst_262 = arith.constant 1.000000e+00 : f32
    %603 = vector.broadcast %cst_262 : f32 to vector<8x128xf32>
    %604 = arith.addf %603, %602 : vector<8x128xf32>
    %605 = arith.divf %603, %604 : vector<8x128xf32>
    %606 = vector.extract_strided_slice %605 {offsets = [0, 0], sizes = [8, 32], strides = [1, 1]} : vector<8x128xf32> to vector<8x32xf32>
    %607 = vector.extract_strided_slice %605 {offsets = [0, 32], sizes = [8, 32], strides = [1, 1]} : vector<8x128xf32> to vector<8x32xf32>
    %608 = vector.extract_strided_slice %605 {offsets = [0, 64], sizes = [8, 32], strides = [1, 1]} : vector<8x128xf32> to vector<8x32xf32>
    %cst_263 = arith.constant 2.000000e+00 : f32
    %609 = vector.broadcast %cst_263 : f32 to vector<8x32xf32>
    %610 = arith.mulf %609, %608 : vector<8x32xf32>
    %cst_264 = arith.constant 1.000000e+00 : f32
    %611 = vector.broadcast %cst_264 : f32 to vector<8x32xf32>
    %612 = arith.subf %610, %611 : vector<8x32xf32>
    %613 = vector.extract_strided_slice %605 {offsets = [0, 96], sizes = [8, 32], strides = [1, 1]} : vector<8x128xf32> to vector<8x32xf32>
    %614 = arith.mulf %607, %593 : vector<8x32xf32>
    %615 = arith.mulf %606, %612 : vector<8x32xf32>
    %616 = arith.addf %614, %615 : vector<8x32xf32>
    %617 = math.tanh %616 : vector<8x32xf32>
    %618 = arith.mulf %613, %617 : vector<8x32xf32>
    %c56_265 = arith.constant 56 : index
    %c0_266 = arith.constant 0 : index
    %619 = vector.load %arg8[%c56_265, %c0_266] : memref<64x32xf32, #tpu.memory_space<vmem>>, vector<8x32xf32>
    tpu.vector_store %arg8[%c56_265, %c0_266], %618 {strides = array<i32>} : memref<64x32xf32, #tpu.memory_space<vmem>>, vector<8x32xf32>,
    %c3_267 = arith.constant 3 : index
    %c0_268 = arith.constant 0 : index
    %c0_269 = arith.constant 0 : index
    %620 = vector.load %arg1[%c3_267, %c0_268, %c0_269] : memref<4x32x128xbf16, #tpu.memory_space<vmem>>, vector<1x32x128xbf16>
    %621 = vector.shape_cast %620 : vector<1x32x128xbf16> to vector<32x128xbf16>
    %c3_270 = arith.constant 3 : index
    %c0_271 = arith.constant 0 : index
    %c0_272 = arith.constant 0 : index
    %622 = vector.load %arg2[%c3_270, %c0_271, %c0_272] : memref<4x32x128xbf16, #tpu.memory_space<vmem>>, vector<1x32x128xbf16>
    %623 = vector.shape_cast %622 : vector<1x32x128xbf16> to vector<32x128xbf16>
    %c3_273 = arith.constant 3 : index
    %c0_274 = arith.constant 0 : index
    %c0_275 = arith.constant 0 : index
    %624 = vector.load %arg3[%c3_273, %c0_274, %c0_275] : memref<4x1x128xf32, #tpu.memory_space<vmem>>, vector<1x1x128xf32>
    %625 = vector.shape_cast %624 : vector<1x1x128xf32> to vector<1x128xf32>
    %c0_276 = arith.constant 0 : index
    %c0_277 = arith.constant 0 : index
    %626 = vector.load %arg8[%c0_276, %c0_277] : memref<64x32xf32, #tpu.memory_space<vmem>>, vector<64x32xf32>
    %627 = arith.truncf %626 : vector<64x32xf32> to vector<64x32xbf16>
    %cst_278 = arith.constant dense<0.000000e+00> : vector<64x128xf32>
    %628 = tpu.matmul %627, %621, %cst_278 {dimension_numbers = #tpu.dot_dimension_numbers<[1], [0], [0], [1], [0, 0, 1, 1], [], []>} : vector<64x32xbf16>, vector<32x128xbf16>, vector<64x128xf32> -> vector<64x128xf32>
    %629 = vector.broadcast %625 : vector<1x128xf32> to vector<64x128xf32>
    %630 = arith.addf %628, %629 : vector<64x128xf32>
    %c0_279 = arith.constant 0 : index
    %c0_280 = arith.constant 0 : index
    %631 = vector.load %arg7[%c0_279, %c0_280] : memref<64x128xf32, #tpu.memory_space<vmem>>, vector<64x128xf32>
    tpu.vector_store %arg7[%c0_279, %c0_280], %630 {strides = array<i32>} : memref<64x128xf32, #tpu.memory_space<vmem>>, vector<64x128xf32>,
    %cst_281 = arith.constant 0.000000e+00 : f32
    %632 = vector.broadcast %cst_281 : f32 to vector<8x32xf32>
    %cst_282 = arith.constant 0.000000e+00 : f32
    %633 = vector.broadcast %cst_282 : f32 to vector<8x32xf32>
    %634 = arith.truncf %632 : vector<8x32xf32> to vector<8x32xbf16>
    %cst_283 = arith.constant dense<0.000000e+00> : vector<8x128xf32>
    %635 = tpu.matmul %634, %623, %cst_283 {dimension_numbers = #tpu.dot_dimension_numbers<[1], [0], [0], [1], [0, 0, 1, 1], [], []>} : vector<8x32xbf16>, vector<32x128xbf16>, vector<8x128xf32> -> vector<8x128xf32>
    %c0_284 = arith.constant 0 : index
    %c0_285 = arith.constant 0 : index
    %636 = vector.load %arg7[%c0_284, %c0_285] : memref<64x128xf32, #tpu.memory_space<vmem>>, vector<8x128xf32>
    %637 = arith.addf %635, %636 : vector<8x128xf32>
    %638 = arith.negf %637 : vector<8x128xf32>
    %639 = math.exp %638 : vector<8x128xf32>
    %cst_286 = arith.constant 1.000000e+00 : f32
    %640 = vector.broadcast %cst_286 : f32 to vector<8x128xf32>
    %641 = arith.addf %640, %639 : vector<8x128xf32>
    %642 = arith.divf %640, %641 : vector<8x128xf32>
    %643 = vector.extract_strided_slice %642 {offsets = [0, 0], sizes = [8, 32], strides = [1, 1]} : vector<8x128xf32> to vector<8x32xf32>
    %644 = vector.extract_strided_slice %642 {offsets = [0, 32], sizes = [8, 32], strides = [1, 1]} : vector<8x128xf32> to vector<8x32xf32>
    %645 = vector.extract_strided_slice %642 {offsets = [0, 64], sizes = [8, 32], strides = [1, 1]} : vector<8x128xf32> to vector<8x32xf32>
    %cst_287 = arith.constant 2.000000e+00 : f32
    %646 = vector.broadcast %cst_287 : f32 to vector<8x32xf32>
    %647 = arith.mulf %646, %645 : vector<8x32xf32>
    %cst_288 = arith.constant 1.000000e+00 : f32
    %648 = vector.broadcast %cst_288 : f32 to vector<8x32xf32>
    %649 = arith.subf %647, %648 : vector<8x32xf32>
    %650 = vector.extract_strided_slice %642 {offsets = [0, 96], sizes = [8, 32], strides = [1, 1]} : vector<8x128xf32> to vector<8x32xf32>
    %651 = arith.mulf %644, %633 : vector<8x32xf32>
    %652 = arith.mulf %643, %649 : vector<8x32xf32>
    %653 = arith.addf %651, %652 : vector<8x32xf32>
    %654 = math.tanh %653 : vector<8x32xf32>
    %655 = arith.mulf %650, %654 : vector<8x32xf32>
    %656 = arith.truncf %655 : vector<8x32xf32> to vector<8x32xbf16>
    %cst_289 = arith.constant dense<0.000000e+00> : vector<8x128xf32>
    %657 = tpu.matmul %656, %623, %cst_289 {dimension_numbers = #tpu.dot_dimension_numbers<[1], [0], [0], [1], [0, 0, 1, 1], [], []>} : vector<8x32xbf16>, vector<32x128xbf16>, vector<8x128xf32> -> vector<8x128xf32>
    %c8_290 = arith.constant 8 : index
    %c0_291 = arith.constant 0 : index
    %658 = vector.load %arg7[%c8_290, %c0_291] : memref<64x128xf32, #tpu.memory_space<vmem>>, vector<8x128xf32>
    %659 = arith.addf %657, %658 : vector<8x128xf32>
    %660 = arith.negf %659 : vector<8x128xf32>
    %661 = math.exp %660 : vector<8x128xf32>
    %cst_292 = arith.constant 1.000000e+00 : f32
    %662 = vector.broadcast %cst_292 : f32 to vector<8x128xf32>
    %663 = arith.addf %662, %661 : vector<8x128xf32>
    %664 = arith.divf %662, %663 : vector<8x128xf32>
    %665 = vector.extract_strided_slice %664 {offsets = [0, 0], sizes = [8, 32], strides = [1, 1]} : vector<8x128xf32> to vector<8x32xf32>
    %666 = vector.extract_strided_slice %664 {offsets = [0, 32], sizes = [8, 32], strides = [1, 1]} : vector<8x128xf32> to vector<8x32xf32>
    %667 = vector.extract_strided_slice %664 {offsets = [0, 64], sizes = [8, 32], strides = [1, 1]} : vector<8x128xf32> to vector<8x32xf32>
    %cst_293 = arith.constant 2.000000e+00 : f32
    %668 = vector.broadcast %cst_293 : f32 to vector<8x32xf32>
    %669 = arith.mulf %668, %667 : vector<8x32xf32>
    %cst_294 = arith.constant 1.000000e+00 : f32
    %670 = vector.broadcast %cst_294 : f32 to vector<8x32xf32>
    %671 = arith.subf %669, %670 : vector<8x32xf32>
    %672 = vector.extract_strided_slice %664 {offsets = [0, 96], sizes = [8, 32], strides = [1, 1]} : vector<8x128xf32> to vector<8x32xf32>
    %673 = arith.mulf %666, %653 : vector<8x32xf32>
    %674 = arith.mulf %665, %671 : vector<8x32xf32>
    %675 = arith.addf %673, %674 : vector<8x32xf32>
    %676 = math.tanh %675 : vector<8x32xf32>
    %677 = arith.mulf %672, %676 : vector<8x32xf32>
    %678 = arith.truncf %677 : vector<8x32xf32> to vector<8x32xbf16>
    %cst_295 = arith.constant dense<0.000000e+00> : vector<8x128xf32>
    %679 = tpu.matmul %678, %623, %cst_295 {dimension_numbers = #tpu.dot_dimension_numbers<[1], [0], [0], [1], [0, 0, 1, 1], [], []>} : vector<8x32xbf16>, vector<32x128xbf16>, vector<8x128xf32> -> vector<8x128xf32>
    %c16_296 = arith.constant 16 : index
    %c0_297 = arith.constant 0 : index
    %680 = vector.load %arg7[%c16_296, %c0_297] : memref<64x128xf32, #tpu.memory_space<vmem>>, vector<8x128xf32>
    %681 = arith.addf %679, %680 : vector<8x128xf32>
    %682 = arith.negf %681 : vector<8x128xf32>
    %683 = math.exp %682 : vector<8x128xf32>
    %cst_298 = arith.constant 1.000000e+00 : f32
    %684 = vector.broadcast %cst_298 : f32 to vector<8x128xf32>
    %685 = arith.addf %684, %683 : vector<8x128xf32>
    %686 = arith.divf %684, %685 : vector<8x128xf32>
    %687 = vector.extract_strided_slice %686 {offsets = [0, 0], sizes = [8, 32], strides = [1, 1]} : vector<8x128xf32> to vector<8x32xf32>
    %688 = vector.extract_strided_slice %686 {offsets = [0, 32], sizes = [8, 32], strides = [1, 1]} : vector<8x128xf32> to vector<8x32xf32>
    %689 = vector.extract_strided_slice %686 {offsets = [0, 64], sizes = [8, 32], strides = [1, 1]} : vector<8x128xf32> to vector<8x32xf32>
    %cst_299 = arith.constant 2.000000e+00 : f32
    %690 = vector.broadcast %cst_299 : f32 to vector<8x32xf32>
    %691 = arith.mulf %690, %689 : vector<8x32xf32>
    %cst_300 = arith.constant 1.000000e+00 : f32
    %692 = vector.broadcast %cst_300 : f32 to vector<8x32xf32>
    %693 = arith.subf %691, %692 : vector<8x32xf32>
    %694 = vector.extract_strided_slice %686 {offsets = [0, 96], sizes = [8, 32], strides = [1, 1]} : vector<8x128xf32> to vector<8x32xf32>
    %695 = arith.mulf %688, %675 : vector<8x32xf32>
    %696 = arith.mulf %687, %693 : vector<8x32xf32>
    %697 = arith.addf %695, %696 : vector<8x32xf32>
    %698 = math.tanh %697 : vector<8x32xf32>
    %699 = arith.mulf %694, %698 : vector<8x32xf32>
    %700 = arith.truncf %699 : vector<8x32xf32> to vector<8x32xbf16>
    %cst_301 = arith.constant dense<0.000000e+00> : vector<8x128xf32>
    %701 = tpu.matmul %700, %623, %cst_301 {dimension_numbers = #tpu.dot_dimension_numbers<[1], [0], [0], [1], [0, 0, 1, 1], [], []>} : vector<8x32xbf16>, vector<32x128xbf16>, vector<8x128xf32> -> vector<8x128xf32>
    %c24_302 = arith.constant 24 : index
    %c0_303 = arith.constant 0 : index
    %702 = vector.load %arg7[%c24_302, %c0_303] : memref<64x128xf32, #tpu.memory_space<vmem>>, vector<8x128xf32>
    %703 = arith.addf %701, %702 : vector<8x128xf32>
    %704 = arith.negf %703 : vector<8x128xf32>
    %705 = math.exp %704 : vector<8x128xf32>
    %cst_304 = arith.constant 1.000000e+00 : f32
    %706 = vector.broadcast %cst_304 : f32 to vector<8x128xf32>
    %707 = arith.addf %706, %705 : vector<8x128xf32>
    %708 = arith.divf %706, %707 : vector<8x128xf32>
    %709 = vector.extract_strided_slice %708 {offsets = [0, 0], sizes = [8, 32], strides = [1, 1]} : vector<8x128xf32> to vector<8x32xf32>
    %710 = vector.extract_strided_slice %708 {offsets = [0, 32], sizes = [8, 32], strides = [1, 1]} : vector<8x128xf32> to vector<8x32xf32>
    %711 = vector.extract_strided_slice %708 {offsets = [0, 64], sizes = [8, 32], strides = [1, 1]} : vector<8x128xf32> to vector<8x32xf32>
    %cst_305 = arith.constant 2.000000e+00 : f32
    %712 = vector.broadcast %cst_305 : f32 to vector<8x32xf32>
    %713 = arith.mulf %712, %711 : vector<8x32xf32>
    %cst_306 = arith.constant 1.000000e+00 : f32
    %714 = vector.broadcast %cst_306 : f32 to vector<8x32xf32>
    %715 = arith.subf %713, %714 : vector<8x32xf32>
    %716 = vector.extract_strided_slice %708 {offsets = [0, 96], sizes = [8, 32], strides = [1, 1]} : vector<8x128xf32> to vector<8x32xf32>
    %717 = arith.mulf %710, %697 : vector<8x32xf32>
    %718 = arith.mulf %709, %715 : vector<8x32xf32>
    %719 = arith.addf %717, %718 : vector<8x32xf32>
    %720 = math.tanh %719 : vector<8x32xf32>
    %721 = arith.mulf %716, %720 : vector<8x32xf32>
    %722 = arith.truncf %721 : vector<8x32xf32> to vector<8x32xbf16>
    %cst_307 = arith.constant dense<0.000000e+00> : vector<8x128xf32>
    %723 = tpu.matmul %722, %623, %cst_307 {dimension_numbers = #tpu.dot_dimension_numbers<[1], [0], [0], [1], [0, 0, 1, 1], [], []>} : vector<8x32xbf16>, vector<32x128xbf16>, vector<8x128xf32> -> vector<8x128xf32>
    %c32_308 = arith.constant 32 : index
    %c0_309 = arith.constant 0 : index
    %724 = vector.load %arg7[%c32_308, %c0_309] : memref<64x128xf32, #tpu.memory_space<vmem>>, vector<8x128xf32>
    %725 = arith.addf %723, %724 : vector<8x128xf32>
    %726 = arith.negf %725 : vector<8x128xf32>
    %727 = math.exp %726 : vector<8x128xf32>
    %cst_310 = arith.constant 1.000000e+00 : f32
    %728 = vector.broadcast %cst_310 : f32 to vector<8x128xf32>
    %729 = arith.addf %728, %727 : vector<8x128xf32>
    %730 = arith.divf %728, %729 : vector<8x128xf32>
    %731 = vector.extract_strided_slice %730 {offsets = [0, 0], sizes = [8, 32], strides = [1, 1]} : vector<8x128xf32> to vector<8x32xf32>
    %732 = vector.extract_strided_slice %730 {offsets = [0, 32], sizes = [8, 32], strides = [1, 1]} : vector<8x128xf32> to vector<8x32xf32>
    %733 = vector.extract_strided_slice %730 {offsets = [0, 64], sizes = [8, 32], strides = [1, 1]} : vector<8x128xf32> to vector<8x32xf32>
    %cst_311 = arith.constant 2.000000e+00 : f32
    %734 = vector.broadcast %cst_311 : f32 to vector<8x32xf32>
    %735 = arith.mulf %734, %733 : vector<8x32xf32>
    %cst_312 = arith.constant 1.000000e+00 : f32
    %736 = vector.broadcast %cst_312 : f32 to vector<8x32xf32>
    %737 = arith.subf %735, %736 : vector<8x32xf32>
    %738 = vector.extract_strided_slice %730 {offsets = [0, 96], sizes = [8, 32], strides = [1, 1]} : vector<8x128xf32> to vector<8x32xf32>
    %739 = arith.mulf %732, %719 : vector<8x32xf32>
    %740 = arith.mulf %731, %737 : vector<8x32xf32>
    %741 = arith.addf %739, %740 : vector<8x32xf32>
    %742 = math.tanh %741 : vector<8x32xf32>
    %743 = arith.mulf %738, %742 : vector<8x32xf32>
    %744 = arith.truncf %743 : vector<8x32xf32> to vector<8x32xbf16>
    %cst_313 = arith.constant dense<0.000000e+00> : vector<8x128xf32>
    %745 = tpu.matmul %744, %623, %cst_313 {dimension_numbers = #tpu.dot_dimension_numbers<[1], [0], [0], [1], [0, 0, 1, 1], [], []>} : vector<8x32xbf16>, vector<32x128xbf16>, vector<8x128xf32> -> vector<8x128xf32>
    %c40_314 = arith.constant 40 : index
    %c0_315 = arith.constant 0 : index
    %746 = vector.load %arg7[%c40_314, %c0_315] : memref<64x128xf32, #tpu.memory_space<vmem>>, vector<8x128xf32>
    %747 = arith.addf %745, %746 : vector<8x128xf32>
    %748 = arith.negf %747 : vector<8x128xf32>
    %749 = math.exp %748 : vector<8x128xf32>
    %cst_316 = arith.constant 1.000000e+00 : f32
    %750 = vector.broadcast %cst_316 : f32 to vector<8x128xf32>
    %751 = arith.addf %750, %749 : vector<8x128xf32>
    %752 = arith.divf %750, %751 : vector<8x128xf32>
    %753 = vector.extract_strided_slice %752 {offsets = [0, 0], sizes = [8, 32], strides = [1, 1]} : vector<8x128xf32> to vector<8x32xf32>
    %754 = vector.extract_strided_slice %752 {offsets = [0, 32], sizes = [8, 32], strides = [1, 1]} : vector<8x128xf32> to vector<8x32xf32>
    %755 = vector.extract_strided_slice %752 {offsets = [0, 64], sizes = [8, 32], strides = [1, 1]} : vector<8x128xf32> to vector<8x32xf32>
    %cst_317 = arith.constant 2.000000e+00 : f32
    %756 = vector.broadcast %cst_317 : f32 to vector<8x32xf32>
    %757 = arith.mulf %756, %755 : vector<8x32xf32>
    %cst_318 = arith.constant 1.000000e+00 : f32
    %758 = vector.broadcast %cst_318 : f32 to vector<8x32xf32>
    %759 = arith.subf %757, %758 : vector<8x32xf32>
    %760 = vector.extract_strided_slice %752 {offsets = [0, 96], sizes = [8, 32], strides = [1, 1]} : vector<8x128xf32> to vector<8x32xf32>
    %761 = arith.mulf %754, %741 : vector<8x32xf32>
    %762 = arith.mulf %753, %759 : vector<8x32xf32>
    %763 = arith.addf %761, %762 : vector<8x32xf32>
    %764 = math.tanh %763 : vector<8x32xf32>
    %765 = arith.mulf %760, %764 : vector<8x32xf32>
    %766 = arith.truncf %765 : vector<8x32xf32> to vector<8x32xbf16>
    %cst_319 = arith.constant dense<0.000000e+00> : vector<8x128xf32>
    %767 = tpu.matmul %766, %623, %cst_319 {dimension_numbers = #tpu.dot_dimension_numbers<[1], [0], [0], [1], [0, 0, 1, 1], [], []>} : vector<8x32xbf16>, vector<32x128xbf16>, vector<8x128xf32> -> vector<8x128xf32>
    %c48_320 = arith.constant 48 : index
    %c0_321 = arith.constant 0 : index
    %768 = vector.load %arg7[%c48_320, %c0_321] : memref<64x128xf32, #tpu.memory_space<vmem>>, vector<8x128xf32>
    %769 = arith.addf %767, %768 : vector<8x128xf32>
    %770 = arith.negf %769 : vector<8x128xf32>
    %771 = math.exp %770 : vector<8x128xf32>
    %cst_322 = arith.constant 1.000000e+00 : f32
    %772 = vector.broadcast %cst_322 : f32 to vector<8x128xf32>
    %773 = arith.addf %772, %771 : vector<8x128xf32>
    %774 = arith.divf %772, %773 : vector<8x128xf32>
    %775 = vector.extract_strided_slice %774 {offsets = [0, 0], sizes = [8, 32], strides = [1, 1]} : vector<8x128xf32> to vector<8x32xf32>
    %776 = vector.extract_strided_slice %774 {offsets = [0, 32], sizes = [8, 32], strides = [1, 1]} : vector<8x128xf32> to vector<8x32xf32>
    %777 = vector.extract_strided_slice %774 {offsets = [0, 64], sizes = [8, 32], strides = [1, 1]} : vector<8x128xf32> to vector<8x32xf32>
    %cst_323 = arith.constant 2.000000e+00 : f32
    %778 = vector.broadcast %cst_323 : f32 to vector<8x32xf32>
    %779 = arith.mulf %778, %777 : vector<8x32xf32>
    %cst_324 = arith.constant 1.000000e+00 : f32
    %780 = vector.broadcast %cst_324 : f32 to vector<8x32xf32>
    %781 = arith.subf %779, %780 : vector<8x32xf32>
    %782 = vector.extract_strided_slice %774 {offsets = [0, 96], sizes = [8, 32], strides = [1, 1]} : vector<8x128xf32> to vector<8x32xf32>
    %783 = arith.mulf %776, %763 : vector<8x32xf32>
    %784 = arith.mulf %775, %781 : vector<8x32xf32>
    %785 = arith.addf %783, %784 : vector<8x32xf32>
    %786 = math.tanh %785 : vector<8x32xf32>
    %787 = arith.mulf %782, %786 : vector<8x32xf32>
    %788 = arith.truncf %787 : vector<8x32xf32> to vector<8x32xbf16>
    %cst_325 = arith.constant dense<0.000000e+00> : vector<8x128xf32>
    %789 = tpu.matmul %788, %623, %cst_325 {dimension_numbers = #tpu.dot_dimension_numbers<[1], [0], [0], [1], [0, 0, 1, 1], [], []>} : vector<8x32xbf16>, vector<32x128xbf16>, vector<8x128xf32> -> vector<8x128xf32>
    %c56_326 = arith.constant 56 : index
    %c0_327 = arith.constant 0 : index
    %790 = vector.load %arg7[%c56_326, %c0_327] : memref<64x128xf32, #tpu.memory_space<vmem>>, vector<8x128xf32>
    %791 = arith.addf %789, %790 : vector<8x128xf32>
    %792 = arith.negf %791 : vector<8x128xf32>
    %793 = math.exp %792 : vector<8x128xf32>
    %cst_328 = arith.constant 1.000000e+00 : f32
    %794 = vector.broadcast %cst_328 : f32 to vector<8x128xf32>
    %795 = arith.addf %794, %793 : vector<8x128xf32>
    %796 = arith.divf %794, %795 : vector<8x128xf32>
    %797 = vector.extract_strided_slice %796 {offsets = [0, 0], sizes = [8, 32], strides = [1, 1]} : vector<8x128xf32> to vector<8x32xf32>
    %798 = vector.extract_strided_slice %796 {offsets = [0, 32], sizes = [8, 32], strides = [1, 1]} : vector<8x128xf32> to vector<8x32xf32>
    %799 = vector.extract_strided_slice %796 {offsets = [0, 64], sizes = [8, 32], strides = [1, 1]} : vector<8x128xf32> to vector<8x32xf32>
    %cst_329 = arith.constant 2.000000e+00 : f32
    %800 = vector.broadcast %cst_329 : f32 to vector<8x32xf32>
    %801 = arith.mulf %800, %799 : vector<8x32xf32>
    %cst_330 = arith.constant 1.000000e+00 : f32
    %802 = vector.broadcast %cst_330 : f32 to vector<8x32xf32>
    %803 = arith.subf %801, %802 : vector<8x32xf32>
    %804 = vector.extract_strided_slice %796 {offsets = [0, 96], sizes = [8, 32], strides = [1, 1]} : vector<8x128xf32> to vector<8x32xf32>
    %805 = arith.mulf %798, %785 : vector<8x32xf32>
    %806 = arith.mulf %797, %803 : vector<8x32xf32>
    %807 = arith.addf %805, %806 : vector<8x32xf32>
    %808 = math.tanh %807 : vector<8x32xf32>
    %809 = arith.mulf %804, %808 : vector<8x32xf32>
    %c0_331 = arith.constant 0 : index
    %c0_332 = arith.constant 0 : index
    %810 = vector.load %arg4[%c0_331, %c0_332] : memref<32x1xf32, #tpu.memory_space<vmem>>, vector<32x1xf32>
    %cst_333 = arith.constant dense<0.000000e+00> : vector<8x1xf32>
    %811 = tpu.matmul %809, %810, %cst_333 {dimension_numbers = #tpu.dot_dimension_numbers<[1], [0], [0], [1], [0, 0, 1, 1], [], []>} : vector<8x32xf32>, vector<32x1xf32>, vector<8x1xf32> -> vector<8x1xf32>
    %c0_334 = arith.constant 0 : index
    %c0_335 = arith.constant 0 : index
    %812 = vector.load %arg5[%c0_334, %c0_335] : memref<1x1xf32, #tpu.memory_space<vmem>>, vector<1x1xf32>
    %813 = vector.broadcast %812 : vector<1x1xf32> to vector<8x1xf32>
    %814 = arith.addf %811, %813 : vector<8x1xf32>
    %815 = vector.extract_strided_slice %814 {offsets = [0, 0], sizes = [2, 1], strides = [1, 1]} : vector<8x1xf32> to vector<2x1xf32>
    %c0_336 = arith.constant 0 : index
    %c0_337 = arith.constant 0 : index
    %816 = vector.load %arg6[%c0_336, %c0_337] : memref<2x1xf32, #tpu.memory_space<vmem>>, vector<2x1xf32>
    tpu.vector_store %arg6[%c0_336, %c0_337], %815 {strides = array<i32>} : memref<2x1xf32, #tpu.memory_space<vmem>>, vector<2x1xf32>,
    return
  }
}

</mosaic_0001>

<bundles_post_ra>
// kernel: tpu_custom_call.1
= control target key start
LH: loop header
LB: loop body
LE: loop exit
PB: predicated region body
PF: predicated region fallthrough
CT: control target
= control target key end

     0   :  { %s4907_s0 = inlined_call_operand.vmem [shape: f32[2,8,16], index: 0, kind: input, shape index: {}]   ;;  %s4908_s1 = inlined_call_operand.hbm [shape: bf16[4,32,128], index: 1, kind: input, shape index: {}]   ;;  %s4909_s2 = inlined_call_operand.hbm [shape: bf16[4,32,128], index: 2, kind: input, shape index: {}]   ;;  %s4910_s3 = inlined_call_operand.vmem [shape: f32[4,1,128], index: 3, kind: input, shape index: {}]   ;;  %s4911_s4 = inlined_call_operand.vmem [shape: f32[32,1], index: 4, kind: input, shape index: {}]   ;;  %s4912_s5 = inlined_call_operand.<no memory space> [shape: f32[1,1], index: 5, kind: input, shape index: {}]   ;;  %s4913_s6 = inlined_call_operand.vmem [shape: f32[2,1], index: 6, kind: output, shape index: {}]  }
   0x1   :  { %v11_v0 = vstv %s4912_s5 }
   0x2   :  { %12 = vst [vmem:[#allocation4] sm:$0x1] %v11_v0 }
   0x3   :  { %13 = vsyncpa [#allocation6], 0 }
   0x4   :  { %14 = vsyncpa [#allocation8], 0  ;;  %s4051_s23 = smov [#allocation5]   ;;  %s4003_s27 = scalar_lea.hbm %s4908_s1, 1024 }
   0x5   :  { %s22_s24 = sshll.u32 %s4051_s23, 4  ;;  %p4004_p0 = scmp.ne.s32.totalorder %s4908_s1, %s4003_s27  ;;  %s23_s24 = int_to_ptr.vmem [resolvable:$true] %s22_s24 }
   0x6   :  { %p4007_p1 = scmp.lt.u32.totalorder %s4003_s27, %s4908_s1 }
   0x8   :  { %p4009_p2 = pnand %p4007_p1, %p4004_p0 }
   0xa   :  { %4012 = shalt.err (!%p4009_p2)
}
   0xb   :  { %s4013_s5 = scalar_lea.vmem %s23_s24, 1024  ;;  %p4018_p4 = scmp.lt.s32.totalorder %s23_s24, %s23_s24 }
   0xc   :  { %p4014_p3 = scmp.ne.s32.totalorder %s23_s24, %s4013_s5  ;;  %p4019_p5 = scmp.lt.s32.totalorder %s4013_s5, %s4013_s5 }
   0xe   :  { %p4020_p6 = por %p4019_p5, %p4018_p4 }
  0x10   :  { %p4021_p7 = pnand %p4020_p6, %p4014_p3 }
  0x12   :  { %4024 = shalt.err (!%p4021_p7)
}
  0x13   :  { %s4052_s8 = smov 64   ;;  %s4053_s9 = smov 4  }
  0x14   :  { %28 = dma.hbm_to_vmem [thread:$0]  %s4908_s1, 1024, %s23_s24, [#allocation6], %s4052_s8, %s4052_s8, %s4053_s9  }
  0x15   :  { %s4054_s12 = smov [#allocation7]   ;;  %s4025_s16 = scalar_lea.hbm %s4909_s2, 1024 }
  0x16   :  { %s34_s13 = sshll.u32 %s4054_s12, 4  ;;  %p4026_p8 = scmp.ne.s32.totalorder %s4909_s2, %s4025_s16  ;;  %s35_s13 = int_to_ptr.vmem [resolvable:$true] %s34_s13 }
  0x17   :  { %p4029_p9 = scmp.lt.u32.totalorder %s4025_s16, %s4909_s2 }
  0x19   :  { %p4031_p10 = pnand %p4029_p9, %p4026_p8 }
  0x1b   :  { %4034 = shalt.err (!%p4031_p10)
}
  0x1c   :  { %s4035_s21 = scalar_lea.vmem %s35_s13, 1024  ;;  %p4040_p12 = scmp.lt.s32.totalorder %s35_s13, %s35_s13 }
  0x1d   :  { %p4036_p11 = scmp.ne.s32.totalorder %s35_s13, %s4035_s21  ;;  %p4041_p13 = scmp.lt.s32.totalorder %s4035_s21, %s4035_s21 }
  0x1f   :  { %p4042_p0 = por %p4041_p13, %p4040_p12 }
  0x21   :  { %p4043_p1 = pnand %p4042_p0, %p4036_p11 }
  0x23   :  { %4046 = shalt.err (!%p4043_p1)
}
  0x24   :  { %40 = dma.hbm_to_vmem [thread:$0]  %s4909_s2, 1024, %s35_s13, [#allocation8], %s4052_s8, %s4052_s8, %s4053_s9  }
  0x25   :  { %4047 = dma.done.wait [#allocation6], 1024  }
  0x26   :  { %4048 = vsyncadd [#allocation6], 4294966272 }
  0x27   :  { %4049 = dma.done.wait [#allocation8], 1024  }
  0x28   :  { %4050 = vsyncadd [#allocation8], 4294966272  ;;  %vm54_vm0 = vcmask 261120   ;;  %v4055_v1 = vmov 0.0   ;;  %vm4056_vm1 = vmmov 0   ;;  %v3795_v2 = vld [vmem:[#allocation5] sm:$0xff]  }
  0x29   :  { %3477 = vmatprep.subr.bf16.mxu1 %v4055_v1  ;;  %55 = vst.msk [vmem:[#allocation3] sm:$0xff] %vm54_vm0, %v4055_v1  ;;  %56 = vst.msk [vmem:[#allocation3 + $0x8] sm:$0xff] %vm54_vm0, %v4055_v1  ;;  %3481 = vmatprep.mubr.msk.bf16.mxu1 %vm4056_vm1, %v4055_v1  ;;  %v4145_v3 = vld [vmem:[#allocation7] sm:$0xff]   ;;  %v3797_v4 = vld [vmem:[#allocation5 + $0x8] sm:$0xff]   ;;  %vm68_vm2 = vcmask 1041409   ;;  %vm71_vm3 = vcmask 123904  }
  0x2a   :  { %57 = vst.msk [vmem:[#allocation3 + $0x10] sm:$0xff] %vm54_vm0, %v4055_v1  ;;  %58 = vst.msk [vmem:[#allocation3 + $0x18] sm:$0xff] %vm54_vm0, %v4055_v1  ;;  %3465 = vmatprep.subr.bf16.mxu0 %v3795_v2  ;;  %3478 = vmatpush3.bf16.msra.mxu1 %v4145_v3  ;;  %v4148_v5 = vld [vmem:[#allocation7 + $0x8] sm:$0xff]   ;;  %v63_v6 = vld [vmem:[%s4907_s0] sm:$0x1]  ;;  %v4057_v22 = vmov 0  }
  0x2b   :  { %59 = vst.msk [vmem:[#allocation3 + $0x20] sm:$0xff] %vm54_vm0, %v4055_v1  ;;  %60 = vst.msk [vmem:[#allocation3 + $0x28] sm:$0xff] %vm54_vm0, %v4055_v1  ;;  %3466 = vmatpush3.bf16.msra.mxu0 %v3795_v2  ;;  %3479 = vmatprep.subr.bf16.mxu1 %v4055_v1  ;;  %v64_v7 = vld [vmem:[%s4907_s0 + $0x8] sm:$0x1]  ;;  %v73_v8 = vld [vmem:[%s4907_s0 + $0x1] sm:$0x1] }
  0x2c   :  { %61 = vst.msk [vmem:[#allocation3 + $0x30] sm:$0xff] %vm54_vm0, %v4055_v1  ;;  %62 = vst.msk [vmem:[#allocation3 + $0x38] sm:$0xff] %vm54_vm0, %v4055_v1  ;;  %3467 = vmatprep.subr.bf16.mxu0 %v3797_v4  ;;  %v67_v9 = vrot.slane %v64_v7, 7  ;;  %v74_v10 = vld [vmem:[%s4907_s0 + $0x9] sm:$0x1]  ;;  %s4058_s16 = smov 32  }
  0x2d   :  { %v81_v11 = vld [vmem:[%s4907_s0 + $0x2] sm:$0x1]  ;;  %v77_v12 = vrot.slane %v74_v10, 7  ;;  %v82_v13 = vld [vmem:[%s4907_s0 + $0xa] sm:$0x1]  ;;  %vm3199_vm4 = vcmask 1024  }
  0x2e   :  { %v89_v14 = vld [vmem:[%s4907_s0 + $0x3] sm:$0x1]  ;;  %3480 = vmatpush3.bf16.msra.mxu1 %v4148_v5  ;;  %v69_v15 = vsel %vm68_vm2, %v67_v9, %v63_v6  ;;  %v85_v16 = vrot.slane %v82_v13, 7  ;;  %v90_v17 = vld [vmem:[%s4907_s0 + $0xb] sm:$0x1] }
  0x2f   :  { %3468 = vmatpush3.bf16.msra.mxu0 %v3797_v4  ;;  %72 = vst.msk [vmem:[#allocation3] sm:$0x3] %vm71_vm3, %v69_v15  ;;  %v78_v18 = vsel %vm68_vm2, %v77_v12, %v73_v8  ;;  %v93_v19 = vrot.slane %v90_v17, 7  ;;  %3485 = vmatprep.subr.bf16.mxu1 %v4055_v1  ;;  %v4202_v33 = vld [vmem:[%s4910_s3] ss:$0 sm:$0xff] }
  0x30   :  { %3493 = vmatprep.subr.bf16.mxu0 %v4055_v1  ;;  %80 = vst.msk [vmem:[#allocation3 + $0x8] sm:$0x3] %vm71_vm3, %v78_v18  ;;  %v86_v20 = vsel %vm68_vm2, %v85_v16, %v81_v11  ;;  %v97_v12 = vld [vmem:[%s4907_s0 + $0x4] sm:$0x1]  ;;  %v98_v13 = vld [vmem:[%s4907_s0 + $0xc] sm:$0x1] }
  0x31   :  { %88 = vst.msk [vmem:[#allocation3 + $0x10] sm:$0x3] %vm71_vm3, %v86_v20  ;;  %v94_v21 = vsel %vm68_vm2, %v93_v19, %v89_v14  ;;  %3482 = vmatmul.mubr.bf16.vlgmr.msra.gmra.mrb[0].mxu1 %v4057_v22  ;;  %v101_v14 = vrot.slane %v98_v13, 7  ;;  %v105_v15 = vld [vmem:[%s4907_s0 + $0x5] sm:$0x1] }
  0x32   :  { %96 = vst.msk [vmem:[#allocation3 + $0x18] sm:$0x3] %vm71_vm3, %v94_v21  ;;  %3486 = vmatpush3.bf16.msra.mxu1 %v4145_v3  ;;  %3489 = vmatprep.mubr.msk.bf16.mxu1 %vm4056_vm1, %v4055_v1  ;;  %v106_v16 = vld [vmem:[%s4907_s0 + $0xd] sm:$0x1]  ;;  %v113_v18 = vld [vmem:[%s4907_s0 + $0x6] sm:$0x1] }
  0x33   :  { %3487 = vmatprep.subr.bf16.mxu1 %v4055_v1  ;;  %v109_v17 = vrot.slane %v106_v16, 7  ;;  %v114_v19 = vld [vmem:[%s4907_s0 + $0xe] sm:$0x1]  ;;  %v102_v20 = vsel %vm68_vm2, %v101_v14, %v97_v12 }
  0x34   :  { %v117_v21 = vrot.slane %v114_v19, 7  ;;  %104 = vst.msk [vmem:[#allocation3 + $0x20] sm:$0x3] %vm71_vm3, %v102_v20 }
  0x36   :  { %v138_v23 = vld [vmem:[#allocation3] sm:$0xff]  ;;  %3488 = vmatpush3.bf16.msra.mxu1 %v4148_v5 }
  0x37   :  { %v139_v24 = vld [vmem:[#allocation3 + $0x8] sm:$0xff]  ;;  %3501 = vmatprep.subr.bf16.mxu1 %v4055_v1 }
  0x38   :  { %v146_v25 = vpack.c.bf16 %v139_v24, %v138_v23  ;;  %v140_v26 = vld [vmem:[#allocation3 + $0x10] sm:$0xff]  ;;  %v121_v23 = vld [vmem:[%s4907_s0 + $0x7] sm:$0x1]  ;;  %v122_v24 = vld [vmem:[%s4907_s0 + $0xf] sm:$0x1] }
  0x39   :  { %v141_v27 = vld [vmem:[#allocation3 + $0x18] sm:$0xff] }
  0x3a   :  { %3469 = vmatprep.mubr.msk.bf16.mxu0 %vm54_vm0, %v146_v25  ;;  %v147_v28 = vpack.c.bf16 %v141_v27, %v140_v26  ;;  %v110_v25 = vsel %vm68_vm2, %v109_v17, %v105_v15  ;;  %v125_v26 = vrot.slane %v122_v24, 7  ;;  %v118_v27 = vsel %vm68_vm2, %v117_v21, %v113_v18 }
  0x3b   :  { %112 = vst.msk [vmem:[#allocation3 + $0x28] sm:$0x3] %vm71_vm3, %v110_v25  ;;  %120 = vst.msk [vmem:[#allocation3 + $0x30] sm:$0x3] %vm71_vm3, %v118_v27 }
  0x3c   :  { %3470 = vmatmul.mubr.msk.bf16.vlgmr.msra.gmra.mrb[0].mxu0 %vm54_vm0, %v147_v28  ;;  %v126_v28 = vsel %vm68_vm2, %v125_v26, %v121_v23 }
  0x3d   :  { %3494 = vmatpush3.bf16.msra.mxu0 %v4145_v3  ;;  %128 = vst.msk [vmem:[#allocation3 + $0x38] sm:$0x3] %vm71_vm3, %v126_v28 }
  0x3e   :  { %3495 = vmatprep.subr.bf16.mxu0 %v4055_v1 }
  0x41   :  { %3496 = vmatpush3.bf16.msra.mxu0 %v4148_v5 }
  0x42   :  { %3509 = vmatprep.subr.bf16.mxu0 %v4055_v1 }
 0x104   :  { %v303_v29 = vpop.f32.mrb[0].mxu1 }
 0x105   :  { %v3483_v30 = vpop.f32.mrb[1].mxu1 }
 0x106   :  { %v306_v31 = vpop.f32.mrb[2].mxu1  ;;  %v142_v30 = vld [vmem:[#allocation3 + $0x20] sm:$0xff] }
 0x107   :  { %v3484_v32 = vpop.f32.mrb[3].mxu1  ;;  %v143_v31 = vld [vmem:[#allocation3 + $0x28] sm:$0xff] }
 0x108   :  { %v148_v32 = vpack.c.bf16 %v143_v31, %v142_v30 }
 0x10a   :  { %3473 = vmatprep.mubr.msk.bf16.mxu0 %vm54_vm0, %v148_v32 }
 0x10f   :  { %v4204_v34 = vpop.f32.mrb[0].mxu0 }
 0x110   :  { %v214_v35 = vpop.f32.mrb[1].mxu0 }
 0x111   :  { %v215_v36 = vadd.f32 %v4202_v33, %v214_v35  ;;  %v4207_v37 = vpop.f32.mrb[2].mxu0  ;;  %v144_v35 = vld [vmem:[#allocation3 + $0x30] sm:$0xff] }
 0x112   :  { %v217_v38 = vpop.f32.mrb[3].mxu0 }
 0x113   :  { %v304_v39 = vadd.f32 %v303_v29, %v215_v36  ;;  %v218_v56 = vadd.f32 %v4202_v33, %v217_v38  ;;  %v145_v36 = vld [vmem:[#allocation3 + $0x38] sm:$0xff] }
 0x114   :  { %v149_v38 = vpack.c.bf16 %v145_v36, %v144_v35 }
 0x115   :  { %v3216_v40 = vmul.f32 -1.442695, %v304_v39 }
 0x116   :  { %3474 = vmatmul.mubr.msk.bf16.gmra.mrb[4].mxu0 %vm54_vm0, %v149_v38 }
 0x117   :  { %3811 = vpow2.f32 %v3216_v40  ;;  %3497 = vmatprep.mubr.msk.bf16.mxu0 %vm4056_vm1, %v4055_v1 }
 0x121   :  { %v3812_v41 = vpop.eup %3811 }
 0x122   :  { %v312_v42 = vadd.f32 1.0, %v3812_v41 }
 0x124   :  { %3813 = vrcp.f32 %v312_v42 }
 0x12e   :  { %v3814_v43 = vpop.eup %3813 }
 0x12f   :  { %v315_v44 = vmul.f32 2.0, %v3814_v43  ;;  %v317_v48 = vmul.f32 0.0, %v3814_v43 }
 0x131   :  { %v3217_v45 = vadd.f32 -1.0, %v315_v44 }
 0x133   :  { %319 = vrot.lane.b32.xlu0 %v3217_v45, %s4052_s8 }
 0x1a5   :  { %v320_v46 = vpop.permute.xlu0 %319 }
 0x1a6   :  { %v322_v47 = vmul.f32 %v3814_v43, %v320_v46 }
 0x1a8   :  { %324 = vrot.lane.b32.xlu0 %v322_v47, %s4058_s16  ;;  %v223_v47 = vadd.f32 %v4204_v34, %v4202_v33 }
 0x1e9   :  { %v4272_v42 = vpop.f32.mrb[4].mxu0 }
 0x21a   :  { %v325_v49 = vpop.permute.xlu0 %324 }
 0x21b   :  { %v327_v50 = vadd.f32 %v325_v49, %v317_v48 }
 0x21d   :  { %3815 = vtanh.f32 %v327_v50 }
 0x227   :  { %v3816_v51 = vpop.eup %3815 }
 0x228   :  { %330 = vrot.lane.b32.xlu1 %v3816_v51, %s4052_s8 }
 0x29a   :  { %v331_v52 = vpop.permute.xlu1 %330 }
 0x29b   :  { %v4212_v53 = vmul.f32 %v3814_v43, %v331_v52  ;;  %v4274_v43 = vpop.f32.mrb[5].mxu0 }
 0x29c   :  { %v4276_v44 = vpop.f32.mrb[6].mxu0  ;;  %v231_v30 = vadd.f32 %v4202_v33, %v4274_v43 }
 0x29d   :  { %v339_v54 = vpack.c.bf16 %v4212_v53, %v4212_v53  ;;  %v4278_v45 = vpop.f32.mrb[7].mxu0 }
 0x29f   :  { %342 = vrot.lane.b32.xlu1 %v339_v54, %s4058_s16 }
 0x311   :  { %v343_v55 = vpop.permute.xlu1 %342 }
 0x312   :  { %3490 = vmatmul.mubr.msk.bf16.vlgmr.msra.gmra.mrb[4].mxu1 %vm54_vm0, %v343_v55 }
 0x313   :  { %3502 = vmatpush3.bf16.msra.mxu1 %v4145_v3  ;;  %3505 = vmatprep.mubr.msk.bf16.mxu1 %vm4056_vm1, %v4055_v1 }
 0x314   :  { %3503 = vmatprep.subr.bf16.mxu1 %v4055_v1 }
 0x317   :  { %3504 = vmatpush3.bf16.msra.mxu1 %v4148_v5 }
 0x318   :  { %3517 = vmatprep.subr.bf16.mxu1 %v4055_v1 }
 0x3e5   :  { %v381_v57 = vpop.f32.mrb[4].mxu1 }
 0x3e6   :  { %v382_v58 = vadd.f32 %v381_v57, %v218_v56  ;;  %v3491_v59 = vpop.f32.mrb[5].mxu1 }
 0x3e7   :  { %v384_v60 = vpop.f32.mrb[6].mxu1 }
 0x3e8   :  { %v3219_v61 = vmul.f32 -1.442695, %v382_v58  ;;  %v3492_v62 = vpop.f32.mrb[7].mxu1 }
 0x3ea   :  { %3817 = vpow2.f32 %v3219_v61 }
 0x3f4   :  { %v3818_v63 = vpop.eup %3817 }
 0x3f5   :  { %v390_v0 = vadd.f32 1.0, %v3818_v63 }
 0x3f7   :  { %3819 = vrcp.f32 %v390_v0 }
 0x401   :  { %v3820_v2 = vpop.eup %3819 }
 0x402   :  { %v393_v4 = vmul.f32 2.0, %v3820_v2  ;;  %v395_v9 = vmul.f32 %v3820_v2, %v327_v50 }
 0x404   :  { %v3220_v6 = vadd.f32 -1.0, %v393_v4 }
 0x406   :  { %397 = vrot.lane.b32.xlu0 %v3220_v6, %s4052_s8 }
 0x478   :  { %v398_v7 = vpop.permute.xlu0 %397 }
 0x479   :  { %v400_v8 = vmul.f32 %v3820_v2, %v398_v7 }
 0x47b   :  { %402 = vrot.lane.b32.xlu1 %v400_v8, %s4058_s16  ;;  %v226_v8 = vadd.f32 %v4207_v37, %v4202_v33 }
 0x4ed   :  { %v403_v10 = vpop.permute.xlu1 %402 }
 0x4ee   :  { %v4227_v11 = vadd.f32 %v403_v10, %v395_v9 }
 0x4f0   :  { %3821 = vtanh.f32 %v4227_v11 }
 0x4fa   :  { %v3822_v29 = vpop.eup %3821 }
 0x4fb   :  { %408 = vrot.lane.b32.xlu0 %v3822_v29, %s4052_s8 }
 0x56d   :  { %v409_v39 = vpop.permute.xlu0 %408 }
 0x56e   :  { %v4267_v40 = vmul.f32 %v3820_v2, %v409_v39 }
 0x570   :  { %v417_v41 = vpack.c.bf16 %v4267_v40, %v4267_v40 }
 0x572   :  { %420 = vrot.lane.b32.xlu1 %v417_v41, %s4058_s16 }
 0x5e4   :  { %v421_v46 = vpop.permute.xlu1 %420 }
 0x5e5   :  { %3498 = vmatmul.mubr.msk.bf16.vlgmr.msra.gmra.mrb[8].mxu0 %vm54_vm0, %v421_v46 }
 0x5e6   :  { %3510 = vmatpush3.bf16.msra.mxu0 %v4145_v3  ;;  %3513 = vmatprep.mubr.msk.bf16.mxu0 %vm4056_vm1, %v4055_v1 }
 0x5e7   :  { %3511 = vmatprep.subr.bf16.mxu0 %v4055_v1 }
 0x5ea   :  { %3512 = vmatpush3.bf16.msra.mxu0 %v4148_v5 }
 0x5eb   :  { %3525 = vmatprep.subr.bf16.mxu0 %v4055_v1 }
 0x6b8   :  { %v459_v48 = vpop.f32.mrb[8].mxu0 }
 0x6b9   :  { %v460_v49 = vadd.f32 %v459_v48, %v223_v47  ;;  %v3499_v50 = vpop.f32.mrb[9].mxu0 }
 0x6ba   :  { %v462_v51 = vpop.f32.mrb[10].mxu0 }
 0x6bb   :  { %v3222_v52 = vmul.f32 -1.442695, %v460_v49  ;;  %v3500_v54 = vpop.f32.mrb[11].mxu0 }
 0x6bd   :  { %3823 = vpow2.f32 %v3222_v52 }
 0x6c7   :  { %v3824_v55 = vpop.eup %3823 }
 0x6c8   :  { %v468_v56 = vadd.f32 1.0, %v3824_v55 }
 0x6ca   :  { %3825 = vrcp.f32 %v468_v56 }
 0x6d4   :  { %v3826_v57 = vpop.eup %3825 }
 0x6d5   :  { %v471_v58 = vmul.f32 2.0, %v3826_v57  ;;  %v473_v34 = vmul.f32 %v3826_v57, %v4227_v11 }
 0x6d7   :  { %v3223_v59 = vadd.f32 -1.0, %v471_v58 }
 0x6d9   :  { %475 = vrot.lane.b32.xlu0 %v3223_v59, %s4052_s8 }
 0x74b   :  { %v476_v60 = vpop.permute.xlu0 %475 }
 0x74c   :  { %v478_v61 = vmul.f32 %v3826_v57, %v476_v60  ;;  %v234_v60 = vadd.f32 %v4202_v33, %v4278_v45 }
 0x74e   :  { %480 = vrot.lane.b32.xlu1 %v478_v61, %s4058_s16 }
 0x7c0   :  { %v481_v62 = vpop.permute.xlu1 %480 }
 0x7c1   :  { %v483_v63 = vadd.f32 %v481_v62, %v473_v34 }
 0x7c3   :  { %3827 = vtanh.f32 %v483_v63 }
 0x7cd   :  { %v3828_v0 = vpop.eup %3827 }
 0x7ce   :  { %486 = vrot.lane.b32.xlu0 %v3828_v0, %s4052_s8 }
 0x840   :  { %v487_v2 = vpop.permute.xlu0 %486 }
 0x841   :  { %v4293_v4 = vmul.f32 %v3826_v57, %v487_v2 }
 0x843   :  { %v495_v6 = vpack.c.bf16 %v4293_v4, %v4293_v4 }
 0x845   :  { %498 = vrot.lane.b32.xlu1 %v495_v6, %s4058_s16 }
 0x8b7   :  { %v499_v7 = vpop.permute.xlu1 %498 }
 0x8b8   :  { %3506 = vmatmul.mubr.msk.bf16.vlgmr.msra.gmra.mrb[8].mxu1 %vm54_vm0, %v499_v7 }
 0x8b9   :  { %3518 = vmatpush3.bf16.msra.mxu1 %v4145_v3  ;;  %3521 = vmatprep.mubr.msk.bf16.mxu1 %vm4056_vm1, %v4055_v1 }
 0x8ba   :  { %3519 = vmatprep.subr.bf16.mxu1 %v4055_v1 }
 0x8bd   :  { %3520 = vmatpush3.bf16.msra.mxu1 %v4148_v5 }
 0x8be   :  { %3533 = vmatprep.subr.bf16.mxu1 %v4055_v1 }
 0x98b   :  { %v537_v9 = vpop.f32.mrb[8].mxu1 }
 0x98c   :  { %v538_v10 = vadd.f32 %v537_v9, %v226_v8  ;;  %v3507_v11 = vpop.f32.mrb[9].mxu1 }
 0x98d   :  { %v540_v12 = vpop.f32.mrb[10].mxu1 }
 0x98e   :  { %v3225_v13 = vmul.f32 -1.442695, %v538_v10  ;;  %v3508_v14 = vpop.f32.mrb[11].mxu1 }
 0x990   :  { %3829 = vpow2.f32 %v3225_v13 }
 0x99a   :  { %v3830_v15 = vpop.eup %3829 }
 0x99b   :  { %v546_v16 = vadd.f32 1.0, %v3830_v15 }
 0x99d   :  { %3831 = vrcp.f32 %v546_v16 }
 0x9a7   :  { %v3832_v17 = vpop.eup %3831 }
 0x9a8   :  { %v549_v18 = vmul.f32 2.0, %v3832_v17  ;;  %v551_v37 = vmul.f32 %v3832_v17, %v483_v63 }
 0x9aa   :  { %v3226_v19 = vadd.f32 -1.0, %v549_v18  ;;  %v239_v18 = vadd.f32 %v4272_v42, %v4202_v33 }
 0x9ac   :  { %553 = vrot.lane.b32.xlu0 %v3226_v19, %s4052_s8 }
 0xa1e   :  { %v554_v20 = vpop.permute.xlu0 %553 }
 0xa1f   :  { %v556_v21 = vmul.f32 %v3832_v17, %v554_v20 }
 0xa21   :  { %558 = vrot.lane.b32.xlu1 %v556_v21, %s4058_s16 }
 0xa93   :  { %v559_v23 = vpop.permute.xlu1 %558 }
 0xa94   :  { %v561_v24 = vadd.f32 %v559_v23, %v551_v37 }
 0xa96   :  { %3833 = vtanh.f32 %v561_v24 }
 0xaa0   :  { %v3834_v25 = vpop.eup %3833 }
 0xaa1   :  { %564 = vrot.lane.b32.xlu0 %v3834_v25, %s4052_s8 }
 0xb13   :  { %v565_v26 = vpop.permute.xlu0 %564 }
 0xb14   :  { %v4310_v27 = vmul.f32 %v3832_v17, %v565_v26 }
 0xb16   :  { %v573_v28 = vpack.c.bf16 %v4310_v27, %v4310_v27 }
 0xb18   :  { %576 = vrot.lane.b32.xlu1 %v573_v28, %s4058_s16 }
 0xb8a   :  { %v577_v29 = vpop.permute.xlu1 %576 }
 0xb8b   :  { %3514 = vmatmul.mubr.msk.bf16.vlgmr.msra.gmra.mrb[12].mxu0 %vm54_vm0, %v577_v29 }
 0xb8c   :  { %3526 = vmatpush3.bf16.msra.mxu0 %v4145_v3  ;;  %3529 = vmatprep.mubr.msk.bf16.mxu0 %vm4056_vm1, %v4055_v1 }
 0xb8d   :  { %3527 = vmatprep.subr.bf16.mxu0 %v4055_v1 }
 0xb90   :  { %3528 = vmatpush3.bf16.msra.mxu0 %v4148_v5 }
 0xc5e   :  { %v615_v31 = vpop.f32.mrb[12].mxu0 }
 0xc5f   :  { %v616_v32 = vadd.f32 %v615_v31, %v231_v30  ;;  %v3515_v35 = vpop.f32.mrb[13].mxu0 }
 0xc60   :  { %v618_v36 = vpop.f32.mrb[14].mxu0 }
 0xc61   :  { %v3228_v38 = vmul.f32 -1.442695, %v616_v32  ;;  %v3516_v39 = vpop.f32.mrb[15].mxu0 }
 0xc63   :  { %3835 = vpow2.f32 %v3228_v38 }
 0xc6d   :  { %v3836_v41 = vpop.eup %3835 }
 0xc6e   :  { %v624_v46 = vadd.f32 1.0, %v3836_v41  ;;  %v3799_v41 = vld [vmem:[#allocation5 + $0x10] sm:$0xff]  }
 0xc6f   :  { %3541 = vmatprep.subr.bf16.mxu0 %v3799_v41 }
 0xc70   :  { %3837 = vrcp.f32 %v624_v46  ;;  %v3800_v46 = vld [vmem:[#allocation5 + $0x18] sm:$0xff]  }
 0xc7a   :  { %v3838_v47 = vpop.eup %3837 }
 0xc7b   :  { %v627_v48 = vmul.f32 2.0, %v3838_v47  ;;  %v629_v43 = vmul.f32 %v3838_v47, %v561_v24 }
 0xc7d   :  { %v3229_v49 = vadd.f32 -1.0, %v627_v48 }
 0xc7f   :  { %631 = vrot.lane.b32.xlu0 %v3229_v49, %s4052_s8 }
 0xcf1   :  { %v632_v50 = vpop.permute.xlu0 %631 }
 0xcf2   :  { %v634_v51 = vmul.f32 %v3838_v47, %v632_v50 }
 0xcf4   :  { %636 = vrot.lane.b32.xlu1 %v634_v51, %s4058_s16 }
 0xd66   :  { %v637_v52 = vpop.permute.xlu1 %636 }
 0xd67   :  { %v639_v54 = vadd.f32 %v637_v52, %v629_v43 }
 0xd69   :  { %3839 = vtanh.f32 %v639_v54 }
 0xd73   :  { %v3840_v55 = vpop.eup %3839 }
 0xd74   :  { %642 = vrot.lane.b32.xlu0 %v3840_v55, %s4052_s8  ;;  %v4376_v55 = vld [vmem:[#allocation7 + $0x10] sm:$0xff]  }
 0xde6   :  { %v643_v56 = vpop.permute.xlu0 %642 }
 0xde7   :  { %v4326_v57 = vmul.f32 %v3838_v47, %v643_v56  ;;  %v4381_v56 = vld [vmem:[#allocation7 + $0x18] sm:$0xff]  }
 0xde9   :  { %v651_v58 = vpack.c.bf16 %v4326_v57, %v4326_v57 }
 0xdeb   :  { %654 = vrot.lane.b32.xlu1 %v651_v58, %s4058_s16 }
 0xe5d   :  { %v655_v59 = vpop.permute.xlu1 %654 }
 0xe5e   :  { %3522 = vmatmul.mubr.msk.bf16.vlgmr.msra.gmra.mrb[12].mxu1 %vm54_vm0, %v655_v59 }
 0xe5f   :  { %3534 = vmatpush3.bf16.msra.mxu1 %v4145_v3  ;;  %3537 = vmatprep.mubr.msk.bf16.mxu1 %vm4056_vm1, %v4055_v1 }
 0xe60   :  { %3535 = vmatprep.subr.bf16.mxu1 %v4055_v1 }
 0xe63   :  { %3536 = vmatpush3.bf16.msra.mxu1 %v4148_v5 }
 0xe64   :  { %3553 = vmatprep.subr.bf16.mxu1 %v4055_v1 }
 0xf31   :  { %v693_v61 = vpop.f32.mrb[12].mxu1 }
 0xf32   :  { %v694_v34 = vadd.f32 %v693_v61, %v234_v60  ;;  %v3523_v62 = vpop.f32.mrb[13].mxu1 }
 0xf33   :  { %v696_v63 = vpop.f32.mrb[14].mxu1  ;;  %v242_v62 = vadd.f32 %v4276_v44, %v4202_v33 }
 0xf34   :  { %v3231_v0 = vmul.f32 -1.442695, %v694_v34  ;;  %v3524_v2 = vpop.f32.mrb[15].mxu1 }
 0xf36   :  { %3841 = vpow2.f32 %v3231_v0 }
 0xf40   :  { %v3842_v3 = vpop.eup %3841 }
 0xf41   :  { %v702_v6 = vadd.f32 1.0, %v3842_v3 }
 0xf43   :  { %3843 = vrcp.f32 %v702_v6 }
 0xf4d   :  { %v3844_v7 = vpop.eup %3843 }
 0xf4e   :  { %v705_v8 = vmul.f32 2.0, %v3844_v7  ;;  %v707_v45 = vmul.f32 %v3844_v7, %v639_v54 }
 0xf50   :  { %v3232_v9 = vadd.f32 -1.0, %v705_v8 }
 0xf52   :  { %709 = vrot.lane.b32.xlu0 %v3232_v9, %s4052_s8 }
 0xfc4   :  { %v710_v5 = vpop.permute.xlu0 %709 }
 0xfc5   :  { %v712_v10 = vmul.f32 %v3844_v7, %v710_v5 }
 0xfc7   :  { %714 = vrot.lane.b32.xlu1 %v712_v10, %s4058_s16 }
0x1039   :  { %v715_v11 = vpop.permute.xlu1 %714 }
0x103a   :  { %v717_v12 = vadd.f32 %v715_v11, %v707_v45 }
0x103c   :  { %3845 = vtanh.f32 %v717_v12 }
0x1046   :  { %v3846_v13 = vpop.eup %3845 }
0x1047   :  { %720 = vrot.lane.b32.xlu0 %v3846_v13, %s4052_s8 }
0x10b9   :  { %v721_v14 = vpop.permute.xlu0 %720 }
0x10ba   :  { %v4343_v15 = vmul.f32 %v3844_v7, %v721_v14  ;;  %v4410_v7 = vld [vmem:[%s4910_s3 + $0x1] ss:$0 sm:$0xff] }
0x10bc   :  { %v729_v16 = vpack.c.bf16 %v4343_v15, %v4343_v15 }
0x10be   :  { %732 = vrot.lane.b32.xlu1 %v729_v16, %s4058_s16 }
0x1130   :  { %v733_v17 = vpop.permute.xlu1 %732 }
0x1131   :  { %3530 = vmatmul.mubr.msk.bf16.vlgmr.msra.gmra.mrb[16].mxu0 %vm54_vm0, %v733_v17 }
0x1132   :  { %3542 = vmatpush3.bf16.msra.mxu0 %v3799_v41 }
0x1133   :  { %3543 = vmatprep.subr.bf16.mxu0 %v3800_v46 }
0x1136   :  { %3544 = vmatpush3.bf16.msra.mxu0 %v3800_v46 }
0x1137   :  { %3569 = vmatprep.subr.bf16.mxu0 %v4055_v1 }
0x1204   :  { %v771_v19 = vpop.f32.mrb[16].mxu0 }
0x1205   :  { %v772_v20 = vadd.f32 %v771_v19, %v239_v18  ;;  %v3531_v21 = vpop.f32.mrb[17].mxu0 }
0x1206   :  { %v774_v37 = vpop.f32.mrb[18].mxu0 }
0x1207   :  { %v3234_v23 = vmul.f32 -1.442695, %v772_v20  ;;  %v3532_v24 = vpop.f32.mrb[19].mxu0 }
0x1209   :  { %3847 = vpow2.f32 %v3234_v23 }
0x1213   :  { %v3848_v25 = vpop.eup %3847 }
0x1214   :  { %v780_v26 = vadd.f32 1.0, %v3848_v25 }
0x1216   :  { %3849 = vrcp.f32 %v780_v26 }
0x1220   :  { %v3850_v28 = vpop.eup %3849 }
0x1221   :  { %v783_v29 = vmul.f32 2.0, %v3850_v28  ;;  %v785_v42 = vmul.f32 %v3850_v28, %v717_v12 }
0x1223   :  { %v3235_v30 = vadd.f32 -1.0, %v783_v29 }
0x1225   :  { %787 = vrot.lane.b32.xlu0 %v3235_v30, %s4052_s8 }
0x1297   :  { %v788_v31 = vpop.permute.xlu0 %787 }
0x1298   :  { %v790_v32 = vmul.f32 %v3850_v28, %v788_v31 }
0x129a   :  { %792 = vrot.lane.b32.xlu1 %v790_v32, %s4058_s16 }
0x129e   :  { %335 = vrot.lane.b32.xlu1 %v4212_v53, %s4058_s16 }
0x12a2   :  { %491 = vrot.lane.b32.xlu1 %v4293_v4, %s4058_s16 }
0x130c   :  { %v793_v35 = vpop.permute.xlu1 %792 }
0x130d   :  { %v4357_v36 = vadd.f32 %v793_v35, %v785_v42 }
0x130f   :  { %3851 = vtanh.f32 %v4357_v36 }
0x1310   :  { %v336_v38 = vpop.permute.xlu1 %335 }
0x1311   :  { %338 = vst.msk [vmem:[#allocation3] sm:$0xff] %vm54_vm0, %v336_v38 }
0x1314   :  { %v492_v39 = vpop.permute.xlu1 %491 }
0x1315   :  { %494 = vst.msk [vmem:[#allocation3 + $0x10] sm:$0xff] %vm54_vm0, %v492_v39 }
0x1318   :  { %v897_v51 = vld [vmem:[#allocation3] sm:$0xff] }
0x1319   :  { %v3852_v53 = vpop.eup %3851 }
0x131a   :  { %798 = vrot.lane.b32.xlu0 %v3852_v53, %s4052_s8 }
0x131e   :  { %413 = vrot.lane.b32.xlu0 %v4267_v40, %s4058_s16 }
0x1322   :  { %569 = vrot.lane.b32.xlu0 %v4310_v27, %s4058_s16  ;;  %v899_v27 = vld [vmem:[#allocation3 + $0x10] sm:$0xff] }
0x138c   :  { %v799_v4 = vpop.permute.xlu0 %798 }
0x138d   :  { %v4368_v47 = vmul.f32 %v3850_v28, %v799_v4 }
0x138f   :  { %v807_v48 = vpack.c.bf16 %v4368_v47, %v4368_v47 }
0x1390   :  { %v414_v49 = vpop.permute.xlu0 %413 }
0x1391   :  { %416 = vst.msk [vmem:[#allocation3 + $0x8] sm:$0xff] %vm54_vm0, %v414_v49  ;;  %810 = vrot.lane.b32.xlu1 %v807_v48, %s4058_s16 }
0x1394   :  { %v570_v50 = vpop.permute.xlu0 %569 }
0x1395   :  { %572 = vst.msk [vmem:[#allocation3 + $0x18] sm:$0xff] %vm54_vm0, %v570_v50 }
0x1398   :  { %v898_v43 = vld [vmem:[#allocation3 + $0x8] sm:$0xff] }
0x1399   :  { %v905_v40 = vpack.c.bf16 %v898_v43, %v897_v51 }
0x139b   :  { %3545 = vmatprep.mubr.msk.bf16.mxu0 %vm54_vm0, %v905_v40 }
0x139c   :  { %v900_v52 = vld [vmem:[#allocation3 + $0x18] sm:$0xff] }
0x139d   :  { %v906_v54 = vpack.c.bf16 %v900_v52, %v899_v27 }
0x139f   :  { %3546 = vmatmul.mubr.msk.bf16.vlgmr.msra.gmra.mrb[20].mxu0 %vm54_vm0, %v906_v54 }
0x13a0   :  { %3570 = vmatpush3.bf16.msra.mxu0 %v4376_v55 }
0x13a1   :  { %3571 = vmatprep.subr.bf16.mxu0 %v4055_v1 }
0x13a4   :  { %3572 = vmatpush3.bf16.msra.mxu0 %v4381_v56 }
0x13a5   :  { %3585 = vmatprep.subr.bf16.mxu0 %v4055_v1 }
0x1403   :  { %v811_v58 = vpop.permute.xlu1 %810 }
0x1404   :  { %3538 = vmatmul.mubr.msk.bf16.vlgmr.msra.gmra.mrb[16].mxu1 %vm54_vm0, %v811_v58 }
0x1405   :  { %3554 = vmatpush3.bf16.msra.mxu1 %v4376_v55  ;;  %3557 = vmatprep.mubr.msk.bf16.mxu1 %vm4056_vm1, %v4055_v1 }
0x1406   :  { %3555 = vmatprep.subr.bf16.mxu1 %v4055_v1 }
0x1409   :  { %3556 = vmatpush3.bf16.msra.mxu1 %v4381_v56 }
0x140a   :  { %3561 = vmatprep.subr.bf16.mxu1 %v4055_v1 }
0x140c   :  { %3558 = vmatmul.mubr.bf16.vlgmr.msra.gmra.mrb[20].mxu1 %v4057_v22 }
0x140d   :  { %3562 = vmatpush3.bf16.msra.mxu1 %v4376_v55  ;;  %3565 = vmatprep.mubr.msk.bf16.mxu1 %vm4056_vm1, %v4055_v1 }
0x140e   :  { %3563 = vmatprep.subr.bf16.mxu1 %v4055_v1 }
0x1411   :  { %3564 = vmatpush3.bf16.msra.mxu1 %v4381_v56 }
0x1412   :  { %3577 = vmatprep.subr.bf16.mxu1 %v4055_v1 }
0x1472   :  { %v4399_v59 = vpop.f32.mrb[20].mxu0 }
0x1473   :  { %v973_v60 = vpop.f32.mrb[21].mxu0 }
0x1474   :  { %v4401_v61 = vpop.f32.mrb[22].mxu0  ;;  %v974_v8 = vadd.f32 %v4410_v7, %v973_v60 }
0x1475   :  { %v4403_v34 = vpop.f32.mrb[23].mxu0 }
0x1476   :  { %v977_v49 = vadd.f32 %v4410_v7, %v4403_v34 }
0x14d7   :  { %v849_v63 = vpop.f32.mrb[16].mxu1 }
0x14d8   :  { %v850_v0 = vadd.f32 %v849_v63, %v242_v62  ;;  %v3539_v2 = vpop.f32.mrb[17].mxu1 }
0x14d9   :  { %v852_v3 = vpop.f32.mrb[18].mxu1 }
0x14da   :  { %v3540_v6 = vpop.f32.mrb[19].mxu1  ;;  %v3237_v19 = vmul.f32 -1.442695, %v850_v0 }
0x14df   :  { %v1059_v9 = vpop.f32.mrb[20].mxu1 }
0x14e0   :  { %v1060_v5 = vadd.f32 %v1059_v9, %v974_v8  ;;  %v3559_v10 = vpop.f32.mrb[21].mxu1 }
0x14e1   :  { %v1062_v45 = vpop.f32.mrb[22].mxu1 }
0x14e2   :  { %v3249_v11 = vmul.f32 -1.442695, %v1060_v5  ;;  %v3560_v12 = vpop.f32.mrb[23].mxu1 }
0x14e4   :  { %3853 = vpow2.f32 %v3249_v11 }
0x14ee   :  { %v3854_v33 = vpop.eup %3853 }
0x14ef   :  { %v1068_v44 = vadd.f32 1.0, %v3854_v33 }
0x14f1   :  { %3855 = vrcp.f32 %v1068_v44 }
0x14f2   :  { %3857 = vpow2.f32 %v3237_v19 }
0x14fb   :  { %v3856_v13 = vpop.eup %3855 }
0x14fc   :  { %v1071_v14 = vmul.f32 2.0, %v3856_v13  ;;  %v3858_v20 = vpop.eup %3857  ;;  %v1073_v37 = vmul.f32 0.0, %v3856_v13 }
0x14fd   :  { %v858_v21 = vadd.f32 1.0, %v3858_v20  ;;  %v982_v20 = vadd.f32 %v4399_v59, %v4410_v7 }
0x14fe   :  { %v3250_v16 = vadd.f32 -1.0, %v1071_v14 }
0x14ff   :  { %3859 = vrcp.f32 %v858_v21 }
0x1500   :  { %1075 = vrot.lane.b32.xlu0 %v3250_v16, %s4052_s8 }
0x1509   :  { %v3860_v25 = vpop.eup %3859 }
0x150a   :  { %v861_v26 = vmul.f32 2.0, %v3860_v25  ;;  %v863_v39 = vmul.f32 %v3860_v25, %v4357_v36 }
0x150c   :  { %v3238_v29 = vadd.f32 -1.0, %v861_v26 }
0x1572   :  { %v1076_v17 = vpop.permute.xlu0 %1075 }
0x1573   :  { %v1078_v18 = vmul.f32 %v3856_v13, %v1076_v17 }
0x1575   :  { %1080 = vrot.lane.b32.xlu1 %v1078_v18, %s4058_s16 }
0x15e7   :  { %v1081_v23 = vpop.permute.xlu1 %1080 }
0x15e8   :  { %v1083_v24 = vadd.f32 %v1081_v23, %v1073_v37 }
0x15ea   :  { %3861 = vtanh.f32 %v1083_v24 }
0x15f4   :  { %v3862_v28 = vpop.eup %3861 }
0x15f5   :  { %1086 = vrot.lane.b32.xlu0 %v3862_v28, %s4052_s8 }
0x15f9   :  { %865 = vrot.lane.b32.xlu0 %v3238_v29, %s4052_s8 }
0x1667   :  { %v1087_v30 = vpop.permute.xlu0 %1086 }
0x1668   :  { %v4417_v31 = vmul.f32 %v3856_v13, %v1087_v30 }
0x166a   :  { %v1095_v32 = vpack.c.bf16 %v4417_v31, %v4417_v31 }
0x166b   :  { %v866_v42 = vpop.permute.xlu0 %865 }
0x166c   :  { %v868_v35 = vmul.f32 %v3860_v25, %v866_v42  ;;  %1098 = vrot.lane.b32.xlu1 %v1095_v32, %s4058_s16 }
0x166e   :  { %870 = vrot.lane.b32.xlu0 %v868_v35, %s4058_s16 }
0x16de   :  { %v1099_v38 = vpop.permute.xlu1 %1098 }
0x16df   :  { %3566 = vmatmul.mubr.msk.bf16.vlgmr.msra.gmra.mrb[24].mxu1 %vm54_vm0, %v1099_v38 }
0x16e0   :  { %v871_v41 = vpop.permute.xlu0 %870  ;;  %3578 = vmatpush3.bf16.msra.mxu1 %v4376_v55  ;;  %3581 = vmatprep.mubr.msk.bf16.mxu1 %vm4056_vm1, %v4055_v1 }
0x16e1   :  { %v873_v46 = vadd.f32 %v871_v41, %v863_v39  ;;  %3579 = vmatprep.subr.bf16.mxu1 %v4055_v1 }
0x16e3   :  { %3863 = vtanh.f32 %v873_v46 }
0x16e4   :  { %3580 = vmatpush3.bf16.msra.mxu1 %v4381_v56 }
0x16e5   :  { %3593 = vmatprep.subr.bf16.mxu1 %v4055_v1 }
0x16ed   :  { %v3864_v53 = vpop.eup %3863 }
0x16ee   :  { %876 = vrot.lane.b32.xlu0 %v3864_v53, %s4052_s8 }
0x16f2   :  { %647 = vrot.lane.b32.xlu0 %v4326_v57, %s4058_s16 }
0x16f6   :  { %803 = vrot.lane.b32.xlu0 %v4368_v47, %s4058_s16 }
0x1760   :  { %v877_v36 = vpop.permute.xlu0 %876 }
0x1761   :  { %v879_v6 = vmul.f32 %v3860_v25, %v877_v36 }
0x1764   :  { %v648_v4 = vpop.permute.xlu0 %647 }
0x1765   :  { %650 = vst.msk [vmem:[#allocation3 + $0x20] sm:$0xff] %vm54_vm0, %v648_v4 }
0x1768   :  { %v804_v48 = vpop.permute.xlu0 %803 }
0x1769   :  { %806 = vst.msk [vmem:[#allocation3 + $0x30] sm:$0xff] %vm54_vm0, %v804_v48 }
0x176c   :  { %v901_v11 = vld [vmem:[#allocation3 + $0x20] sm:$0xff] }
0x1770   :  { %v903_v33 = vld [vmem:[#allocation3 + $0x30] sm:$0xff] }
0x17b2   :  { %v1137_v50 = vpop.f32.mrb[24].mxu1 }
0x17b3   :  { %v1138_v51 = vadd.f32 %v1137_v50, %v977_v49  ;;  %v3567_v43 = vpop.f32.mrb[25].mxu1  ;;  %v985_v49 = vadd.f32 %v4401_v61, %v4410_v7 }
0x17b4   :  { %v1140_v40 = vpop.f32.mrb[26].mxu1 }
0x17b5   :  { %v3252_v27 = vmul.f32 -1.442695, %v1138_v51  ;;  %v3568_v52 = vpop.f32.mrb[27].mxu1 }
0x17b7   :  { %3865 = vpow2.f32 %v3252_v27 }
0x17c1   :  { %v3866_v57 = vpop.eup %3865 }
0x17c2   :  { %v1146_v54 = vadd.f32 1.0, %v3866_v57 }
0x17c4   :  { %3867 = vrcp.f32 %v1146_v54 }
0x17ce   :  { %v3868_v47 = vpop.eup %3867 }
0x17cf   :  { %v1149_v58 = vmul.f32 2.0, %v3868_v47  ;;  %v1151_v34 = vmul.f32 %v3868_v47, %v1083_v24 }
0x17d1   :  { %v3253_v60 = vadd.f32 -1.0, %v1149_v58 }
0x17d3   :  { %1153 = vrot.lane.b32.xlu1 %v3253_v60, %s4052_s8 }
0x1845   :  { %v1154_v62 = vpop.permute.xlu1 %1153 }
0x1846   :  { %v1156_v63 = vmul.f32 %v3868_v47, %v1154_v62 }
0x1848   :  { %1158 = vrot.lane.b32.xlu1 %v1156_v63, %s4058_s16 }
0x18ba   :  { %v1159_v0 = vpop.permute.xlu1 %1158 }
0x18bb   :  { %v1161_v2 = vadd.f32 %v1159_v0, %v1151_v34 }
0x18bd   :  { %3869 = vtanh.f32 %v1161_v2 }
0x18c7   :  { %v3870_v3 = vpop.eup %3869 }
0x18c8   :  { %1164 = vrot.lane.b32.xlu1 %v3870_v3, %s4052_s8 }
0x18cc   :  { %725 = vrot.lane.b32.xlu1 %v4343_v15, %s4058_s16 }
0x18d0   :  { %881 = vrot.lane.b32.xlu1 %v879_v6, %s4058_s16 }
0x193a   :  { %v1165_v8 = vpop.permute.xlu1 %1164 }
0x193b   :  { %v4446_v9 = vmul.f32 %v3868_v47, %v1165_v8 }
0x193d   :  { %v1173_v5 = vpack.c.bf16 %v4446_v9, %v4446_v9 }
0x193e   :  { %v726_v10 = vpop.permute.xlu1 %725 }
0x193f   :  { %728 = vst.msk [vmem:[#allocation3 + $0x28] sm:$0xff] %vm54_vm0, %v726_v10  ;;  %1176 = vrot.lane.b32.xlu0 %v1173_v5, %s4058_s16 }
0x1942   :  { %v882_v45 = vpop.permute.xlu1 %881 }
0x1943   :  { %884 = vst.msk [vmem:[#allocation3 + $0x38] sm:$0xff] %vm54_vm0, %v882_v45 }
0x1946   :  { %v902_v12 = vld [vmem:[#allocation3 + $0x28] sm:$0xff] }
0x1947   :  { %v907_v15 = vpack.c.bf16 %v902_v12, %v901_v11 }
0x1949   :  { %3549 = vmatprep.mubr.msk.bf16.mxu0 %vm54_vm0, %v907_v15 }
0x194a   :  { %v904_v44 = vld [vmem:[#allocation3 + $0x38] sm:$0xff] }
0x194b   :  { %v908_v13 = vpack.c.bf16 %v904_v44, %v903_v33 }
0x194d   :  { %3550 = vmatmul.mubr.msk.bf16.gmra.mrb[24].mxu0 %vm54_vm0, %v908_v13 }
0x194e   :  { %3573 = vmatprep.mubr.msk.bf16.mxu0 %vm4056_vm1, %v4055_v1 }
0x19b1   :  { %v1177_v14 = vpop.permute.xlu0 %1176 }
0x19b2   :  { %3574 = vmatmul.mubr.msk.bf16.vlgmr.msra.gmra.mrb[28].mxu0 %vm54_vm0, %v1177_v14 }
0x19b3   :  { %3586 = vmatpush3.bf16.msra.mxu0 %v4376_v55  ;;  %3589 = vmatprep.mubr.msk.bf16.mxu0 %vm4056_vm1, %v4055_v1 }
0x19b4   :  { %3587 = vmatprep.subr.bf16.mxu0 %v4055_v1 }
0x19b7   :  { %3588 = vmatpush3.bf16.msra.mxu0 %v4381_v56 }
0x19b8   :  { %3601 = vmatprep.subr.bf16.mxu0 %v4055_v1 }
0x1a20   :  { %v4464_v16 = vpop.f32.mrb[24].mxu0 }
0x1a21   :  { %v4466_v17 = vpop.f32.mrb[25].mxu0 }
0x1a22   :  { %v4468_v18 = vpop.f32.mrb[26].mxu0  ;;  %v990_v10 = vadd.f32 %v4410_v7, %v4466_v17 }
0x1a23   :  { %v4470_v19 = vpop.f32.mrb[27].mxu0 }
0x1a85   :  { %v1215_v21 = vpop.f32.mrb[28].mxu0 }
0x1a86   :  { %v1216_v37 = vadd.f32 %v1215_v21, %v982_v20  ;;  %v3575_v23 = vpop.f32.mrb[29].mxu0 }
0x1a87   :  { %v1218_v24 = vpop.f32.mrb[30].mxu0 }
0x1a88   :  { %v3255_v25 = vmul.f32 -1.442695, %v1216_v37  ;;  %v3576_v26 = vpop.f32.mrb[31].mxu0 }
0x1a8a   :  { %3871 = vpow2.f32 %v3255_v25 }
0x1a94   :  { %v3872_v28 = vpop.eup %3871 }
0x1a95   :  { %v1224_v29 = vadd.f32 1.0, %v3872_v28 }
0x1a97   :  { %3873 = vrcp.f32 %v1224_v29 }
0x1aa1   :  { %v3874_v30 = vpop.eup %3873 }
0x1aa2   :  { %v1227_v32 = vmul.f32 2.0, %v3874_v30  ;;  %v1229_v59 = vmul.f32 %v3874_v30, %v1161_v2 }
0x1aa4   :  { %v3256_v42 = vadd.f32 -1.0, %v1227_v32 }
0x1aa6   :  { %1231 = vrot.lane.b32.xlu1 %v3256_v42, %s4052_s8 }
0x1b18   :  { %v1232_v35 = vpop.permute.xlu1 %1231 }
0x1b19   :  { %v1234_v38 = vmul.f32 %v3874_v30, %v1232_v35  ;;  %v993_v35 = vadd.f32 %v4410_v7, %v4470_v19 }
0x1b1b   :  { %1236 = vrot.lane.b32.xlu0 %v1234_v38, %s4058_s16 }
0x1b8d   :  { %v1237_v39 = vpop.permute.xlu0 %1236 }
0x1b8e   :  { %v1239_v41 = vadd.f32 %v1237_v39, %v1229_v59 }
0x1b90   :  { %3875 = vtanh.f32 %v1239_v41 }
0x1b9a   :  { %v3876_v46 = vpop.eup %3875 }
0x1b9b   :  { %1242 = vrot.lane.b32.xlu1 %v3876_v46, %s4052_s8 }
0x1c0d   :  { %v1243_v53 = vpop.permute.xlu1 %1242 }
0x1c0e   :  { %v4477_v36 = vmul.f32 %v3874_v30, %v1243_v53 }
0x1c10   :  { %v1251_v4 = vpack.c.bf16 %v4477_v36, %v4477_v36 }
0x1c12   :  { %1254 = vrot.lane.b32.xlu0 %v1251_v4, %s4058_s16 }
0x1c84   :  { %v1255_v48 = vpop.permute.xlu0 %1254 }
0x1c85   :  { %3582 = vmatmul.mubr.msk.bf16.vlgmr.msra.gmra.mrb[28].mxu1 %vm54_vm0, %v1255_v48 }
0x1c86   :  { %3594 = vmatpush3.bf16.msra.mxu1 %v4376_v55  ;;  %3597 = vmatprep.mubr.msk.bf16.mxu1 %vm4056_vm1, %v4055_v1 }
0x1c87   :  { %3595 = vmatprep.subr.bf16.mxu1 %v4055_v1 }
0x1c8a   :  { %3596 = vmatpush3.bf16.msra.mxu1 %v4381_v56 }
0x1c8b   :  { %3609 = vmatprep.subr.bf16.mxu1 %v4055_v1 }
0x1d58   :  { %v1293_v50 = vpop.f32.mrb[28].mxu1 }
0x1d59   :  { %v1294_v51 = vadd.f32 %v1293_v50, %v985_v49  ;;  %v3583_v43 = vpop.f32.mrb[29].mxu1 }
0x1d5a   :  { %v1296_v40 = vpop.f32.mrb[30].mxu1 }
0x1d5b   :  { %v3258_v27 = vmul.f32 -1.442695, %v1294_v51  ;;  %v3584_v52 = vpop.f32.mrb[31].mxu1 }
0x1d5d   :  { %3877 = vpow2.f32 %v3258_v27 }
0x1d67   :  { %v3878_v57 = vpop.eup %3877 }
0x1d68   :  { %v1302_v54 = vadd.f32 1.0, %v3878_v57 }
0x1d6a   :  { %3879 = vrcp.f32 %v1302_v54 }
0x1d74   :  { %v3880_v47 = vpop.eup %3879 }
0x1d75   :  { %v1305_v58 = vmul.f32 2.0, %v3880_v47  ;;  %v1307_v61 = vmul.f32 %v3880_v47, %v1239_v41 }
0x1d77   :  { %v3259_v60 = vadd.f32 -1.0, %v1305_v58  ;;  %v998_v58 = vadd.f32 %v4464_v16, %v4410_v7 }
0x1d79   :  { %1309 = vrot.lane.b32.xlu1 %v3259_v60, %s4052_s8 }
0x1deb   :  { %v1310_v62 = vpop.permute.xlu1 %1309 }
0x1dec   :  { %v1312_v63 = vmul.f32 %v3880_v47, %v1310_v62 }
0x1dee   :  { %1314 = vrot.lane.b32.xlu0 %v1312_v63, %s4058_s16 }
0x1e60   :  { %v1315_v34 = vpop.permute.xlu0 %1314 }
0x1e61   :  { %v1317_v0 = vadd.f32 %v1315_v34, %v1307_v61 }
0x1e63   :  { %3881 = vtanh.f32 %v1317_v0 }
0x1e6d   :  { %v3882_v2 = vpop.eup %3881 }
0x1e6e   :  { %1320 = vrot.lane.b32.xlu1 %v3882_v2, %s4052_s8 }
0x1ee0   :  { %v1321_v3 = vpop.permute.xlu1 %1320 }
0x1ee1   :  { %v4494_v6 = vmul.f32 %v3880_v47, %v1321_v3 }
0x1ee3   :  { %v1329_v8 = vpack.c.bf16 %v4494_v6, %v4494_v6 }
0x1ee5   :  { %1332 = vrot.lane.b32.xlu0 %v1329_v8, %s4058_s16 }
0x1f57   :  { %v1333_v5 = vpop.permute.xlu0 %1332 }
0x1f58   :  { %3590 = vmatmul.mubr.msk.bf16.vlgmr.msra.gmra.mrb[32].mxu0 %vm54_vm0, %v1333_v5 }
0x1f59   :  { %3602 = vmatpush3.bf16.msra.mxu0 %v4376_v55  ;;  %3605 = vmatprep.mubr.msk.bf16.mxu0 %vm4056_vm1, %v4055_v1 }
0x1f5a   :  { %3603 = vmatprep.subr.bf16.mxu0 %v4055_v1 }
0x1f5d   :  { %3604 = vmatpush3.bf16.msra.mxu0 %v4381_v56 }
0x202b   :  { %v1371_v45 = vpop.f32.mrb[32].mxu0 }
0x202c   :  { %v1372_v11 = vadd.f32 %v1371_v45, %v990_v10  ;;  %v3591_v12 = vpop.f32.mrb[33].mxu0 }
0x202d   :  { %v1374_v15 = vpop.f32.mrb[34].mxu0 }
0x202e   :  { %v3261_v33 = vmul.f32 -1.442695, %v1372_v11  ;;  %v3592_v44 = vpop.f32.mrb[35].mxu0 }
0x2030   :  { %3883 = vpow2.f32 %v3261_v33 }
0x203a   :  { %v3884_v13 = vpop.eup %3883 }
0x203b   :  { %v1380_v14 = vadd.f32 1.0, %v3884_v13  ;;  %v3803_v13 = vld [vmem:[#allocation5 + $0x20] sm:$0xff]  }
0x203c   :  { %3617 = vmatprep.subr.bf16.mxu0 %v3803_v13 }
0x203d   :  { %3885 = vrcp.f32 %v1380_v14  ;;  %v3804_v14 = vld [vmem:[#allocation5 + $0x28] sm:$0xff]  }
0x2047   :  { %v3886_v20 = vpop.eup %3885 }
0x2048   :  { %v1383_v21 = vmul.f32 2.0, %v3886_v20  ;;  %v1385_v17 = vmul.f32 %v3886_v20, %v1317_v0 }
0x204a   :  { %v3262_v37 = vadd.f32 -1.0, %v1383_v21 }
0x204c   :  { %1387 = vrot.lane.b32.xlu1 %v3262_v37, %s4052_s8 }
0x20be   :  { %v1388_v23 = vpop.permute.xlu1 %1387 }
0x20bf   :  { %v1390_v24 = vmul.f32 %v3886_v20, %v1388_v23 }
0x20c1   :  { %1392 = vrot.lane.b32.xlu0 %v1390_v24, %s4058_s16 }
0x2133   :  { %v1393_v25 = vpop.permute.xlu0 %1392 }
0x2134   :  { %v1395_v26 = vadd.f32 %v1393_v25, %v1385_v17 }
0x2136   :  { %3887 = vtanh.f32 %v1395_v26 }
0x2140   :  { %v3888_v28 = vpop.eup %3887 }
0x2141   :  { %1398 = vrot.lane.b32.xlu1 %v3888_v28, %s4052_s8  ;;  %v4560_v28 = vld [vmem:[#allocation7 + $0x20] sm:$0xff]  }
0x21b3   :  { %v1399_v29 = vpop.permute.xlu1 %1398 }
0x21b4   :  { %v4510_v30 = vmul.f32 %v3886_v20, %v1399_v29  ;;  %v4565_v29 = vld [vmem:[#allocation7 + $0x28] sm:$0xff]  }
0x21b6   :  { %v1407_v32 = vpack.c.bf16 %v4510_v30, %v4510_v30 }
0x21b8   :  { %1410 = vrot.lane.b32.xlu0 %v1407_v32, %s4058_s16 }
0x222a   :  { %v1411_v42 = vpop.permute.xlu0 %1410 }
0x222b   :  { %3598 = vmatmul.mubr.msk.bf16.vlgmr.msra.gmra.mrb[32].mxu1 %vm54_vm0, %v1411_v42 }
0x222c   :  { %3610 = vmatpush3.bf16.msra.mxu1 %v4376_v55  ;;  %3613 = vmatprep.mubr.msk.bf16.mxu1 %vm4056_vm1, %v4055_v1 }
0x222d   :  { %3611 = vmatprep.subr.bf16.mxu1 %v4055_v1 }
0x2230   :  { %3612 = vmatpush3.bf16.msra.mxu1 %v4381_v56 }
0x2231   :  { %3629 = vmatprep.subr.bf16.mxu1 %v4055_v1 }
0x22fe   :  { %v1449_v38 = vpop.f32.mrb[32].mxu1 }
0x22ff   :  { %v1450_v59 = vadd.f32 %v1449_v38, %v993_v35  ;;  %v3599_v39 = vpop.f32.mrb[33].mxu1 }
0x2300   :  { %v1452_v41 = vpop.f32.mrb[34].mxu1  ;;  %v1001_v39 = vadd.f32 %v4468_v18, %v4410_v7 }
0x2301   :  { %v3264_v46 = vmul.f32 -1.442695, %v1450_v59  ;;  %v3600_v53 = vpop.f32.mrb[35].mxu1 }
0x2303   :  { %3889 = vpow2.f32 %v3264_v46 }
0x230d   :  { %v3890_v55 = vpop.eup %3889 }
0x230e   :  { %v1458_v4 = vadd.f32 1.0, %v3890_v55 }
0x2310   :  { %3891 = vrcp.f32 %v1458_v4 }
0x231a   :  { %v3892_v48 = vpop.eup %3891 }
0x231b   :  { %v1461_v49 = vmul.f32 2.0, %v3892_v48  ;;  %v1463_v19 = vmul.f32 %v3892_v48, %v1395_v26 }
0x231d   :  { %v3265_v50 = vadd.f32 -1.0, %v1461_v49 }
0x231f   :  { %1465 = vrot.lane.b32.xlu1 %v3265_v50, %s4052_s8 }
0x2391   :  { %v1466_v56 = vpop.permute.xlu1 %1465 }
0x2392   :  { %v1468_v51 = vmul.f32 %v3892_v48, %v1466_v56 }
0x2394   :  { %1470 = vrot.lane.b32.xlu0 %v1468_v51, %s4058_s16 }
0x2406   :  { %v1471_v43 = vpop.permute.xlu0 %1470 }
0x2407   :  { %v1473_v40 = vadd.f32 %v1471_v43, %v1463_v19 }
0x2409   :  { %3893 = vtanh.f32 %v1473_v40 }
0x2413   :  { %v3894_v27 = vpop.eup %3893 }
0x2414   :  { %1476 = vrot.lane.b32.xlu1 %v3894_v27, %s4052_s8 }
0x2486   :  { %v1477_v52 = vpop.permute.xlu1 %1476 }
0x2487   :  { %v4527_v57 = vmul.f32 %v3892_v48, %v1477_v52  ;;  %v4594_v48 = vld [vmem:[%s4910_s3 + $0x2] ss:$0 sm:$0xff] }
0x2489   :  { %v1485_v54 = vpack.c.bf16 %v4527_v57, %v4527_v57 }
0x248b   :  { %1488 = vrot.lane.b32.xlu0 %v1485_v54, %s4058_s16 }
0x24fd   :  { %v1489_v47 = vpop.permute.xlu0 %1488 }
0x24fe   :  { %3606 = vmatmul.mubr.msk.bf16.vlgmr.msra.gmra.mrb[36].mxu0 %vm54_vm0, %v1489_v47 }
0x24ff   :  { %3618 = vmatpush3.bf16.msra.mxu0 %v3803_v13 }
0x2500   :  { %3619 = vmatprep.subr.bf16.mxu0 %v3804_v14 }
0x2503   :  { %3620 = vmatpush3.bf16.msra.mxu0 %v3804_v14 }
0x2504   :  { %3645 = vmatprep.subr.bf16.mxu0 %v4055_v1 }
0x25d1   :  { %v1527_v60 = vpop.f32.mrb[36].mxu0 }
0x25d2   :  { %v1528_v62 = vadd.f32 %v1527_v60, %v998_v58  ;;  %v3607_v63 = vpop.f32.mrb[37].mxu0 }
0x25d3   :  { %v1530_v61 = vpop.f32.mrb[38].mxu0 }
0x25d4   :  { %v3267_v34 = vmul.f32 -1.442695, %v1528_v62  ;;  %v3608_v0 = vpop.f32.mrb[39].mxu0 }
0x25d6   :  { %3895 = vpow2.f32 %v3267_v34 }
0x25e0   :  { %v3896_v2 = vpop.eup %3895 }
0x25e1   :  { %v1536_v3 = vadd.f32 1.0, %v3896_v2 }
0x25e3   :  { %3897 = vrcp.f32 %v1536_v3 }
0x25ed   :  { %v3898_v8 = vpop.eup %3897 }
0x25ee   :  { %v1539_v5 = vmul.f32 2.0, %v3898_v8  ;;  %v1541_v16 = vmul.f32 %v3898_v8, %v1473_v40 }
0x25f0   :  { %v3268_v10 = vadd.f32 -1.0, %v1539_v5 }
0x25f2   :  { %1543 = vrot.lane.b32.xlu1 %v3268_v10, %s4052_s8 }
0x2664   :  { %v1544_v45 = vpop.permute.xlu1 %1543 }
0x2665   :  { %v1546_v11 = vmul.f32 %v3898_v8, %v1544_v45 }
0x2667   :  { %1548 = vrot.lane.b32.xlu0 %v1546_v11, %s4058_s16 }
0x266b   :  { %1091 = vrot.lane.b32.xlu0 %v4417_v31, %s4058_s16 }
0x266f   :  { %1247 = vrot.lane.b32.xlu0 %v4477_v36, %s4058_s16 }
0x26d9   :  { %v1549_v12 = vpop.permute.xlu0 %1548 }
0x26da   :  { %v4541_v15 = vadd.f32 %v1549_v12, %v1541_v16 }
0x26dc   :  { %3899 = vtanh.f32 %v4541_v15 }
0x26dd   :  { %v1092_v33 = vpop.permute.xlu0 %1091 }
0x26de   :  { %1094 = vst.msk [vmem:[#allocation3] sm:$0xff] %vm54_vm0, %v1092_v33 }
0x26e1   :  { %v1248_v44 = vpop.permute.xlu0 %1247 }
0x26e2   :  { %1250 = vst.msk [vmem:[#allocation3 + $0x10] sm:$0xff] %vm54_vm0, %v1248_v44 }
0x26e5   :  { %v1653_v24 = vld [vmem:[#allocation3] sm:$0xff] }
0x26e6   :  { %v3900_v31 = vpop.eup %3899 }
0x26e7   :  { %1554 = vrot.lane.b32.xlu1 %v3900_v31, %s4052_s8 }
0x26eb   :  { %1169 = vrot.lane.b32.xlu1 %v4446_v9, %s4058_s16 }
0x26ef   :  { %1325 = vrot.lane.b32.xlu1 %v4494_v6, %s4058_s16  ;;  %v1655_v6 = vld [vmem:[#allocation3 + $0x10] sm:$0xff] }
0x2759   :  { %v1555_v36 = vpop.permute.xlu1 %1554 }
0x275a   :  { %v4552_v20 = vmul.f32 %v3898_v8, %v1555_v36 }
0x275c   :  { %v1563_v21 = vpack.c.bf16 %v4552_v20, %v4552_v20 }
0x275d   :  { %v1170_v37 = vpop.permute.xlu1 %1169 }
0x275e   :  { %1172 = vst.msk [vmem:[#allocation3 + $0x8] sm:$0xff] %vm54_vm0, %v1170_v37  ;;  %1566 = vrot.lane.b32.xlu0 %v1563_v21, %s4058_s16 }
0x2761   :  { %v1326_v23 = vpop.permute.xlu1 %1325 }
0x2762   :  { %1328 = vst.msk [vmem:[#allocation3 + $0x18] sm:$0xff] %vm54_vm0, %v1326_v23 }
0x2765   :  { %v1654_v17 = vld [vmem:[#allocation3 + $0x8] sm:$0xff] }
0x2766   :  { %v1661_v9 = vpack.c.bf16 %v1654_v17, %v1653_v24 }
0x2768   :  { %3621 = vmatprep.mubr.msk.bf16.mxu0 %vm54_vm0, %v1661_v9 }
0x2769   :  { %v1656_v25 = vld [vmem:[#allocation3 + $0x18] sm:$0xff] }
0x276a   :  { %v1662_v26 = vpack.c.bf16 %v1656_v25, %v1655_v6 }
0x276c   :  { %3622 = vmatmul.mubr.msk.bf16.vlgmr.msra.gmra.mrb[40].mxu0 %vm54_vm0, %v1662_v26 }
0x276d   :  { %3646 = vmatpush3.bf16.msra.mxu0 %v4560_v28 }
0x276e   :  { %3647 = vmatprep.subr.bf16.mxu0 %v4055_v1 }
0x2771   :  { %3648 = vmatpush3.bf16.msra.mxu0 %v4565_v29 }
0x2772   :  { %3661 = vmatprep.subr.bf16.mxu0 %v4055_v1 }
0x27d0   :  { %v1567_v32 = vpop.permute.xlu0 %1566 }
0x27d1   :  { %3614 = vmatmul.mubr.msk.bf16.vlgmr.msra.gmra.mrb[36].mxu1 %vm54_vm0, %v1567_v32 }
0x27d2   :  { %3630 = vmatpush3.bf16.msra.mxu1 %v4560_v28  ;;  %3633 = vmatprep.mubr.msk.bf16.mxu1 %vm4056_vm1, %v4055_v1 }
0x27d3   :  { %3631 = vmatprep.subr.bf16.mxu1 %v4055_v1 }
0x27d6   :  { %3632 = vmatpush3.bf16.msra.mxu1 %v4565_v29 }
0x27d7   :  { %3637 = vmatprep.subr.bf16.mxu1 %v4055_v1 }
0x27d9   :  { %3634 = vmatmul.mubr.bf16.vlgmr.msra.gmra.mrb[40].mxu1 %v4057_v22 }
0x27da   :  { %3638 = vmatpush3.bf16.msra.mxu1 %v4560_v28  ;;  %3641 = vmatprep.mubr.msk.bf16.mxu1 %vm4056_vm1, %v4055_v1 }
0x27db   :  { %3639 = vmatprep.subr.bf16.mxu1 %v4055_v1 }
0x27de   :  { %3640 = vmatpush3.bf16.msra.mxu1 %v4565_v29 }
0x27df   :  { %3653 = vmatprep.subr.bf16.mxu1 %v4055_v1 }
0x283f   :  { %v4583_v42 = vpop.f32.mrb[40].mxu0 }
0x2840   :  { %v1729_v35 = vpop.f32.mrb[41].mxu0 }
0x2841   :  { %v4585_v38 = vpop.f32.mrb[42].mxu0  ;;  %v1730_v49 = vadd.f32 %v4594_v48, %v1729_v35 }
0x2842   :  { %v4587_v59 = vpop.f32.mrb[43].mxu0 }
0x2843   :  { %v1733_v37 = vadd.f32 %v4594_v48, %v4587_v59 }
0x28a4   :  { %v1605_v41 = vpop.f32.mrb[36].mxu1 }
0x28a5   :  { %v1606_v46 = vadd.f32 %v1605_v41, %v1001_v39  ;;  %v3615_v53 = vpop.f32.mrb[37].mxu1 }
0x28a6   :  { %v1608_v55 = vpop.f32.mrb[38].mxu1 }
0x28a7   :  { %v3616_v4 = vpop.f32.mrb[39].mxu1  ;;  %v3270_v60 = vmul.f32 -1.442695, %v1606_v46 }
0x28ac   :  { %v1815_v50 = vpop.f32.mrb[40].mxu1 }
0x28ad   :  { %v1816_v56 = vadd.f32 %v1815_v50, %v1730_v49  ;;  %v3635_v51 = vpop.f32.mrb[41].mxu1 }
0x28ae   :  { %v1818_v19 = vpop.f32.mrb[42].mxu1 }
0x28af   :  { %v3282_v43 = vmul.f32 -1.442695, %v1816_v56  ;;  %v3636_v40 = vpop.f32.mrb[43].mxu1 }
0x28b1   :  { %3901 = vpow2.f32 %v3282_v43 }
0x28bb   :  { %v3902_v7 = vpop.eup %3901 }
0x28bc   :  { %v1824_v18 = vadd.f32 1.0, %v3902_v7 }
0x28be   :  { %3903 = vrcp.f32 %v1824_v18 }
0x28bf   :  { %3905 = vpow2.f32 %v3270_v60 }
0x28c8   :  { %v3904_v27 = vpop.eup %3903 }
0x28c9   :  { %v1827_v52 = vmul.f32 2.0, %v3904_v27  ;;  %v3906_v62 = vpop.eup %3905  ;;  %v1829_v61 = vmul.f32 0.0, %v3904_v27 }
0x28ca   :  { %v1614_v63 = vadd.f32 1.0, %v3906_v62  ;;  %v1738_v62 = vadd.f32 %v4583_v42, %v4594_v48 }
0x28cb   :  { %v3283_v54 = vadd.f32 -1.0, %v1827_v52 }
0x28cc   :  { %3907 = vrcp.f32 %v1614_v63 }
0x28cd   :  { %1831 = vrot.lane.b32.xlu1 %v3283_v54, %s4052_s8 }
0x28d6   :  { %v3908_v2 = vpop.eup %3907 }
0x28d7   :  { %v1617_v3 = vmul.f32 2.0, %v3908_v2  ;;  %v1619_v44 = vmul.f32 %v3908_v2, %v4541_v15 }
0x28d9   :  { %v3271_v5 = vadd.f32 -1.0, %v1617_v3 }
0x293f   :  { %v1832_v47 = vpop.permute.xlu1 %1831 }
0x2940   :  { %v1834_v58 = vmul.f32 %v3904_v27, %v1832_v47 }
0x2942   :  { %1836 = vrot.lane.b32.xlu0 %v1834_v58, %s4058_s16 }
0x29b4   :  { %v1837_v34 = vpop.permute.xlu0 %1836 }
0x29b5   :  { %v1839_v0 = vadd.f32 %v1837_v34, %v1829_v61 }
0x29b7   :  { %3909 = vtanh.f32 %v1839_v0 }
0x29c1   :  { %v3910_v8 = vpop.eup %3909 }
0x29c2   :  { %1842 = vrot.lane.b32.xlu1 %v3910_v8, %s4052_s8 }
0x29c6   :  { %1621 = vrot.lane.b32.xlu1 %v3271_v5, %s4052_s8 }
0x2a34   :  { %v1843_v10 = vpop.permute.xlu1 %1842 }
0x2a35   :  { %v4601_v45 = vmul.f32 %v3904_v27, %v1843_v10 }
0x2a37   :  { %v1851_v11 = vpack.c.bf16 %v4601_v45, %v4601_v45 }
0x2a38   :  { %v1622_v16 = vpop.permute.xlu1 %1621 }
0x2a39   :  { %v1624_v12 = vmul.f32 %v3908_v2, %v1622_v16  ;;  %1854 = vrot.lane.b32.xlu0 %v1851_v11, %s4058_s16 }
0x2a3b   :  { %1626 = vrot.lane.b32.xlu1 %v1624_v12, %s4058_s16 }
0x2aab   :  { %v1855_v33 = vpop.permute.xlu0 %1854 }
0x2aac   :  { %3642 = vmatmul.mubr.msk.bf16.vlgmr.msra.gmra.mrb[44].mxu1 %vm54_vm0, %v1855_v33 }
0x2aad   :  { %v1627_v13 = vpop.permute.xlu1 %1626  ;;  %3654 = vmatpush3.bf16.msra.mxu1 %v4560_v28  ;;  %3657 = vmatprep.mubr.msk.bf16.mxu1 %vm4056_vm1, %v4055_v1 }
0x2aae   :  { %v1629_v14 = vadd.f32 %v1627_v13, %v1619_v44  ;;  %3655 = vmatprep.subr.bf16.mxu1 %v4055_v1 }
0x2ab0   :  { %3911 = vtanh.f32 %v1629_v14 }
0x2ab1   :  { %3656 = vmatpush3.bf16.msra.mxu1 %v4565_v29 }
0x2ab2   :  { %3669 = vmatprep.subr.bf16.mxu1 %v4055_v1 }
0x2aba   :  { %v3912_v31 = vpop.eup %3911 }
0x2abb   :  { %1632 = vrot.lane.b32.xlu1 %v3912_v31, %s4052_s8 }
0x2abf   :  { %1403 = vrot.lane.b32.xlu1 %v4510_v30, %s4058_s16 }
0x2ac3   :  { %1559 = vrot.lane.b32.xlu1 %v4552_v20, %s4058_s16 }
0x2b2d   :  { %v1633_v15 = vpop.permute.xlu1 %1632 }
0x2b2e   :  { %v1635_v4 = vmul.f32 %v3908_v2, %v1633_v15 }
0x2b31   :  { %v1404_v36 = vpop.permute.xlu1 %1403 }
0x2b32   :  { %1406 = vst.msk [vmem:[#allocation3 + $0x20] sm:$0xff] %vm54_vm0, %v1404_v36 }
0x2b35   :  { %v1560_v21 = vpop.permute.xlu1 %1559 }
0x2b36   :  { %1562 = vst.msk [vmem:[#allocation3 + $0x30] sm:$0xff] %vm54_vm0, %v1560_v21 }
0x2b39   :  { %v1657_v43 = vld [vmem:[#allocation3 + $0x20] sm:$0xff] }
0x2b3d   :  { %v1659_v7 = vld [vmem:[#allocation3 + $0x30] sm:$0xff] }
0x2b7f   :  { %v1893_v23 = vpop.f32.mrb[44].mxu1 }
0x2b80   :  { %v1894_v24 = vadd.f32 %v1893_v23, %v1733_v37  ;;  %v3643_v17 = vpop.f32.mrb[45].mxu1  ;;  %v1741_v37 = vadd.f32 %v4585_v38, %v4594_v48 }
0x2b81   :  { %v1896_v9 = vpop.f32.mrb[46].mxu1 }
0x2b82   :  { %v3285_v6 = vmul.f32 -1.442695, %v1894_v24  ;;  %v3644_v25 = vpop.f32.mrb[47].mxu1 }
0x2b84   :  { %3913 = vpow2.f32 %v3285_v6 }
0x2b8e   :  { %v3914_v30 = vpop.eup %3913 }
0x2b8f   :  { %v1902_v26 = vadd.f32 1.0, %v3914_v30 }
0x2b91   :  { %3915 = vrcp.f32 %v1902_v26 }
0x2b9b   :  { %v3916_v20 = vpop.eup %3915 }
0x2b9c   :  { %v1905_v32 = vmul.f32 2.0, %v3916_v20  ;;  %v1907_v59 = vmul.f32 %v3916_v20, %v1839_v0 }
0x2b9e   :  { %v3286_v35 = vadd.f32 -1.0, %v1905_v32 }
0x2ba0   :  { %1909 = vrot.lane.b32.xlu0 %v3286_v35, %s4052_s8 }
0x2c12   :  { %v1910_v39 = vpop.permute.xlu0 %1909 }
0x2c13   :  { %v1912_v41 = vmul.f32 %v3916_v20, %v1910_v39 }
0x2c15   :  { %1914 = vrot.lane.b32.xlu0 %v1912_v41, %s4058_s16 }
0x2c87   :  { %v1915_v46 = vpop.permute.xlu0 %1914 }
0x2c88   :  { %v1917_v53 = vadd.f32 %v1915_v46, %v1907_v59 }
0x2c8a   :  { %3917 = vtanh.f32 %v1917_v53 }
0x2c94   :  { %v3918_v55 = vpop.eup %3917 }
0x2c95   :  { %1920 = vrot.lane.b32.xlu0 %v3918_v55, %s4052_s8 }
0x2c99   :  { %1481 = vrot.lane.b32.xlu0 %v4527_v57, %s4058_s16 }
0x2c9d   :  { %1637 = vrot.lane.b32.xlu0 %v1635_v4, %s4058_s16 }
0x2d07   :  { %v1921_v49 = vpop.permute.xlu0 %1920 }
0x2d08   :  { %v4630_v50 = vmul.f32 %v3916_v20, %v1921_v49 }
0x2d0a   :  { %v1929_v56 = vpack.c.bf16 %v4630_v50, %v4630_v50 }
0x2d0b   :  { %v1482_v51 = vpop.permute.xlu0 %1481 }
0x2d0c   :  { %1484 = vst.msk [vmem:[#allocation3 + $0x28] sm:$0xff] %vm54_vm0, %v1482_v51  ;;  %1932 = vrot.lane.b32.xlu1 %v1929_v56, %s4058_s16 }
0x2d0f   :  { %v1638_v19 = vpop.permute.xlu0 %1637 }
0x2d10   :  { %1640 = vst.msk [vmem:[#allocation3 + $0x38] sm:$0xff] %vm54_vm0, %v1638_v19 }
0x2d13   :  { %v1658_v40 = vld [vmem:[#allocation3 + $0x28] sm:$0xff] }
0x2d14   :  { %v1663_v57 = vpack.c.bf16 %v1658_v40, %v1657_v43 }
0x2d16   :  { %3625 = vmatprep.mubr.msk.bf16.mxu0 %vm54_vm0, %v1663_v57 }
0x2d17   :  { %v1660_v18 = vld [vmem:[#allocation3 + $0x38] sm:$0xff] }
0x2d18   :  { %v1664_v27 = vpack.c.bf16 %v1660_v18, %v1659_v7 }
0x2d1a   :  { %3626 = vmatmul.mubr.msk.bf16.gmra.mrb[44].mxu0 %vm54_vm0, %v1664_v27 }
0x2d1b   :  { %3649 = vmatprep.mubr.msk.bf16.mxu0 %vm4056_vm1, %v4055_v1 }
0x2d7e   :  { %v1933_v52 = vpop.permute.xlu1 %1932 }
0x2d7f   :  { %3650 = vmatmul.mubr.msk.bf16.vlgmr.msra.gmra.mrb[48].mxu0 %vm54_vm0, %v1933_v52 }
0x2d80   :  { %3662 = vmatpush3.bf16.msra.mxu0 %v4560_v28  ;;  %3665 = vmatprep.mubr.msk.bf16.mxu0 %vm4056_vm1, %v4055_v1 }
0x2d81   :  { %3663 = vmatprep.subr.bf16.mxu0 %v4055_v1 }
0x2d84   :  { %3664 = vmatpush3.bf16.msra.mxu0 %v4565_v29 }
0x2d85   :  { %3677 = vmatprep.subr.bf16.mxu0 %v4055_v1 }
0x2ded   :  { %v4648_v54 = vpop.f32.mrb[44].mxu0 }
0x2dee   :  { %v4650_v47 = vpop.f32.mrb[45].mxu0 }
0x2def   :  { %v4652_v58 = vpop.f32.mrb[46].mxu0  ;;  %v1746_v51 = vadd.f32 %v4594_v48, %v4650_v47 }
0x2df0   :  { %v4654_v60 = vpop.f32.mrb[47].mxu0 }
0x2e52   :  { %v1971_v63 = vpop.f32.mrb[48].mxu0 }
0x2e53   :  { %v1972_v61 = vadd.f32 %v1971_v63, %v1738_v62  ;;  %v3651_v34 = vpop.f32.mrb[49].mxu0 }
0x2e54   :  { %v1974_v0 = vpop.f32.mrb[50].mxu0 }
0x2e55   :  { %v3288_v2 = vmul.f32 -1.442695, %v1972_v61  ;;  %v3652_v3 = vpop.f32.mrb[51].mxu0 }
0x2e57   :  { %3919 = vpow2.f32 %v3288_v2 }
0x2e61   :  { %v3920_v8 = vpop.eup %3919 }
0x2e62   :  { %v1980_v5 = vadd.f32 1.0, %v3920_v8 }
0x2e64   :  { %3921 = vrcp.f32 %v1980_v5 }
0x2e6e   :  { %v3922_v10 = vpop.eup %3921 }
0x2e6f   :  { %v1983_v11 = vmul.f32 2.0, %v3922_v10  ;;  %v1985_v42 = vmul.f32 %v3922_v10, %v1917_v53 }
0x2e71   :  { %v3289_v16 = vadd.f32 -1.0, %v1983_v11 }
0x2e73   :  { %1987 = vrot.lane.b32.xlu0 %v3289_v16, %s4052_s8 }
0x2ee5   :  { %v1988_v12 = vpop.permute.xlu0 %1987 }
0x2ee6   :  { %v1990_v33 = vmul.f32 %v3922_v10, %v1988_v12  ;;  %v1749_v12 = vadd.f32 %v4594_v48, %v4654_v60 }
0x2ee8   :  { %1992 = vrot.lane.b32.xlu1 %v1990_v33, %s4058_s16 }
0x2f5a   :  { %v1993_v44 = vpop.permute.xlu1 %1992 }
0x2f5b   :  { %v1995_v13 = vadd.f32 %v1993_v44, %v1985_v42 }
0x2f5d   :  { %3923 = vtanh.f32 %v1995_v13 }
0x2f67   :  { %v3924_v14 = vpop.eup %3923 }
0x2f68   :  { %1998 = vrot.lane.b32.xlu0 %v3924_v14, %s4052_s8 }
0x2fda   :  { %v1999_v31 = vpop.permute.xlu0 %1998 }
0x2fdb   :  { %v4661_v15 = vmul.f32 %v3922_v10, %v1999_v31 }
0x2fdd   :  { %v2007_v36 = vpack.c.bf16 %v4661_v15, %v4661_v15 }
0x2fdf   :  { %2010 = vrot.lane.b32.xlu1 %v2007_v36, %s4058_s16 }
0x3051   :  { %v2011_v21 = vpop.permute.xlu1 %2010 }
0x3052   :  { %3658 = vmatmul.mubr.msk.bf16.vlgmr.msra.gmra.mrb[48].mxu1 %vm54_vm0, %v2011_v21 }
0x3053   :  { %3670 = vmatpush3.bf16.msra.mxu1 %v4560_v28  ;;  %3673 = vmatprep.mubr.msk.bf16.mxu1 %vm4056_vm1, %v4055_v1 }
0x3054   :  { %3671 = vmatprep.subr.bf16.mxu1 %v4055_v1 }
0x3057   :  { %3672 = vmatpush3.bf16.msra.mxu1 %v4565_v29 }
0x3058   :  { %3685 = vmatprep.subr.bf16.mxu1 %v4055_v1 }
0x3125   :  { %v2049_v23 = vpop.f32.mrb[48].mxu1 }
0x3126   :  { %v2050_v24 = vadd.f32 %v2049_v23, %v1741_v37  ;;  %v3659_v17 = vpop.f32.mrb[49].mxu1 }
0x3127   :  { %v2052_v9 = vpop.f32.mrb[50].mxu1 }
0x3128   :  { %v3291_v6 = vmul.f32 -1.442695, %v2050_v24  ;;  %v3660_v25 = vpop.f32.mrb[51].mxu1 }
0x312a   :  { %3925 = vpow2.f32 %v3291_v6 }
0x3134   :  { %v3926_v30 = vpop.eup %3925 }
0x3135   :  { %v2058_v26 = vadd.f32 1.0, %v3926_v30 }
0x3137   :  { %3927 = vrcp.f32 %v2058_v26 }
0x3141   :  { %v3928_v20 = vpop.eup %3927 }
0x3142   :  { %v2061_v32 = vmul.f32 2.0, %v3928_v20  ;;  %v2063_v38 = vmul.f32 %v3928_v20, %v1995_v13 }
0x3144   :  { %v3292_v35 = vadd.f32 -1.0, %v2061_v32  ;;  %v1754_v32 = vadd.f32 %v4648_v54, %v4594_v48 }
0x3146   :  { %2065 = vrot.lane.b32.xlu0 %v3292_v35, %s4052_s8 }
0x31b8   :  { %v2066_v39 = vpop.permute.xlu0 %2065 }
0x31b9   :  { %v2068_v41 = vmul.f32 %v3928_v20, %v2066_v39 }
0x31bb   :  { %2070 = vrot.lane.b32.xlu1 %v2068_v41, %s4058_s16 }
0x322d   :  { %v2071_v59 = vpop.permute.xlu1 %2070 }
0x322e   :  { %v2073_v46 = vadd.f32 %v2071_v59, %v2063_v38 }
0x3230   :  { %3929 = vtanh.f32 %v2073_v46 }
0x323a   :  { %v3930_v53 = vpop.eup %3929 }
0x323b   :  { %2076 = vrot.lane.b32.xlu0 %v3930_v53, %s4052_s8 }
0x32ad   :  { %v2077_v55 = vpop.permute.xlu0 %2076 }
0x32ae   :  { %v4678_v4 = vmul.f32 %v3928_v20, %v2077_v55 }
0x32b0   :  { %v2085_v49 = vpack.c.bf16 %v4678_v4, %v4678_v4 }
0x32b2   :  { %2088 = vrot.lane.b32.xlu1 %v2085_v49, %s4058_s16 }
0x3324   :  { %v2089_v56 = vpop.permute.xlu1 %2088 }
0x3325   :  { %3666 = vmatmul.mubr.msk.bf16.vlgmr.msra.gmra.mrb[52].mxu0 %vm54_vm0, %v2089_v56 }
0x3326   :  { %3678 = vmatpush3.bf16.msra.mxu0 %v4560_v28  ;;  %3681 = vmatprep.mubr.msk.bf16.mxu0 %vm4056_vm1, %v4055_v1 }
0x3327   :  { %3679 = vmatprep.subr.bf16.mxu0 %v4055_v1 }
0x332a   :  { %3680 = vmatpush3.bf16.msra.mxu0 %v4565_v29 }
0x33f8   :  { %v2127_v19 = vpop.f32.mrb[52].mxu0 }
0x33f9   :  { %v2128_v43 = vadd.f32 %v2127_v19, %v1746_v51  ;;  %v3667_v40 = vpop.f32.mrb[53].mxu0 }
0x33fa   :  { %v2130_v57 = vpop.f32.mrb[54].mxu0 }
0x33fb   :  { %v3294_v7 = vmul.f32 -1.442695, %v2128_v43  ;;  %v3668_v18 = vpop.f32.mrb[55].mxu0 }
0x33fd   :  { %3931 = vpow2.f32 %v3294_v7 }
0x3407   :  { %v3932_v27 = vpop.eup %3931 }
0x3408   :  { %v2136_v52 = vadd.f32 1.0, %v3932_v27  ;;  %v3807_v27 = vld [vmem:[#allocation5 + $0x30] sm:$0xff]  }
0x3409   :  { %3693 = vmatprep.subr.bf16.mxu0 %v3807_v27 }
0x340a   :  { %3933 = vrcp.f32 %v2136_v52  ;;  %v3808_v52 = vld [vmem:[#allocation5 + $0x38] sm:$0xff]  }
0x3414   :  { %v3934_v62 = vpop.eup %3933 }
0x3415   :  { %v2139_v63 = vmul.f32 2.0, %v3934_v62  ;;  %v2141_v47 = vmul.f32 %v3934_v62, %v2073_v46 }
0x3417   :  { %v3295_v61 = vadd.f32 -1.0, %v2139_v63 }
0x3419   :  { %2143 = vrot.lane.b32.xlu0 %v3295_v61, %s4052_s8 }
0x348b   :  { %v2144_v34 = vpop.permute.xlu0 %2143 }
0x348c   :  { %v2146_v0 = vmul.f32 %v3934_v62, %v2144_v34 }
0x348e   :  { %2148 = vrot.lane.b32.xlu1 %v2146_v0, %s4058_s16 }
0x3500   :  { %v2149_v2 = vpop.permute.xlu1 %2148 }
0x3501   :  { %v2151_v3 = vadd.f32 %v2149_v2, %v2141_v47 }
0x3503   :  { %3935 = vtanh.f32 %v2151_v3 }
0x350d   :  { %v3936_v8 = vpop.eup %3935 }
0x350e   :  { %2154 = vrot.lane.b32.xlu0 %v3936_v8, %s4052_s8  ;;  %v4744_v8 = vld [vmem:[#allocation7 + $0x30] sm:$0xff]  }
0x3580   :  { %v2155_v5 = vpop.permute.xlu0 %2154 }
0x3581   :  { %v4694_v10 = vmul.f32 %v3934_v62, %v2155_v5  ;;  %v4749_v5 = vld [vmem:[#allocation7 + $0x38] sm:$0xff]  }
0x3583   :  { %v2163_v11 = vpack.c.bf16 %v4694_v10, %v4694_v10 }
0x3585   :  { %2166 = vrot.lane.b32.xlu1 %v2163_v11, %s4058_s16 }
0x35f7   :  { %v2167_v16 = vpop.permute.xlu1 %2166 }
0x35f8   :  { %3674 = vmatmul.mubr.msk.bf16.vlgmr.msra.gmra.mrb[52].mxu1 %vm54_vm0, %v2167_v16 }
0x35f9   :  { %3686 = vmatpush3.bf16.msra.mxu1 %v4560_v28  ;;  %3689 = vmatprep.mubr.msk.bf16.mxu1 %vm4056_vm1, %v4055_v1 }
0x35fa   :  { %3687 = vmatprep.subr.bf16.mxu1 %v4055_v1 }
0x35fd   :  { %3688 = vmatpush3.bf16.msra.mxu1 %v4565_v29 }
0x35fe   :  { %3705 = vmatprep.subr.bf16.mxu1 %v4055_v1 }
0x36cb   :  { %v2205_v33 = vpop.f32.mrb[52].mxu1 }
0x36cc   :  { %v2206_v42 = vadd.f32 %v2205_v33, %v1749_v12  ;;  %v3675_v44 = vpop.f32.mrb[53].mxu1 }
0x36cd   :  { %v2208_v13 = vpop.f32.mrb[54].mxu1 }
0x36ce   :  { %v3297_v14 = vmul.f32 -1.442695, %v2206_v42  ;;  %v3676_v31 = vpop.f32.mrb[55].mxu1 }
0x36d0   :  { %3937 = vpow2.f32 %v3297_v14 }
0x36da   :  { %v3938_v28 = vpop.eup %3937 }
0x36db   :  { %v2214_v36 = vadd.f32 1.0, %v3938_v28 }
0x36dd   :  { %3939 = vrcp.f32 %v2214_v36  ;;  %v4778_v36 = vld [vmem:[%s4910_s3 + $0x3] ss:$0 sm:$0xff] }
0x36e7   :  { %v3940_v21 = vpop.eup %3939 }
0x36e8   :  { %v2217_v37 = vmul.f32 2.0, %v3940_v21  ;;  %v2219_v60 = vmul.f32 %v3940_v21, %v2151_v3 }
0x36ea   :  { %v3298_v23 = vadd.f32 -1.0, %v2217_v37 }
0x36ec   :  { %2221 = vrot.lane.b32.xlu0 %v3298_v23, %s4052_s8 }
0x375e   :  { %v2222_v29 = vpop.permute.xlu0 %2221 }
0x375f   :  { %v2224_v24 = vmul.f32 %v3940_v21, %v2222_v29 }
0x3761   :  { %2226 = vrot.lane.b32.xlu1 %v2224_v24, %s4058_s16 }
0x37d3   :  { %v2227_v17 = vpop.permute.xlu1 %2226 }
0x37d4   :  { %v2229_v9 = vadd.f32 %v2227_v17, %v2219_v60 }
0x37d6   :  { %3941 = vtanh.f32 %v2229_v9 }
0x37e0   :  { %v3942_v6 = vpop.eup %3941 }
0x37e1   :  { %2232 = vrot.lane.b32.xlu0 %v3942_v6, %s4052_s8 }
0x3853   :  { %v2233_v25 = vpop.permute.xlu0 %2232 }
0x3854   :  { %v4711_v30 = vmul.f32 %v3940_v21, %v2233_v25 }
0x3856   :  { %v2241_v26 = vpack.c.bf16 %v4711_v30, %v4711_v30 }
0x3858   :  { %2244 = vrot.lane.b32.xlu1 %v2241_v26, %s4058_s16 }
0x38ca   :  { %v2245_v20 = vpop.permute.xlu1 %2244 }
0x38cb   :  { %3682 = vmatmul.mubr.msk.bf16.vlgmr.msra.gmra.mrb[56].mxu0 %vm54_vm0, %v2245_v20 }
0x38cc   :  { %3694 = vmatpush3.bf16.msra.mxu0 %v3807_v27 }
0x38cd   :  { %3695 = vmatprep.subr.bf16.mxu0 %v3808_v52 }
0x38d0   :  { %3696 = vmatpush3.bf16.msra.mxu0 %v3808_v52 }
0x38d1   :  { %3721 = vmatprep.subr.bf16.mxu0 %v4055_v1 }
0x399e   :  { %v2283_v35 = vpop.f32.mrb[56].mxu0 }
0x399f   :  { %v2284_v39 = vadd.f32 %v2283_v35, %v1754_v32  ;;  %v3683_v41 = vpop.f32.mrb[57].mxu0 }
0x39a0   :  { %v2286_v38 = vpop.f32.mrb[58].mxu0 }
0x39a1   :  { %v3300_v59 = vmul.f32 -1.442695, %v2284_v39  ;;  %v3684_v46 = vpop.f32.mrb[59].mxu0 }
0x39a3   :  { %3943 = vpow2.f32 %v3300_v59 }
0x39ad   :  { %v3944_v53 = vpop.eup %3943 }
0x39ae   :  { %v2292_v55 = vadd.f32 1.0, %v3944_v53 }
0x39b0   :  { %3945 = vrcp.f32 %v2292_v55 }
0x39ba   :  { %v3946_v49 = vpop.eup %3945 }
0x39bb   :  { %v2295_v56 = vmul.f32 2.0, %v3946_v49  ;;  %v2297_v54 = vmul.f32 %v3946_v49, %v2229_v9 }
0x39bd   :  { %v3301_v51 = vadd.f32 -1.0, %v2295_v56 }
0x39bf   :  { %2299 = vrot.lane.b32.xlu0 %v3301_v51, %s4052_s8 }
0x3a31   :  { %v2300_v19 = vpop.permute.xlu0 %2299 }
0x3a32   :  { %v2302_v43 = vmul.f32 %v3946_v49, %v2300_v19 }
0x3a34   :  { %2304 = vrot.lane.b32.xlu1 %v2302_v43, %s4058_s16 }
0x3a38   :  { %1847 = vrot.lane.b32.xlu1 %v4601_v45, %s4058_s16 }
0x3a3c   :  { %2003 = vrot.lane.b32.xlu1 %v4661_v15, %s4058_s16 }
0x3aa6   :  { %v2305_v40 = vpop.permute.xlu1 %2304 }
0x3aa7   :  { %v4725_v57 = vadd.f32 %v2305_v40, %v2297_v54 }
0x3aa9   :  { %3947 = vtanh.f32 %v4725_v57 }
0x3aaa   :  { %v1848_v7 = vpop.permute.xlu1 %1847 }
0x3aab   :  { %1850 = vst.msk [vmem:[#allocation3] sm:$0xff] %vm54_vm0, %v1848_v7 }
0x3aae   :  { %v2004_v18 = vpop.permute.xlu1 %2003 }
0x3aaf   :  { %2006 = vst.msk [vmem:[#allocation3 + $0x10] sm:$0xff] %vm54_vm0, %v2004_v18 }
0x3ab2   :  { %v2409_v0 = vld [vmem:[#allocation3] sm:$0xff] }
0x3ab3   :  { %v3948_v45 = vpop.eup %3947 }
0x3ab4   :  { %2310 = vrot.lane.b32.xlu0 %v3948_v45, %s4052_s8 }
0x3ab8   :  { %1925 = vrot.lane.b32.xlu0 %v4630_v50, %s4058_s16 }
0x3abc   :  { %2081 = vrot.lane.b32.xlu0 %v4678_v4, %s4058_s16  ;;  %v2411_v4 = vld [vmem:[#allocation3 + $0x10] sm:$0xff] }
0x3b26   :  { %v2311_v15 = vpop.permute.xlu0 %2310 }
0x3b27   :  { %v4736_v62 = vmul.f32 %v3946_v49, %v2311_v15 }
0x3b29   :  { %v2319_v63 = vpack.c.bf16 %v4736_v62, %v4736_v62 }
0x3b2a   :  { %v1926_v61 = vpop.permute.xlu0 %1925 }
0x3b2b   :  { %1928 = vst.msk [vmem:[#allocation3 + $0x8] sm:$0xff] %vm54_vm0, %v1926_v61  ;;  %2322 = vrot.lane.b32.xlu1 %v2319_v63, %s4058_s16 }
0x3b2e   :  { %v2082_v34 = vpop.permute.xlu0 %2081 }
0x3b2f   :  { %2084 = vst.msk [vmem:[#allocation3 + $0x18] sm:$0xff] %vm54_vm0, %v2082_v34 }
0x3b32   :  { %v2410_v47 = vld [vmem:[#allocation3 + $0x8] sm:$0xff] }
0x3b33   :  { %v2417_v50 = vpack.c.bf16 %v2410_v47, %v2409_v0 }
0x3b35   :  { %3697 = vmatprep.mubr.msk.bf16.mxu0 %vm54_vm0, %v2417_v50 }
0x3b36   :  { %v2412_v2 = vld [vmem:[#allocation3 + $0x18] sm:$0xff] }
0x3b37   :  { %v2418_v3 = vpack.c.bf16 %v2412_v2, %v2411_v4 }
0x3b39   :  { %3698 = vmatmul.mubr.msk.bf16.vlgmr.msra.gmra.mrb[60].mxu0 %vm54_vm0, %v2418_v3 }
0x3b3a   :  { %3722 = vmatpush3.bf16.msra.mxu0 %v4744_v8 }
0x3b3b   :  { %3723 = vmatprep.subr.bf16.mxu0 %v4055_v1 }
0x3b3e   :  { %3724 = vmatpush3.bf16.msra.mxu0 %v4749_v5 }
0x3b3f   :  { %3737 = vmatprep.subr.bf16.mxu0 %v4055_v1 }
0x3b9d   :  { %v2323_v11 = vpop.permute.xlu1 %2322 }
0x3b9e   :  { %3690 = vmatmul.mubr.msk.bf16.vlgmr.msra.gmra.mrb[56].mxu1 %vm54_vm0, %v2323_v11 }
0x3b9f   :  { %3706 = vmatpush3.bf16.msra.mxu1 %v4744_v8  ;;  %3709 = vmatprep.mubr.msk.bf16.mxu1 %vm4056_vm1, %v4055_v1 }
0x3ba0   :  { %3707 = vmatprep.subr.bf16.mxu1 %v4055_v1 }
0x3ba3   :  { %3708 = vmatpush3.bf16.msra.mxu1 %v4749_v5 }
0x3ba4   :  { %3713 = vmatprep.subr.bf16.mxu1 %v4055_v1 }
0x3ba6   :  { %3710 = vmatmul.mubr.bf16.vlgmr.msra.gmra.mrb[60].mxu1 %v4057_v22  ;;  %v1757_v22 = vadd.f32 %v4652_v58, %v4594_v48 }
0x3ba7   :  { %3714 = vmatpush3.bf16.msra.mxu1 %v4744_v8  ;;  %3717 = vmatprep.mubr.msk.bf16.mxu1 %vm4056_vm1, %v4055_v1 }
0x3ba8   :  { %3715 = vmatprep.subr.bf16.mxu1 %v4055_v1 }
0x3bab   :  { %3716 = vmatpush3.bf16.msra.mxu1 %v4749_v5 }
0x3bac   :  { %3729 = vmatprep.subr.bf16.mxu1 %v4055_v1 }
0x3c0c   :  { %v4767_v16 = vpop.f32.mrb[60].mxu0 }
0x3c0d   :  { %v2485_v12 = vpop.f32.mrb[61].mxu0 }
0x3c0e   :  { %v4769_v33 = vpop.f32.mrb[62].mxu0  ;;  %v2486_v21 = vadd.f32 %v4778_v36, %v2485_v12 }
0x3c0f   :  { %v4771_v42 = vpop.f32.mrb[63].mxu0 }
0x3c10   :  { %v2489_v63 = vadd.f32 %v4778_v36, %v4771_v42 }
0x3c71   :  { %v2361_v44 = vpop.f32.mrb[56].mxu1 }
0x3c72   :  { %v2362_v13 = vadd.f32 %v2361_v44, %v1757_v22  ;;  %v3691_v14 = vpop.f32.mrb[57].mxu1 }
0x3c73   :  { %v2364_v31 = vpop.f32.mrb[58].mxu1 }
0x3c74   :  { %v3692_v28 = vpop.f32.mrb[59].mxu1  ;;  %v3303_v32 = vmul.f32 -1.442695, %v2362_v13 }
0x3c79   :  { %v2571_v37 = vpop.f32.mrb[60].mxu1 }
0x3c7a   :  { %v2572_v23 = vadd.f32 %v2571_v37, %v2486_v21  ;;  %v3711_v29 = vpop.f32.mrb[61].mxu1 }
0x3c7b   :  { %v2574_v24 = vpop.f32.mrb[62].mxu1 }
0x3c7c   :  { %v3315_v60 = vmul.f32 -1.442695, %v2572_v23  ;;  %v3712_v17 = vpop.f32.mrb[63].mxu1 }
0x3c7e   :  { %3949 = vpow2.f32 %v3315_v60 }
0x3c88   :  { %v3950_v48 = vpop.eup %3949 }
0x3c89   :  { %v2580_v58 = vadd.f32 1.0, %v3950_v48 }
0x3c8b   :  { %3951 = vrcp.f32 %v2580_v58 }
0x3c8c   :  { %3953 = vpow2.f32 %v3303_v32  ;;  %v2494_v32 = vadd.f32 %v4767_v16, %v4778_v36 }
0x3c95   :  { %v3952_v9 = vpop.eup %3951 }
0x3c96   :  { %v2583_v6 = vmul.f32 2.0, %v3952_v9  ;;  %v3954_v35 = vpop.eup %3953  ;;  %v2585_v41 = vmul.f32 0.0, %v3952_v9 }
0x3c97   :  { %v2370_v39 = vadd.f32 1.0, %v3954_v35 }
0x3c98   :  { %v3316_v25 = vadd.f32 -1.0, %v2583_v6 }
0x3c99   :  { %3955 = vrcp.f32 %v2370_v39 }
0x3c9a   :  { %2587 = vrot.lane.b32.xlu0 %v3316_v25, %s4052_s8 }
0x3ca3   :  { %v3956_v46 = vpop.eup %3955 }
0x3ca4   :  { %v2373_v53 = vmul.f32 2.0, %v3956_v46  ;;  %v2375_v7 = vmul.f32 %v3956_v46, %v4725_v57 }
0x3ca6   :  { %v3304_v49 = vadd.f32 -1.0, %v2373_v53 }
0x3d0c   :  { %v2588_v26 = vpop.permute.xlu0 %2587 }
0x3d0d   :  { %v2590_v20 = vmul.f32 %v3952_v9, %v2588_v26 }
0x3d0f   :  { %2592 = vrot.lane.b32.xlu1 %v2590_v20, %s4058_s16 }
0x3d81   :  { %v2593_v38 = vpop.permute.xlu1 %2592 }
0x3d82   :  { %v2595_v59 = vadd.f32 %v2593_v38, %v2585_v41 }
0x3d84   :  { %3957 = vtanh.f32 %v2595_v59 }
0x3d8e   :  { %v3958_v55 = vpop.eup %3957 }
0x3d8f   :  { %2598 = vrot.lane.b32.xlu0 %v3958_v55, %s4052_s8 }
0x3d93   :  { %2377 = vrot.lane.b32.xlu0 %v3304_v49, %s4052_s8 }
0x3e01   :  { %v2599_v56 = vpop.permute.xlu0 %2598 }
0x3e02   :  { %v2601_v51 = vmul.f32 %v3952_v9, %v2599_v56 }
0x3e04   :  { %v2602_v19 = vpack.c.bf16 %v2601_v51, %v2601_v51 }
0x3e05   :  { %v2378_v43 = vpop.permute.xlu0 %2377 }
0x3e06   :  { %v2380_v54 = vmul.f32 %v3956_v46, %v2378_v43  ;;  %2605 = vrot.lane.b32.xlu1 %v2602_v19, %s4058_s16 }
0x3e08   :  { %2382 = vrot.lane.b32.xlu0 %v2380_v54, %s4058_s16 }
0x3e78   :  { %v2606_v40 = vpop.permute.xlu1 %2605 }
0x3e79   :  { %3718 = vmatmul.mubr.msk.bf16.vlgmr.msra.gmra.mrb[64].mxu1 %vm54_vm0, %v2606_v40 }
0x3e7a   :  { %v2383_v18 = vpop.permute.xlu0 %2382  ;;  %3730 = vmatpush3.bf16.msra.mxu1 %v4744_v8  ;;  %3733 = vmatprep.mubr.msk.bf16.mxu1 %vm4056_vm1, %v4055_v1 }
0x3e7b   :  { %v2385_v27 = vadd.f32 %v2383_v18, %v2375_v7  ;;  %3731 = vmatprep.subr.bf16.mxu1 %v4055_v1 }
0x3e7d   :  { %3959 = vtanh.f32 %v2385_v27 }
0x3e7e   :  { %3732 = vmatpush3.bf16.msra.mxu1 %v4749_v5 }
0x3e7f   :  { %3745 = vmatprep.subr.bf16.mxu1 %v4055_v1 }
0x3e87   :  { %v3960_v52 = vpop.eup %3959 }
0x3e88   :  { %2388 = vrot.lane.b32.xlu0 %v3960_v52, %s4052_s8 }
0x3e8c   :  { %2159 = vrot.lane.b32.xlu0 %v4694_v10, %s4058_s16 }
0x3e90   :  { %2315 = vrot.lane.b32.xlu0 %v4736_v62, %s4058_s16 }
0x3efa   :  { %v2389_v57 = vpop.permute.xlu0 %2388 }
0x3efb   :  { %v2391_v31 = vmul.f32 %v3956_v46, %v2389_v57 }
0x3efe   :  { %v2160_v45 = vpop.permute.xlu0 %2159 }
0x3eff   :  { %2162 = vst.msk [vmem:[#allocation3 + $0x20] sm:$0xff] %vm54_vm0, %v2160_v45  ;;  %v2497_v45 = vadd.f32 %v4769_v33, %v4778_v36 }
0x3f02   :  { %v2316_v15 = vpop.permute.xlu0 %2315 }
0x3f03   :  { %2318 = vst.msk [vmem:[#allocation3 + $0x30] sm:$0xff] %vm54_vm0, %v2316_v15 }
0x3f06   :  { %v2413_v24 = vld [vmem:[#allocation3 + $0x20] sm:$0xff] }
0x3f4c   :  { %v2644_v61 = vpop.f32.mrb[64].mxu1 }
0x3f4d   :  { %v2645_v34 = vadd.f32 %v2644_v61, %v2489_v63  ;;  %v3719_v0 = vpop.f32.mrb[65].mxu1 }
0x3f4e   :  { %v2647_v47 = vpop.f32.mrb[66].mxu1 }
0x3f4f   :  { %v3318_v50 = vmul.f32 -1.442695, %v2645_v34  ;;  %v3720_v4 = vpop.f32.mrb[67].mxu1 }
0x3f51   :  { %3961 = vpow2.f32 %v3318_v50 }
0x3f5b   :  { %v3962_v10 = vpop.eup %3961 }
0x3f5c   :  { %v2653_v2 = vadd.f32 1.0, %v3962_v10 }
0x3f5e   :  { %3963 = vrcp.f32 %v2653_v2 }
0x3f68   :  { %v3964_v62 = vpop.eup %3963 }
0x3f69   :  { %v2656_v3 = vmul.f32 2.0, %v3964_v62  ;;  %v2658_v42 = vmul.f32 %v3964_v62, %v2595_v59 }
0x3f6b   :  { %v3319_v11 = vadd.f32 -1.0, %v2656_v3 }
0x3f6d   :  { %2660 = vrot.lane.b32.xlu1 %v3319_v11, %s4052_s8 }
0x3fdf   :  { %v2661_v12 = vpop.permute.xlu1 %2660 }
0x3fe0   :  { %v2663_v22 = vmul.f32 %v3964_v62, %v2661_v12 }
0x3fe2   :  { %2665 = vrot.lane.b32.xlu1 %v2663_v22, %s4058_s16 }
0x4054   :  { %v2666_v44 = vpop.permute.xlu1 %2665 }
0x4055   :  { %v2668_v13 = vadd.f32 %v2666_v44, %v2658_v42 }
0x4057   :  { %3965 = vtanh.f32 %v2668_v13 }
0x4061   :  { %v3966_v14 = vpop.eup %3965 }
0x4062   :  { %2671 = vrot.lane.b32.xlu1 %v3966_v14, %s4052_s8 }
0x4066   :  { %2237 = vrot.lane.b32.xlu1 %v4711_v30, %s4058_s16  ;;  %v2415_v30 = vld [vmem:[#allocation3 + $0x30] sm:$0xff] }
0x406a   :  { %2393 = vrot.lane.b32.xlu1 %v2391_v31, %s4058_s16 }
0x40d4   :  { %v2672_v28 = vpop.permute.xlu1 %2671 }
0x40d5   :  { %v2674_v21 = vmul.f32 %v3964_v62, %v2672_v28 }
0x40d7   :  { %v2675_v37 = vpack.c.bf16 %v2674_v21, %v2674_v21 }
0x40d8   :  { %v2238_v23 = vpop.permute.xlu1 %2237 }
0x40d9   :  { %2240 = vst.msk [vmem:[#allocation3 + $0x28] sm:$0xff] %vm54_vm0, %v2238_v23  ;;  %2678 = vrot.lane.b32.xlu0 %v2675_v37, %s4058_s16 }
0x40dc   :  { %v2394_v29 = vpop.permute.xlu1 %2393 }
0x40dd   :  { %2396 = vst.msk [vmem:[#allocation3 + $0x38] sm:$0xff] %vm54_vm0, %v2394_v29 }
0x40e0   :  { %v2414_v60 = vld [vmem:[#allocation3 + $0x28] sm:$0xff] }
0x40e1   :  { %v2419_v17 = vpack.c.bf16 %v2414_v60, %v2413_v24 }
0x40e3   :  { %3701 = vmatprep.mubr.msk.bf16.mxu0 %vm54_vm0, %v2419_v17 }
0x40e4   :  { %v2416_v48 = vld [vmem:[#allocation3 + $0x38] sm:$0xff] }
0x40e5   :  { %v2420_v58 = vpack.c.bf16 %v2416_v48, %v2415_v30 }
0x40e7   :  { %3702 = vmatmul.mubr.msk.bf16.gmra.mrb[64].mxu0 %vm54_vm0, %v2420_v58 }
0x40e8   :  { %3725 = vmatprep.mubr.msk.bf16.mxu0 %vm4056_vm1, %v4055_v1 }
0x414b   :  { %v2679_v9 = vpop.permute.xlu0 %2678 }
0x414c   :  { %3726 = vmatmul.mubr.msk.bf16.vlgmr.msra.gmra.mrb[68].mxu0 %vm54_vm0, %v2679_v9 }
0x414d   :  { %3738 = vmatpush3.bf16.msra.mxu0 %v4744_v8  ;;  %3741 = vmatprep.mubr.msk.bf16.mxu0 %vm4056_vm1, %v4055_v1 }
0x414e   :  { %3739 = vmatprep.subr.bf16.mxu0 %v4055_v1 }
0x4151   :  { %3740 = vmatpush3.bf16.msra.mxu0 %v4749_v5 }
0x4152   :  { %3753 = vmatprep.subr.bf16.mxu0 %v4055_v1 }
0x41ba   :  { %v4824_v6 = vpop.f32.mrb[64].mxu0 }
0x41bb   :  { %v4826_v25 = vpop.f32.mrb[65].mxu0 }
0x41bc   :  { %v4828_v26 = vpop.f32.mrb[66].mxu0  ;;  %v2502_v28 = vadd.f32 %v4778_v36, %v4826_v25 }
0x41bd   :  { %v4830_v20 = vpop.f32.mrb[67].mxu0 }
0x421f   :  { %v2717_v35 = vpop.f32.mrb[68].mxu0 }
0x4220   :  { %v2718_v39 = vadd.f32 %v2717_v35, %v2494_v32  ;;  %v3727_v41 = vpop.f32.mrb[69].mxu0 }
0x4221   :  { %v2720_v38 = vpop.f32.mrb[70].mxu0 }
0x4222   :  { %v3321_v59 = vmul.f32 -1.442695, %v2718_v39  ;;  %v3728_v46 = vpop.f32.mrb[71].mxu0 }
0x4224   :  { %3967 = vpow2.f32 %v3321_v59 }
0x422e   :  { %v3968_v53 = vpop.eup %3967 }
0x422f   :  { %v2726_v55 = vadd.f32 1.0, %v3968_v53 }
0x4231   :  { %3969 = vrcp.f32 %v2726_v55 }
0x423b   :  { %v3970_v49 = vpop.eup %3969 }
0x423c   :  { %v2729_v56 = vmul.f32 2.0, %v3970_v49  ;;  %v2731_v16 = vmul.f32 %v3970_v49, %v2668_v13 }
0x423e   :  { %v3322_v51 = vadd.f32 -1.0, %v2729_v56 }
0x4240   :  { %2733 = vrot.lane.b32.xlu1 %v3322_v51, %s4052_s8 }
0x42b2   :  { %v2734_v19 = vpop.permute.xlu1 %2733 }
0x42b3   :  { %v2736_v43 = vmul.f32 %v3970_v49, %v2734_v19 }
0x42b5   :  { %2738 = vrot.lane.b32.xlu0 %v2736_v43, %s4058_s16 }
0x4327   :  { %v2739_v54 = vpop.permute.xlu0 %2738 }
0x4328   :  { %v2741_v40 = vadd.f32 %v2739_v54, %v2731_v16 }
0x432a   :  { %3971 = vtanh.f32 %v2741_v40 }
0x4334   :  { %v3972_v7 = vpop.eup %3971 }
0x4335   :  { %2744 = vrot.lane.b32.xlu1 %v3972_v7, %s4052_s8 }
0x43a7   :  { %v2745_v18 = vpop.permute.xlu1 %2744 }
0x43a8   :  { %v2747_v27 = vmul.f32 %v3970_v49, %v2745_v18  ;;  %v2505_v49 = vadd.f32 %v4778_v36, %v4830_v20 }
0x43aa   :  { %v2748_v52 = vpack.c.bf16 %v2747_v27, %v2747_v27 }
0x43ac   :  { %2751 = vrot.lane.b32.xlu0 %v2748_v52, %s4058_s16 }
0x441e   :  { %v2752_v57 = vpop.permute.xlu0 %2751 }
0x441f   :  { %3734 = vmatmul.mubr.msk.bf16.vlgmr.msra.gmra.mrb[68].mxu1 %vm54_vm0, %v2752_v57 }
0x4420   :  { %3746 = vmatpush3.bf16.msra.mxu1 %v4744_v8  ;;  %3749 = vmatprep.mubr.msk.bf16.mxu1 %vm4056_vm1, %v4055_v1 }
0x4421   :  { %3747 = vmatprep.subr.bf16.mxu1 %v4055_v1 }
0x4424   :  { %3748 = vmatpush3.bf16.msra.mxu1 %v4749_v5 }
0x4425   :  { %3761 = vmatprep.subr.bf16.mxu1 %v4055_v1 }
0x44f2   :  { %v2790_v15 = vpop.f32.mrb[68].mxu1 }
0x44f3   :  { %v2791_v63 = vadd.f32 %v2790_v15, %v2497_v45  ;;  %v3735_v61 = vpop.f32.mrb[69].mxu1 }
0x44f4   :  { %v2793_v34 = vpop.f32.mrb[70].mxu1 }
0x44f5   :  { %v3324_v0 = vmul.f32 -1.442695, %v2791_v63  ;;  %v3736_v47 = vpop.f32.mrb[71].mxu1 }
0x44f6   :  { %v2510_v47 = vadd.f32 %v4824_v6, %v4778_v36 }
0x44f7   :  { %3973 = vpow2.f32 %v3324_v0 }
0x4501   :  { %v3974_v50 = vpop.eup %3973 }
0x4502   :  { %v2799_v4 = vadd.f32 1.0, %v3974_v50 }
0x4504   :  { %3975 = vrcp.f32 %v2799_v4 }
0x450e   :  { %v3976_v10 = vpop.eup %3975 }
0x450f   :  { %v2802_v2 = vmul.f32 2.0, %v3976_v10  ;;  %v2804_v33 = vmul.f32 %v3976_v10, %v2741_v40 }
0x4511   :  { %v3325_v62 = vadd.f32 -1.0, %v2802_v2 }
0x4513   :  { %2806 = vrot.lane.b32.xlu1 %v3325_v62, %s4052_s8 }
0x4585   :  { %v2807_v3 = vpop.permute.xlu1 %2806 }
0x4586   :  { %v2809_v11 = vmul.f32 %v3976_v10, %v2807_v3 }
0x4588   :  { %2811 = vrot.lane.b32.xlu0 %v2809_v11, %s4058_s16 }
0x45fa   :  { %v2812_v12 = vpop.permute.xlu0 %2811 }
0x45fb   :  { %v2814_v22 = vadd.f32 %v2812_v12, %v2804_v33 }
0x45fd   :  { %3977 = vtanh.f32 %v2814_v22 }
0x4607   :  { %v3978_v42 = vpop.eup %3977 }
0x4608   :  { %2817 = vrot.lane.b32.xlu1 %v3978_v42, %s4052_s8 }
0x467a   :  { %v2818_v44 = vpop.permute.xlu1 %2817 }
0x467b   :  { %v2820_v13 = vmul.f32 %v3976_v10, %v2818_v44 }
0x467d   :  { %v2821_v14 = vpack.c.bf16 %v2820_v13, %v2820_v13 }
0x467f   :  { %2824 = vrot.lane.b32.xlu0 %v2821_v14, %s4058_s16 }
0x46f1   :  { %v2825_v31 = vpop.permute.xlu0 %2824 }
0x46f2   :  { %3742 = vmatmul.mubr.msk.bf16.vlgmr.msra.gmra.mrb[72].mxu0 %vm54_vm0, %v2825_v31 }
0x46f3   :  { %3754 = vmatpush3.bf16.msra.mxu0 %v4744_v8  ;;  %3757 = vmatprep.mubr.msk.bf16.mxu0 %vm4056_vm1, %v4055_v1 }
0x46f4   :  { %3755 = vmatprep.subr.bf16.mxu0 %v4055_v1 }
0x46f7   :  { %3756 = vmatpush3.bf16.msra.mxu0 %v4749_v5 }
0x47c5   :  { %v2863_v21 = vpop.f32.mrb[72].mxu0 }
0x47c6   :  { %v2864_v37 = vadd.f32 %v2863_v21, %v2502_v28  ;;  %v3743_v23 = vpop.f32.mrb[73].mxu0 }
0x47c7   :  { %v2866_v29 = vpop.f32.mrb[74].mxu0 }
0x47c8   :  { %v3327_v24 = vmul.f32 -1.442695, %v2864_v37  ;;  %v3744_v60 = vpop.f32.mrb[75].mxu0  ;;  %v2513_v29 = vadd.f32 %v4828_v26, %v4778_v36 }
0x47ca   :  { %3979 = vpow2.f32 %v3327_v24 }
0x47d4   :  { %v3980_v17 = vpop.eup %3979 }
0x47d5   :  { %v2872_v30 = vadd.f32 1.0, %v3980_v17 }
0x47d7   :  { %3981 = vrcp.f32 %v2872_v30 }
0x47e1   :  { %v3982_v48 = vpop.eup %3981 }
0x47e2   :  { %v2875_v58 = vmul.f32 2.0, %v3982_v48  ;;  %v2877_v25 = vmul.f32 %v3982_v48, %v2814_v22 }
0x47e4   :  { %v3328_v9 = vadd.f32 -1.0, %v2875_v58 }
0x47e6   :  { %2879 = vrot.lane.b32.xlu1 %v3328_v9, %s4052_s8 }
0x4858   :  { %v2880_v32 = vpop.permute.xlu1 %2879 }
0x4859   :  { %v2882_v35 = vmul.f32 %v3982_v48, %v2880_v32 }
0x485b   :  { %2884 = vrot.lane.b32.xlu0 %v2882_v35, %s4058_s16 }
0x48cd   :  { %v2885_v39 = vpop.permute.xlu0 %2884 }
0x48ce   :  { %v2887_v41 = vadd.f32 %v2885_v39, %v2877_v25 }
0x48d0   :  { %3983 = vtanh.f32 %v2887_v41 }
0x48da   :  { %v3984_v38 = vpop.eup %3983 }
0x48db   :  { %2890 = vrot.lane.b32.xlu1 %v3984_v38, %s4052_s8 }
0x494d   :  { %v2891_v59 = vpop.permute.xlu1 %2890 }
0x494e   :  { %v2893_v46 = vmul.f32 %v3982_v48, %v2891_v59 }
0x4950   :  { %v2894_v53 = vpack.c.bf16 %v2893_v46, %v2893_v46  ;;  %v3113_v46 = vld [vmem:[%s4911_s4] sm:$0xff] }
0x4952   :  { %2897 = vrot.lane.b32.xlu0 %v2894_v53, %s4058_s16  ;;  %v3114_v53 = vld [vmem:[%s4911_s4 + $0x8] sm:$0xff] }
0x49c4   :  { %v2898_v55 = vpop.permute.xlu0 %2897 }
0x49c5   :  { %3750 = vmatmul.mubr.msk.bf16.vlgmr.msra.gmra.mrb[72].mxu1 %vm54_vm0, %v2898_v55  ;;  %v3115_v55 = vld [vmem:[%s4911_s4 + $0x10] sm:$0xff] }
0x49c6   :  { %3762 = vmatpush3.bf16.msra.mxu1 %v4744_v8  ;;  %3765 = vmatprep.mubr.msk.bf16.mxu1 %vm4056_vm1, %v4055_v1 }
0x49c7   :  { %3763 = vmatprep.subr.bf16.mxu1 %v4055_v1 }
0x49ca   :  { %3764 = vmatpush3.bf16.msra.mxu1 %v4749_v5 }
0x4a98   :  { %v2936_v56 = vpop.f32.mrb[72].mxu1 }
0x4a99   :  { %v2937_v51 = vadd.f32 %v2936_v56, %v2505_v49  ;;  %v3751_v19 = vpop.f32.mrb[73].mxu1  ;;  %v4059_v49 = vmov 0.0|0.0   ;;  %v3781_v56 = vpack.c.bf16 %v3114_v53, %v3113_v46 }
0x4a9a   :  { %v2939_v43 = vpop.f32.mrb[74].mxu1  ;;  %3780 = vmatprep.subr.bf16.mxu0 %v4059_v49 }
0x4a9b   :  { %v3330_v16 = vmul.f32 -1.442695, %v2937_v51  ;;  %v3752_v54 = vpop.f32.mrb[75].mxu1  ;;  %v3116_v51 = vld [vmem:[%s4911_s4 + $0x18] sm:$0xff] }
0x4a9c   :  { %v3784_v19 = vpack.c.bf16 %v3116_v51, %v3115_v55 }
0x4a9d   :  { %3985 = vpow2.f32 %v3330_v16 }
0x4aa7   :  { %v3986_v40 = vpop.eup %3985 }
0x4aa8   :  { %v2945_v7 = vadd.f32 1.0, %v3986_v40 }
0x4aaa   :  { %3987 = vrcp.f32 %v2945_v7  ;;  %v3338_v7 = vld [vmem:[#allocation4] ss:$0 sm:$0xff] }
0x4ab4   :  { %v3988_v8 = vpop.eup %3987 }
0x4ab5   :  { %v2948_v18 = vmul.f32 2.0, %v3988_v8  ;;  %v2950_v20 = vmul.f32 %v3988_v8, %v2887_v41 }
0x4ab7   :  { %v3331_v27 = vadd.f32 -1.0, %v2948_v18 }
0x4ab9   :  { %2952 = vrot.lane.b32.xlu1 %v3331_v27, %s4052_s8 }
0x4b2b   :  { %v2953_v52 = vpop.permute.xlu1 %2952 }
0x4b2c   :  { %v2955_v5 = vmul.f32 %v3988_v8, %v2953_v52 }
0x4b2e   :  { %2957 = vrot.lane.b32.xlu0 %v2955_v5, %s4058_s16 }
0x4ba0   :  { %v2958_v57 = vpop.permute.xlu0 %2957 }
0x4ba1   :  { %v2960_v45 = vadd.f32 %v2958_v57, %v2950_v20 }
0x4ba3   :  { %3989 = vtanh.f32 %v2960_v45 }
0x4bad   :  { %v3990_v15 = vpop.eup %3989 }
0x4bae   :  { %2963 = vrot.lane.b32.xlu1 %v3990_v15, %s4052_s8 }
0x4c20   :  { %v2964_v63 = vpop.permute.xlu1 %2963 }
0x4c21   :  { %v2966_v61 = vmul.f32 %v3988_v8, %v2964_v63 }
0x4c23   :  { %v2967_v34 = vpack.c.bf16 %v2966_v61, %v2966_v61 }
0x4c25   :  { %2970 = vrot.lane.b32.xlu0 %v2967_v34, %s4058_s16 }
0x4c97   :  { %v2971_v0 = vpop.permute.xlu0 %2970 }
0x4c98   :  { %3758 = vmatmul.mubr.msk.bf16.vlgmr.msra.gmra.mrb[76].mxu0 %vm54_vm0, %v2971_v0 }
0x4c99   :  { %3777 = vmatprep.mubr.msk.f32.mxu0 %vm4056_vm1, %v4055_v1  ;;  %3782 = vmatpush3.bf16.msra.mxu0 %v3781_v56 }
0x4c9a   :  { %3783 = vmatprep.subr.bf16.mxu0 %v4059_v49 }
0x4c9d   :  { %3785 = vmatpush3.bf16.msra.mxu0 %v3784_v19 }
0x4d6b   :  { %v3009_v50 = vpop.f32.mrb[76].mxu0 }
0x4d6c   :  { %v3010_v4 = vadd.f32 %v3009_v50, %v2510_v47  ;;  %v3759_v10 = vpop.f32.mrb[77].mxu0 }
0x4d6d   :  { %v3012_v2 = vpop.f32.mrb[78].mxu0 }
0x4d6e   :  { %v3333_v62 = vmul.f32 -1.442695, %v3010_v4  ;;  %v3760_v3 = vpop.f32.mrb[79].mxu0 }
0x4d70   :  { %3991 = vpow2.f32 %v3333_v62 }
0x4d7a   :  { %v3992_v11 = vpop.eup %3991 }
0x4d7b   :  { %v3018_v33 = vadd.f32 1.0, %v3992_v11 }
0x4d7d   :  { %3993 = vrcp.f32 %v3018_v33 }
0x4d87   :  { %v3994_v12 = vpop.eup %3993 }
0x4d88   :  { %v3021_v22 = vmul.f32 2.0, %v3994_v12  ;;  %v3023_v6 = vmul.f32 %v3994_v12, %v2960_v45 }
0x4d8a   :  { %v3334_v42 = vadd.f32 -1.0, %v3021_v22 }
0x4d8c   :  { %3025 = vrot.lane.b32.xlu1 %v3334_v42, %s4052_s8 }
0x4dfe   :  { %v3026_v44 = vpop.permute.xlu1 %3025 }
0x4dff   :  { %v3028_v1 = vmul.f32 %v3994_v12, %v3026_v44 }
0x4e01   :  { %3030 = vrot.lane.b32.xlu0 %v3028_v1, %s4058_s16 }
0x4e73   :  { %v3031_v13 = vpop.permute.xlu0 %3030 }
0x4e74   :  { %v3033_v14 = vadd.f32 %v3031_v13, %v3023_v6 }
0x4e76   :  { %3995 = vtanh.f32 %v3033_v14 }
0x4e80   :  { %v3996_v31 = vpop.eup %3995 }
0x4e81   :  { %3036 = vrot.lane.b32.xlu1 %v3996_v31, %s4052_s8 }
0x4ef3   :  { %v3037_v28 = vpop.permute.xlu1 %3036 }
0x4ef4   :  { %v3039_v21 = vmul.f32 %v3994_v12, %v3037_v28 }
0x4ef6   :  { %v3040_v37 = vpack.c.bf16 %v3039_v21, %v3039_v21 }
0x4ef8   :  { %3043 = vrot.lane.b32.xlu0 %v3040_v37, %s4058_s16 }
0x4f6a   :  { %v3044_v23 = vpop.permute.xlu0 %3043 }
0x4f6b   :  { %3766 = vmatmul.mubr.msk.bf16.vlgmr.msra.gmra.mrb[76].mxu1 %vm54_vm0, %v3044_v23 }
0x503e   :  { %v3082_v24 = vpop.f32.mrb[76].mxu1 }
0x503f   :  { %v3083_v60 = vadd.f32 %v3082_v24, %v2513_v29  ;;  %v3767_v17 = vpop.f32.mrb[77].mxu1 }
0x5040   :  { %v3085_v30 = vpop.f32.mrb[78].mxu1 }
0x5041   :  { %v3336_v48 = vmul.f32 -1.442695, %v3083_v60  ;;  %v3768_v58 = vpop.f32.mrb[79].mxu1 }
0x5043   :  { %3997 = vpow2.f32 %v3336_v48 }
0x504d   :  { %v3998_v9 = vpop.eup %3997 }
0x504e   :  { %v3091_v32 = vadd.f32 1.0, %v3998_v9 }
0x5050   :  { %3999 = vrcp.f32 %v3091_v32 }
0x505a   :  { %v4000_v35 = vpop.eup %3999 }
0x505b   :  { %v3094_v25 = vmul.f32 2.0, %v4000_v35  ;;  %v3096_v36 = vmul.f32 %v4000_v35, %v3033_v14 }
0x505d   :  { %v3337_v39 = vadd.f32 -1.0, %v3094_v25 }
0x505f   :  { %3098 = vrot.lane.b32.xlu1 %v3337_v39, %s4052_s8 }
0x50d1   :  { %v3099_v41 = vpop.permute.xlu1 %3098 }
0x50d2   :  { %v3101_v38 = vmul.f32 %v4000_v35, %v3099_v41 }
0x50d4   :  { %3103 = vrot.lane.b32.xlu0 %v3101_v38, %s4058_s16 }
0x5146   :  { %v3104_v26 = vpop.permute.xlu0 %3103 }
0x5147   :  { %v3106_v59 = vadd.f32 %v3104_v26, %v3096_v36 }
0x5149   :  { %4001 = vtanh.f32 %v3106_v59 }
0x5153   :  { %v4002_v43 = vpop.eup %4001 }
0x5154   :  { %3109 = vrot.lane.b32.xlu1 %v4002_v43, %s4052_s8 }
0x51c6   :  { %v3110_v16 = vpop.permute.xlu1 %3109 }
0x51c7   :  { %v3112_v54 = vmul.f32 %v4000_v35, %v3110_v16 }
0x51c9   :  { %3125 = vrot.lane.b32.xlu0 %v3112_v54, %s4058_s16 }
0x523b   :  { %v3126_v40 = vpop.permute.xlu0 %3125 }
0x523c   :  { %3778 = vmatmul.mubr.msk.f32.vlgmr.msra.gmra.mrb[80].mxu0 %vm54_vm0, %v3126_v40 }
0x530f   :  { %v3195_v8 = vpop.f32.mrb[80].mxu0 }
0x5310   :  { %v3196_v18 = vadd.f32 %v3338_v7, %v3195_v8  ;;  %v3779_v27 = vpop.f32.mrb[81].mxu0 }
0x5312   :  { %3200 = vst.msk [vmem:[%s4913_s6] sm:$0x3] %vm3199_vm4, %v3196_v18 }
0x5313   :  { %3205 = vsyncpa [#allocation6], 1 }
0x5314   :  { %3206 = vsyncpa [#allocation8], 1 }

</bundles_post_ra>
